<compile_context>
chip_gen: v6e
topology: v6e:2x2x1
jax: 0.10.0
libtpu: 0.0.40
codegen_flags: <defaults>
</compile_context>

<pallas_src>
import functools

import numpy as np

import jax
import jax.numpy as jnp
from jax.experimental import pallas as pl
from jax.experimental.pallas import tpu as pltpu


# --------------------------------------------------------------- constants --
def _upsample_matrix(h_in, w_in, batch):
    """0/1 selection matrix for 2x nearest upsample in (C, pixel*B + b) layout."""
    h_out, w_out = 2 * h_in, 2 * w_in
    n_out = h_out * w_out * batch
    j = np.arange(n_out)
    b = j % batch
    q = j // batch
    w1 = q % w_out
    h1 = q // w_out
    i = ((h1 // 2) * w_in + (w1 // 2)) * batch + b
    u = np.zeros((h_in * w_in * batch, n_out), np.float32)
    u[i, j] = 1.0
    return u


def _border_masks(h, w, batch):
    """(9, H*W*B) 0/1 masks: tap t = ky*3+kx is valid iff the shifted source
    pixel lies inside the image (3x3 conv, zero padding)."""
    n = h * w * batch
    col = np.arange(n)
    p = col // batch
    hh = p // w
    ww = p % w
    m = np.zeros((9, n), np.float32)
    for t in range(9):
        dy, dx = t // 3 - 1, t % 3 - 1
        ok = (hh + dy >= 0) & (hh + dy < h) & (ww + dx >= 0) & (ww + dx < w)
        m[t] = ok.astype(np.float32)
    return m


def _vmem_limit_bytes(est):
    """Generation-aware scoped-VMEM request (stays below v7x's 64 MiB physical)."""
    if est <= 12 * (1 << 20):
        return None  # default scoped limit is plenty
    try:
        cap = pltpu.get_tpu_info().vmem_capacity_bytes - (16 << 20)
    except Exception:
        cap = 48 << 20
    return int(min(int(est), cap))


# ---------------------------------------------------------------- kernels ---
def _linear_kernel(w_ref, z_ref, b_ref, o_ref):
    """out0^T[(c,p), b] = sum_k W[(c,p), k] * z[b, k] + bias[(c,p)]."""
    zb = z_ref[...].astype(w_ref.dtype)
    o_ref[...] = jax.lax.dot_general(
        w_ref[...], zb,
        dimension_numbers=(((1,), (1,)), ((), ())),
        preferred_element_type=jnp.float32) + b_ref[...]


def _conv_stack_kernel(x0_ref, u1_ref, u2_ref, m1_ref, m2_ref,
                       bn0_ref, bn1_ref, bn2_ref,
                       w1_ref, b1_ref, w2_ref, b2_ref, w3_ref, b3_ref,
                       out_ref,
                       taps1_ref, taps2_ref, taps3_ref,
                       *, width1, width2, batch, n0, n1, n2):
    def bn_affine(x, bn_ref, n, eps):
        # train-mode BatchNorm: biased batch statistics over all (pixel, b) cols
        inv_n = 1.0 / n
        mean = jnp.sum(x, axis=1, keepdims=True) * inv_n
        var = jnp.sum(x * x, axis=1, keepdims=True) * inv_n - mean * mean
        scale = bn_ref[:, 0:1] * jax.lax.rsqrt(var + eps)
        shift = bn_ref[:, 1:2] - mean * scale
        return x * scale + shift

    def leaky(x):
        return jnp.where(x > 0, x, 0.2 * x)

    def build_taps(xn, mask, taps_ref, width, cin, ncols):
        # 9 shifted copies of xn; the shift runs on the XLU (pltpu.roll), the
        # precomputed border mask zeroes zero-padding positions and any roll
        # wrap-around, and every store is full-width / sublane-aligned.
        for t in range(9):
            dy, dx = t // 3 - 1, t % 3 - 1
            shift = (-(dy * width + dx) * batch) % ncols
            shifted = xn if shift == 0 else pltpu.roll(xn, shift, axis=1)
            taps_ref[t * cin:(t + 1) * cin, :] = (
                shifted * mask[t:t + 1, :]).astype(taps_ref.dtype)

    # ---- stage 1: BN(1e-5) -> Upsample(2x) -> Conv3x3(c2 -> c2) + bias ------
    x0 = x0_ref[...]
    c2 = x0.shape[0]
    xn0 = bn_affine(x0, bn0_ref, n0, 1e-5)
    up1 = jnp.dot(xn0, u1_ref[...], preferred_element_type=jnp.float32)
    ncols1 = up1.shape[1]
    m1 = m1_ref[...]
    build_taps(up1, m1, taps1_ref, width1, c2, ncols1)
    y1 = jnp.dot(w1_ref[...], taps1_ref[...],
                 preferred_element_type=jnp.float32) + b1_ref[...]

    # ---- stage 2: BN(0.8) -> LeakyReLU -> Upsample(2x) -> Conv3x3(c2 -> ngf) -
    xn1 = leaky(bn_affine(y1, bn1_ref, n1, 0.8))
    up2 = jnp.dot(xn1, u2_ref[...], preferred_element_type=jnp.float32)
    ncols2 = up2.shape[1]
    m2 = m2_ref[...]
    build_taps(up2, m2, taps2_ref, width2, c2, ncols2)
    y2 = jnp.dot(w2_ref[...], taps2_ref[...],
                 preferred_element_type=jnp.float32) + b2_ref[...]

    # ---- stage 3: BN(0.8) -> LeakyReLU -> Conv3x3(ngf -> nc) -> Tanh --------
    ngf = y2.shape[0]
    xn2 = leaky(bn_affine(y2, bn2_ref, n2, 0.8))
    build_taps(xn2, m2, taps3_ref, width2, ngf, ncols2)
    y3 = jnp.dot(w3_ref[...], taps3_ref[...],
                 preferred_element_type=jnp.float32) + b3_ref[...]
    out_ref[...] = jnp.tanh(y3)


# ----------------------------------------------------------------- forward --
def dcgen_forward(z, kp, *, ngf, nc, img_size):
    B, _ = z.shape
    s = img_size // 4
    ss = s * s
    c2 = 2 * ngf
    L = c2 * ss
    H1 = W1 = img_size // 2
    H2 = W2 = img_size
    R1, R2 = H1 * W1, H2 * W2
    N1, N2 = R1 * B, R2 * B

    # trace-time constants (numpy -> HLO constants; no runtime dispatches)
    u1 = jnp.asarray(_upsample_matrix(s, s, B))       # (ss*B, N1) f32
    u2 = jnp.asarray(_upsample_matrix(H1, W1, B))     # (N1,   N2) f32
    m1 = jnp.asarray(_border_masks(H1, W1, B))        # (9, N1) f32
    m2 = jnp.asarray(_border_masks(H2, W2, B))        # (9, N2) f32

    # ---- kernel 1: Linear.  Output kept (L, B) so that the reshape to the
    # channel-major, batch-minor layout (c2, ss*B) is a free row-major reshape.
    out0 = pl.pallas_call(
        _linear_kernel,
        out_shape=jax.ShapeDtypeStruct((L, B), jnp.float32),
    )(kp["l1_w"], z, kp["l1_b"])
    x0 = out0.reshape(c2, ss * B)

    # ---- kernel 2: the whole fused conv stack -------------------------------
    kern = functools.partial(
        _conv_stack_kernel, width1=W1, width2=W2, batch=B,
        n0=float(B * ss), n1=float(B * R1), n2=float(B * R2))

    scratch = [pltpu.VMEM((9 * c2, N1), jnp.bfloat16),
               pltpu.VMEM((9 * c2, N2), jnp.bfloat16),
               pltpu.VMEM((9 * ngf, N2), jnp.bfloat16)]
    inputs = (x0, u1, u2, m1, m2, kp["bn0"], kp["bn1"], kp["bn2"],
              kp["conv1_w"], kp["conv1_b"], kp["conv2_w"], kp["conv2_b"],
              kp["conv3_w"], kp["conv3_b"])
    est = (sum(a.size * a.dtype.itemsize for a in inputs)
           + 2 * (9 * c2 * N1 + 9 * c2 * N2 + 9 * ngf * N2)
           + 4 * nc * N2 + (2 << 20))
    lim = _vmem_limit_bytes(est)
    cparams = pltpu.CompilerParams(vmem_limit_bytes=lim) if lim else None

    img = pl.pallas_call(
        kern,
        out_shape=jax.ShapeDtypeStruct((nc, N2), jnp.float32),
        scratch_shapes=scratch,
        compiler_params=cparams,
    )(*inputs)

    # (nc, (h*W2 + w)*B + b) -> (B, nc, H2, W2): tiny wrapper-side transpose
    return img.reshape(nc, H2, W2, B).transpose(3, 0, 1, 2)


# --------------------------------------------------------------- params -----
def init_params(key, ngf, nz, nc, img_size):
    """Torch-convention parameter layouts (as in DCGen + weights_init_normal)."""
    s = img_size // 4
    c2 = 2 * ngf
    L = c2 * s * s
    ks = jax.random.split(key, 11)
    p = {}
    p["l1_w"] = 0.05 * jax.random.normal(ks[0], (L, nz), jnp.float32)
    p["l1_b"] = 0.05 * jax.random.normal(ks[1], (L,), jnp.float32)
    p["bn0_g"] = 1.0 + 0.02 * jax.random.normal(ks[2], (c2,), jnp.float32)
    p["bn0_b"] = jnp.zeros((c2,), jnp.float32)
    p["conv1_w"] = 0.02 * jax.random.normal(ks[3], (c2, c2, 3, 3), jnp.float32)
    p["conv1_b"] = 0.02 * jax.random.normal(ks[4], (c2,), jnp.float32)
    p["bn1_g"] = 1.0 + 0.02 * jax.random.normal(ks[5], (c2,), jnp.float32)
    p["bn1_b"] = jnp.zeros((c2,), jnp.float32)
    p["conv2_w"] = 0.02 * jax.random.normal(ks[6], (ngf, c2, 3, 3), jnp.float32)
    p["conv2_b"] = 0.02 * jax.random.normal(ks[7], (ngf,), jnp.float32)
    p["bn2_g"] = 1.0 + 0.02 * jax.random.normal(ks[8], (ngf,), jnp.float32)
    p["bn2_b"] = jnp.zeros((ngf,), jnp.float32)
    p["conv3_w"] = 0.02 * jax.random.normal(ks[9], (nc, ngf, 3, 3), jnp.float32)
    p["conv3_b"] = 0.02 * jax.random.normal(ks[10], (nc,), jnp.float32)
    return p


def prepare_params(p):
    """One-time repack of torch-layout params into kernel layouts (bf16 weights)."""
    def conv_w(w):  # (Cout, Cin, 3, 3) -> (Cout, 9*Cin), tap-major then cin
        co, ci = w.shape[0], w.shape[1]
        return jnp.transpose(w, (0, 2, 3, 1)).reshape(co, 9 * ci).astype(jnp.bfloat16)

    def col(v):
        return v.reshape(-1, 1).astype(jnp.float32)

    k = {}
    k["l1_w"] = p["l1_w"].astype(jnp.bfloat16)          # (L, nz) torch layout
    k["l1_b"] = col(p["l1_b"])                          # (L, 1)
    k["bn0"] = jnp.stack([p["bn0_g"], p["bn0_b"]], axis=-1)   # (C, 2) f32
    k["bn1"] = jnp.stack([p["bn1_g"], p["bn1_b"]], axis=-1)
    k["bn2"] = jnp.stack([p["bn2_g"], p["bn2_b"]], axis=-1)
    k["conv1_w"] = conv_w(p["conv1_w"]); k["conv1_b"] = col(p["conv1_b"])
    k["conv2_w"] = conv_w(p["conv2_w"]); k["conv2_b"] = col(p["conv2_b"])
    k["conv3_w"] = conv_w(p["conv3_w"]); k["conv3_b"] = col(p["conv3_b"])
    return k


# --------------------------------------------------------------- reference --
def dcgen_reference(z, p, *, img_size):
    """Plain-JAX f32 reference of the PyTorch module (train-mode BatchNorm)."""
    B = z.shape[0]
    s = img_size // 4
    c2 = p["bn0_g"].shape[0]
    x = (z @ p["l1_w"].T + p["l1_b"]).reshape(B, c2, s, s)

    def bn(x, g, b, eps):
        mean = jnp.mean(x, axis=(0, 2, 3), keepdims=True)
        var = jnp.mean((x - mean) ** 2, axis=(0, 2, 3), keepdims=True)
        return ((x - mean) * jax.lax.rsqrt(var + eps) * g.reshape(1, -1, 1, 1)
                + b.reshape(1, -1, 1, 1))

    def up(x):
        return jnp.repeat(jnp.repeat(x, 2, axis=2), 2, axis=3)

    def conv(x, w, b):
        y = jax.lax.conv_general_dilated(
            x, w, window_strides=(1, 1), padding=((1, 1), (1, 1)),
            dimension_numbers=("NCHW", "OIHW", "NCHW"))
        return y + b.reshape(1, -1, 1, 1)

    def leaky(x):
        return jnp.where(x > 0, x, 0.2 * x)

    x = conv(up(bn(x, p["bn0_g"], p["bn0_b"], 1e-5)), p["conv1_w"], p["conv1_b"])
    x = conv(up(leaky(bn(x, p["bn1_g"], p["bn1_b"], 0.8))), p["conv2_w"], p["conv2_b"])
    x = conv(leaky(bn(x, p["bn2_g"], p["bn2_b"], 0.8)), p["conv3_w"], p["conv3_b"])
    return jnp.tanh(x)


if __name__ == "__main__":
    # Small config consistent with the module: ngf=16, nz=32, img_shape=(3,16,16)
    NGF, NZ, NC, IMG, BATCH = 16, 32, 3, 16, 2

    key = jax.random.PRNGKey(0)
    pkey, zkey = jax.random.split(key)
    params = init_params(pkey, NGF, NZ, NC, IMG)
    kparams = prepare_params(params)
    z = jax.random.normal(zkey, (BATCH, NZ), jnp.float32)

    fwd = jax.jit(functools.partial(dcgen_forward, ngf=NGF, nc=NC, img_size=IMG))
    out = fwd(z, kparams)
    jax.block_until_ready(out)

    assert out.shape == (BATCH, NC, IMG, IMG), out.shape
    assert out.dtype == jnp.float32

    # numeric self-check against a plain-JAX f32 reference (bf16-weight tolerance)
    ref = jax.jit(functools.partial(dcgen_reference, img_size=IMG))(z, params)
    np.testing.assert_allclose(np.asarray(out), np.asarray(ref), atol=3e-2)

    print("KERNEL_OK")
</pallas_src>

<mosaic_0001>
module attributes {stable_mosaic.version = 11 : i64} {
  func.func @_linear_kernel(%arg0: memref<512x32xbf16, #tpu.memory_space<vmem>>, %arg1: memref<2x32xf32, #tpu.memory_space<vmem>>, %arg2: memref<512x1xf32, #tpu.memory_space<vmem>>, %arg3: memref<512x2xf32, #tpu.memory_space<vmem>>) attributes {dimension_semantics = [], scalar_prefetch = 0 : i64, scratch_operands = 0 : i64, tpu.core_type = #tpu.core_type<tc>} {
    %c0 = arith.constant 0 : index
    %c0_0 = arith.constant 0 : index
    %0 = vector.load %arg1[%c0, %c0_0] : memref<2x32xf32, #tpu.memory_space<vmem>>, vector<2x32xf32>
    %1 = arith.truncf %0 : vector<2x32xf32> to vector<2x32xbf16>
    %c0_1 = arith.constant 0 : index
    %c0_2 = arith.constant 0 : index
    %2 = vector.load %arg0[%c0_1, %c0_2] : memref<512x32xbf16, #tpu.memory_space<vmem>>, vector<512x32xbf16>
    %cst = arith.constant dense<0.000000e+00> : vector<512x2xf32>
    %3 = tpu.matmul %2, %1, %cst {dimension_numbers = #tpu.dot_dimension_numbers<[1], [1], [0], [0], [0, 0, 1, 0], [], []>} : vector<512x32xbf16>, vector<2x32xbf16>, vector<512x2xf32> -> vector<512x2xf32>
    %c0_3 = arith.constant 0 : index
    %c0_4 = arith.constant 0 : index
    %4 = vector.load %arg2[%c0_3, %c0_4] : memref<512x1xf32, #tpu.memory_space<vmem>>, vector<512x1xf32>
    %5 = vector.broadcast %4 : vector<512x1xf32> to vector<512x2xf32>
    %6 = arith.addf %3, %5 : vector<512x2xf32>
    %c0_5 = arith.constant 0 : index
    %c0_6 = arith.constant 0 : index
    %7 = vector.load %arg3[%c0_5, %c0_6] : memref<512x2xf32, #tpu.memory_space<vmem>>, vector<512x2xf32>
    tpu.vector_store %arg3[%c0_5, %c0_6], %6 {strides = array<i32>} : memref<512x2xf32, #tpu.memory_space<vmem>>, vector<512x2xf32>,
    return
  }
}

module attributes {stable_mosaic.version = 11 : i64} {
  func.func @_conv_stack_kernel(%arg0: memref<32x32xf32, #tpu.memory_space<vmem>>, %arg1: memref<32x128xf32, #tpu.memory_space<vmem>>, %arg2: memref<128x512xf32, #tpu.memory_space<vmem>>, %arg3: memref<9x128xf32, #tpu.memory_space<vmem>>, %arg4: memref<9x512xf32, #tpu.memory_space<vmem>>, %arg5: memref<32x2xf32, #tpu.memory_space<vmem>>, %arg6: memref<32x2xf32, #tpu.memory_space<vmem>>, %arg7: memref<16x2xf32, #tpu.memory_space<vmem>>, %arg8: memref<32x288xbf16, #tpu.memory_space<vmem>>, %arg9: memref<32x1xf32, #tpu.memory_space<vmem>>, %arg10: memref<16x288xbf16, #tpu.memory_space<vmem>>, %arg11: memref<16x1xf32, #tpu.memory_space<vmem>>, %arg12: memref<3x144xbf16, #tpu.memory_space<vmem>>, %arg13: memref<3x1xf32, #tpu.memory_space<vmem>>, %arg14: memref<3x512xf32, #tpu.memory_space<vmem>>, %arg15: memref<288x128xbf16, #tpu.memory_space<vmem>>, %arg16: memref<288x512xbf16, #tpu.memory_space<vmem>>, %arg17: memref<144x512xbf16, #tpu.memory_space<vmem>>) attributes {dimension_semantics = [], scalar_prefetch = 0 : i64, scratch_operands = 3 : i64, tpu.core_type = #tpu.core_type<tc>} {
    %c0 = arith.constant 0 : index
    %c0_0 = arith.constant 0 : index
    %0 = vector.load %arg0[%c0, %c0_0] : memref<32x32xf32, #tpu.memory_space<vmem>>, vector<32x32xf32>
    %cst = arith.constant dense<0.000000e+00> : vector<32xf32>
    %1 = vector.multi_reduction <add>, %0, %cst [1] : vector<32x32xf32> to vector<32xf32>
    %2 = vector.shape_cast %1 : vector<32xf32> to vector<32x1xf32>
    %cst_1 = arith.constant 3.125000e-02 : f32
    %3 = vector.broadcast %cst_1 : f32 to vector<32x1xf32>
    %4 = arith.mulf %2, %3 : vector<32x1xf32>
    %5 = arith.mulf %0, %0 : vector<32x32xf32>
    %cst_2 = arith.constant dense<0.000000e+00> : vector<32xf32>
    %6 = vector.multi_reduction <add>, %5, %cst_2 [1] : vector<32x32xf32> to vector<32xf32>
    %7 = vector.shape_cast %6 : vector<32xf32> to vector<32x1xf32>
    %cst_3 = arith.constant 3.125000e-02 : f32
    %8 = vector.broadcast %cst_3 : f32 to vector<32x1xf32>
    %9 = arith.mulf %7, %8 : vector<32x1xf32>
    %10 = arith.mulf %4, %4 : vector<32x1xf32>
    %11 = arith.subf %9, %10 : vector<32x1xf32>
    %c0_4 = arith.constant 0 : index
    %c0_5 = arith.constant 0 : index
    %12 = vector.load %arg5[%c0_4, %c0_5] : memref<32x2xf32, #tpu.memory_space<vmem>>, vector<32x1xf32>
    %cst_6 = arith.constant 9.99999974E-6 : f32
    %13 = vector.broadcast %cst_6 : f32 to vector<32x1xf32>
    %14 = arith.addf %11, %13 : vector<32x1xf32>
    %15 = math.rsqrt %14 : vector<32x1xf32>
    %16 = arith.mulf %12, %15 : vector<32x1xf32>
    %c0_7 = arith.constant 0 : index
    %c1 = arith.constant 1 : index
    %17 = vector.load %arg5[%c0_7, %c1] : memref<32x2xf32, #tpu.memory_space<vmem>>, vector<32x1xf32>
    %18 = arith.mulf %4, %16 : vector<32x1xf32>
    %19 = arith.subf %17, %18 : vector<32x1xf32>
    %20 = vector.broadcast %16 : vector<32x1xf32> to vector<32x32xf32>
    %21 = arith.mulf %0, %20 : vector<32x32xf32>
    %22 = vector.broadcast %19 : vector<32x1xf32> to vector<32x32xf32>
    %23 = arith.addf %21, %22 : vector<32x32xf32>
    %c0_8 = arith.constant 0 : index
    %c0_9 = arith.constant 0 : index
    %24 = vector.load %arg1[%c0_8, %c0_9] : memref<32x128xf32, #tpu.memory_space<vmem>>, vector<32x128xf32>
    %cst_10 = arith.constant dense<0.000000e+00> : vector<32x128xf32>
    %25 = tpu.matmul %23, %24, %cst_10 {dimension_numbers = #tpu.dot_dimension_numbers<[1], [0], [0], [1], [0, 0, 1, 1], [], []>} : vector<32x32xf32>, vector<32x128xf32>, vector<32x128xf32> -> vector<32x128xf32>
    %c0_11 = arith.constant 0 : index
    %c0_12 = arith.constant 0 : index
    %26 = vector.load %arg3[%c0_11, %c0_12] : memref<9x128xf32, #tpu.memory_space<vmem>>, vector<9x128xf32>
    %c18_i32 = arith.constant 18 : i32
    %27 = tpu.dynamic_rotate %25 by %c18_i32 dim 1 : vector<32x128xf32>, i32 -> vector<32x128xf32>
    %28 = vector.extract_strided_slice %26 {offsets = [0, 0], sizes = [1, 128], strides = [1, 1]} : vector<9x128xf32> to vector<1x128xf32>
    %29 = vector.broadcast %28 : vector<1x128xf32> to vector<32x128xf32>
    %30 = arith.mulf %27, %29 : vector<32x128xf32>
    %31 = arith.truncf %30 : vector<32x128xf32> to vector<32x128xbf16>
    %c0_13 = arith.constant 0 : index
    %c0_14 = arith.constant 0 : index
    %32 = vector.load %arg15[%c0_13, %c0_14] : memref<288x128xbf16, #tpu.memory_space<vmem>>, vector<32x128xbf16>
    tpu.vector_store %arg15[%c0_13, %c0_14], %31 {strides = array<i32>} : memref<288x128xbf16, #tpu.memory_space<vmem>>, vector<32x128xbf16>,
    %c16_i32 = arith.constant 16 : i32
    %33 = tpu.dynamic_rotate %25 by %c16_i32 dim 1 : vector<32x128xf32>, i32 -> vector<32x128xf32>
    %34 = vector.extract_strided_slice %26 {offsets = [1, 0], sizes = [1, 128], strides = [1, 1]} : vector<9x128xf32> to vector<1x128xf32>
    %35 = vector.broadcast %34 : vector<1x128xf32> to vector<32x128xf32>
    %36 = arith.mulf %33, %35 : vector<32x128xf32>
    %37 = arith.truncf %36 : vector<32x128xf32> to vector<32x128xbf16>
    %c32 = arith.constant 32 : index
    %c0_15 = arith.constant 0 : index
    %38 = vector.load %arg15[%c32, %c0_15] : memref<288x128xbf16, #tpu.memory_space<vmem>>, vector<32x128xbf16>
    tpu.vector_store %arg15[%c32, %c0_15], %37 {strides = array<i32>} : memref<288x128xbf16, #tpu.memory_space<vmem>>, vector<32x128xbf16>,
    %c14_i32 = arith.constant 14 : i32
    %39 = tpu.dynamic_rotate %25 by %c14_i32 dim 1 : vector<32x128xf32>, i32 -> vector<32x128xf32>
    %40 = vector.extract_strided_slice %26 {offsets = [2, 0], sizes = [1, 128], strides = [1, 1]} : vector<9x128xf32> to vector<1x128xf32>
    %41 = vector.broadcast %40 : vector<1x128xf32> to vector<32x128xf32>
    %42 = arith.mulf %39, %41 : vector<32x128xf32>
    %43 = arith.truncf %42 : vector<32x128xf32> to vector<32x128xbf16>
    %c64 = arith.constant 64 : index
    %c0_16 = arith.constant 0 : index
    %44 = vector.load %arg15[%c64, %c0_16] : memref<288x128xbf16, #tpu.memory_space<vmem>>, vector<32x128xbf16>
    tpu.vector_store %arg15[%c64, %c0_16], %43 {strides = array<i32>} : memref<288x128xbf16, #tpu.memory_space<vmem>>, vector<32x128xbf16>,
    %c2_i32 = arith.constant 2 : i32
    %45 = tpu.dynamic_rotate %25 by %c2_i32 dim 1 : vector<32x128xf32>, i32 -> vector<32x128xf32>
    %46 = vector.extract_strided_slice %26 {offsets = [3, 0], sizes = [1, 128], strides = [1, 1]} : vector<9x128xf32> to vector<1x128xf32>
    %47 = vector.broadcast %46 : vector<1x128xf32> to vector<32x128xf32>
    %48 = arith.mulf %45, %47 : vector<32x128xf32>
    %49 = arith.truncf %48 : vector<32x128xf32> to vector<32x128xbf16>
    %c96 = arith.constant 96 : index
    %c0_17 = arith.constant 0 : index
    %50 = vector.load %arg15[%c96, %c0_17] : memref<288x128xbf16, #tpu.memory_space<vmem>>, vector<32x128xbf16>
    tpu.vector_store %arg15[%c96, %c0_17], %49 {strides = array<i32>} : memref<288x128xbf16, #tpu.memory_space<vmem>>, vector<32x128xbf16>,
    %51 = vector.extract_strided_slice %26 {offsets = [4, 0], sizes = [1, 128], strides = [1, 1]} : vector<9x128xf32> to vector<1x128xf32>
    %52 = vector.broadcast %51 : vector<1x128xf32> to vector<32x128xf32>
    %53 = arith.mulf %25, %52 : vector<32x128xf32>
    %54 = arith.truncf %53 : vector<32x128xf32> to vector<32x128xbf16>
    %c128 = arith.constant 128 : index
    %c0_18 = arith.constant 0 : index
    %55 = vector.load %arg15[%c128, %c0_18] : memref<288x128xbf16, #tpu.memory_space<vmem>>, vector<32x128xbf16>
    tpu.vector_store %arg15[%c128, %c0_18], %54 {strides = array<i32>} : memref<288x128xbf16, #tpu.memory_space<vmem>>, vector<32x128xbf16>,
    %c126_i32 = arith.constant 126 : i32
    %56 = tpu.dynamic_rotate %25 by %c126_i32 dim 1 : vector<32x128xf32>, i32 -> vector<32x128xf32>
    %57 = vector.extract_strided_slice %26 {offsets = [5, 0], sizes = [1, 128], strides = [1, 1]} : vector<9x128xf32> to vector<1x128xf32>
    %58 = vector.broadcast %57 : vector<1x128xf32> to vector<32x128xf32>
    %59 = arith.mulf %56, %58 : vector<32x128xf32>
    %60 = arith.truncf %59 : vector<32x128xf32> to vector<32x128xbf16>
    %c160 = arith.constant 160 : index
    %c0_19 = arith.constant 0 : index
    %61 = vector.load %arg15[%c160, %c0_19] : memref<288x128xbf16, #tpu.memory_space<vmem>>, vector<32x128xbf16>
    tpu.vector_store %arg15[%c160, %c0_19], %60 {strides = array<i32>} : memref<288x128xbf16, #tpu.memory_space<vmem>>, vector<32x128xbf16>,
    %c114_i32 = arith.constant 114 : i32
    %62 = tpu.dynamic_rotate %25 by %c114_i32 dim 1 : vector<32x128xf32>, i32 -> vector<32x128xf32>
    %63 = vector.extract_strided_slice %26 {offsets = [6, 0], sizes = [1, 128], strides = [1, 1]} : vector<9x128xf32> to vector<1x128xf32>
    %64 = vector.broadcast %63 : vector<1x128xf32> to vector<32x128xf32>
    %65 = arith.mulf %62, %64 : vector<32x128xf32>
    %66 = arith.truncf %65 : vector<32x128xf32> to vector<32x128xbf16>
    %c192 = arith.constant 192 : index
    %c0_20 = arith.constant 0 : index
    %67 = vector.load %arg15[%c192, %c0_20] : memref<288x128xbf16, #tpu.memory_space<vmem>>, vector<32x128xbf16>
    tpu.vector_store %arg15[%c192, %c0_20], %66 {strides = array<i32>} : memref<288x128xbf16, #tpu.memory_space<vmem>>, vector<32x128xbf16>,
    %c112_i32 = arith.constant 112 : i32
    %68 = tpu.dynamic_rotate %25 by %c112_i32 dim 1 : vector<32x128xf32>, i32 -> vector<32x128xf32>
    %69 = vector.extract_strided_slice %26 {offsets = [7, 0], sizes = [1, 128], strides = [1, 1]} : vector<9x128xf32> to vector<1x128xf32>
    %70 = vector.broadcast %69 : vector<1x128xf32> to vector<32x128xf32>
    %71 = arith.mulf %68, %70 : vector<32x128xf32>
    %72 = arith.truncf %71 : vector<32x128xf32> to vector<32x128xbf16>
    %c224 = arith.constant 224 : index
    %c0_21 = arith.constant 0 : index
    %73 = vector.load %arg15[%c224, %c0_21] : memref<288x128xbf16, #tpu.memory_space<vmem>>, vector<32x128xbf16>
    tpu.vector_store %arg15[%c224, %c0_21], %72 {strides = array<i32>} : memref<288x128xbf16, #tpu.memory_space<vmem>>, vector<32x128xbf16>,
    %c110_i32 = arith.constant 110 : i32
    %74 = tpu.dynamic_rotate %25 by %c110_i32 dim 1 : vector<32x128xf32>, i32 -> vector<32x128xf32>
    %75 = vector.extract_strided_slice %26 {offsets = [8, 0], sizes = [1, 128], strides = [1, 1]} : vector<9x128xf32> to vector<1x128xf32>
    %76 = vector.broadcast %75 : vector<1x128xf32> to vector<32x128xf32>
    %77 = arith.mulf %74, %76 : vector<32x128xf32>
    %78 = arith.truncf %77 : vector<32x128xf32> to vector<32x128xbf16>
    %c256 = arith.constant 256 : index
    %c0_22 = arith.constant 0 : index
    %79 = vector.load %arg15[%c256, %c0_22] : memref<288x128xbf16, #tpu.memory_space<vmem>>, vector<32x128xbf16>
    tpu.vector_store %arg15[%c256, %c0_22], %78 {strides = array<i32>} : memref<288x128xbf16, #tpu.memory_space<vmem>>, vector<32x128xbf16>,
    %c0_23 = arith.constant 0 : index
    %c0_24 = arith.constant 0 : index
    %80 = vector.load %arg8[%c0_23, %c0_24] : memref<32x288xbf16, #tpu.memory_space<vmem>>, vector<32x288xbf16>
    %c0_25 = arith.constant 0 : index
    %c0_26 = arith.constant 0 : index
    %81 = vector.load %arg15[%c0_25, %c0_26] : memref<288x128xbf16, #tpu.memory_space<vmem>>, vector<288x128xbf16>
    %cst_27 = arith.constant dense<0.000000e+00> : vector<32x128xf32>
    %82 = tpu.matmul %80, %81, %cst_27 {dimension_numbers = #tpu.dot_dimension_numbers<[1], [0], [0], [1], [0, 0, 1, 1], [], []>} : vector<32x288xbf16>, vector<288x128xbf16>, vector<32x128xf32> -> vector<32x128xf32>
    %c0_28 = arith.constant 0 : index
    %c0_29 = arith.constant 0 : index
    %83 = vector.load %arg9[%c0_28, %c0_29] : memref<32x1xf32, #tpu.memory_space<vmem>>, vector<32x1xf32>
    %84 = vector.broadcast %83 : vector<32x1xf32> to vector<32x128xf32>
    %85 = arith.addf %82, %84 : vector<32x128xf32>
    %cst_30 = arith.constant dense<0.000000e+00> : vector<32xf32>
    %86 = vector.multi_reduction <add>, %85, %cst_30 [1] : vector<32x128xf32> to vector<32xf32>
    %87 = vector.shape_cast %86 : vector<32xf32> to vector<32x1xf32>
    %cst_31 = arith.constant 7.812500e-03 : f32
    %88 = vector.broadcast %cst_31 : f32 to vector<32x1xf32>
    %89 = arith.mulf %87, %88 : vector<32x1xf32>
    %90 = arith.mulf %85, %85 : vector<32x128xf32>
    %cst_32 = arith.constant dense<0.000000e+00> : vector<32xf32>
    %91 = vector.multi_reduction <add>, %90, %cst_32 [1] : vector<32x128xf32> to vector<32xf32>
    %92 = vector.shape_cast %91 : vector<32xf32> to vector<32x1xf32>
    %cst_33 = arith.constant 7.812500e-03 : f32
    %93 = vector.broadcast %cst_33 : f32 to vector<32x1xf32>
    %94 = arith.mulf %92, %93 : vector<32x1xf32>
    %95 = arith.mulf %89, %89 : vector<32x1xf32>
    %96 = arith.subf %94, %95 : vector<32x1xf32>
    %c0_34 = arith.constant 0 : index
    %c0_35 = arith.constant 0 : index
    %97 = vector.load %arg6[%c0_34, %c0_35] : memref<32x2xf32, #tpu.memory_space<vmem>>, vector<32x1xf32>
    %cst_36 = arith.constant 8.000000e-01 : f32
    %98 = vector.broadcast %cst_36 : f32 to vector<32x1xf32>
    %99 = arith.addf %96, %98 : vector<32x1xf32>
    %100 = math.rsqrt %99 : vector<32x1xf32>
    %101 = arith.mulf %97, %100 : vector<32x1xf32>
    %c0_37 = arith.constant 0 : index
    %c1_38 = arith.constant 1 : index
    %102 = vector.load %arg6[%c0_37, %c1_38] : memref<32x2xf32, #tpu.memory_space<vmem>>, vector<32x1xf32>
    %103 = arith.mulf %89, %101 : vector<32x1xf32>
    %104 = arith.subf %102, %103 : vector<32x1xf32>
    %105 = vector.broadcast %101 : vector<32x1xf32> to vector<32x128xf32>
    %106 = arith.mulf %85, %105 : vector<32x128xf32>
    %107 = vector.broadcast %104 : vector<32x1xf32> to vector<32x128xf32>
    %108 = arith.addf %106, %107 : vector<32x128xf32>
    %cst_39 = arith.constant 0.000000e+00 : f32
    %109 = vector.broadcast %cst_39 : f32 to vector<32x128xf32>
    %110 = arith.cmpf ogt, %108, %109 : vector<32x128xf32>
    %cst_40 = arith.constant 2.000000e-01 : f32
    %111 = vector.broadcast %cst_40 : f32 to vector<32x128xf32>
    %112 = arith.mulf %111, %108 : vector<32x128xf32>
    %113 = arith.select %110, %108, %112 : vector<32x128xi1>, vector<32x128xf32>
    %c0_41 = arith.constant 0 : index
    %c0_42 = arith.constant 0 : index
    %114 = vector.load %arg2[%c0_41, %c0_42] : memref<128x512xf32, #tpu.memory_space<vmem>>, vector<128x512xf32>
    %cst_43 = arith.constant dense<0.000000e+00> : vector<32x512xf32>
    %115 = tpu.matmul %113, %114, %cst_43 {dimension_numbers = #tpu.dot_dimension_numbers<[1], [0], [0], [1], [0, 0, 1, 1], [], []>} : vector<32x128xf32>, vector<128x512xf32>, vector<32x512xf32> -> vector<32x512xf32>
    %c0_44 = arith.constant 0 : index
    %c0_45 = arith.constant 0 : index
    %116 = vector.load %arg4[%c0_44, %c0_45] : memref<9x512xf32, #tpu.memory_space<vmem>>, vector<9x512xf32>
    %c34_i32 = arith.constant 34 : i32
    %117 = tpu.dynamic_rotate %115 by %c34_i32 dim 1 : vector<32x512xf32>, i32 -> vector<32x512xf32>
    %118 = vector.extract_strided_slice %116 {offsets = [0, 0], sizes = [1, 512], strides = [1, 1]} : vector<9x512xf32> to vector<1x512xf32>
    %119 = vector.broadcast %118 : vector<1x512xf32> to vector<32x512xf32>
    %120 = arith.mulf %117, %119 : vector<32x512xf32>
    %121 = arith.truncf %120 : vector<32x512xf32> to vector<32x512xbf16>
    %c0_46 = arith.constant 0 : index
    %c0_47 = arith.constant 0 : index
    %122 = vector.load %arg16[%c0_46, %c0_47] : memref<288x512xbf16, #tpu.memory_space<vmem>>, vector<32x512xbf16>
    tpu.vector_store %arg16[%c0_46, %c0_47], %121 {strides = array<i32>} : memref<288x512xbf16, #tpu.memory_space<vmem>>, vector<32x512xbf16>,
    %c32_i32 = arith.constant 32 : i32
    %123 = tpu.dynamic_rotate %115 by %c32_i32 dim 1 : vector<32x512xf32>, i32 -> vector<32x512xf32>
    %124 = vector.extract_strided_slice %116 {offsets = [1, 0], sizes = [1, 512], strides = [1, 1]} : vector<9x512xf32> to vector<1x512xf32>
    %125 = vector.broadcast %124 : vector<1x512xf32> to vector<32x512xf32>
    %126 = arith.mulf %123, %125 : vector<32x512xf32>
    %127 = arith.truncf %126 : vector<32x512xf32> to vector<32x512xbf16>
    %c32_48 = arith.constant 32 : index
    %c0_49 = arith.constant 0 : index
    %128 = vector.load %arg16[%c32_48, %c0_49] : memref<288x512xbf16, #tpu.memory_space<vmem>>, vector<32x512xbf16>
    tpu.vector_store %arg16[%c32_48, %c0_49], %127 {strides = array<i32>} : memref<288x512xbf16, #tpu.memory_space<vmem>>, vector<32x512xbf16>,
    %c30_i32 = arith.constant 30 : i32
    %129 = tpu.dynamic_rotate %115 by %c30_i32 dim 1 : vector<32x512xf32>, i32 -> vector<32x512xf32>
    %130 = vector.extract_strided_slice %116 {offsets = [2, 0], sizes = [1, 512], strides = [1, 1]} : vector<9x512xf32> to vector<1x512xf32>
    %131 = vector.broadcast %130 : vector<1x512xf32> to vector<32x512xf32>
    %132 = arith.mulf %129, %131 : vector<32x512xf32>
    %133 = arith.truncf %132 : vector<32x512xf32> to vector<32x512xbf16>
    %c64_50 = arith.constant 64 : index
    %c0_51 = arith.constant 0 : index
    %134 = vector.load %arg16[%c64_50, %c0_51] : memref<288x512xbf16, #tpu.memory_space<vmem>>, vector<32x512xbf16>
    tpu.vector_store %arg16[%c64_50, %c0_51], %133 {strides = array<i32>} : memref<288x512xbf16, #tpu.memory_space<vmem>>, vector<32x512xbf16>,
    %c2_i32_52 = arith.constant 2 : i32
    %135 = tpu.dynamic_rotate %115 by %c2_i32_52 dim 1 : vector<32x512xf32>, i32 -> vector<32x512xf32>
    %136 = vector.extract_strided_slice %116 {offsets = [3, 0], sizes = [1, 512], strides = [1, 1]} : vector<9x512xf32> to vector<1x512xf32>
    %137 = vector.broadcast %136 : vector<1x512xf32> to vector<32x512xf32>
    %138 = arith.mulf %135, %137 : vector<32x512xf32>
    %139 = arith.truncf %138 : vector<32x512xf32> to vector<32x512xbf16>
    %c96_53 = arith.constant 96 : index
    %c0_54 = arith.constant 0 : index
    %140 = vector.load %arg16[%c96_53, %c0_54] : memref<288x512xbf16, #tpu.memory_space<vmem>>, vector<32x512xbf16>
    tpu.vector_store %arg16[%c96_53, %c0_54], %139 {strides = array<i32>} : memref<288x512xbf16, #tpu.memory_space<vmem>>, vector<32x512xbf16>,
    %141 = vector.extract_strided_slice %116 {offsets = [4, 0], sizes = [1, 512], strides = [1, 1]} : vector<9x512xf32> to vector<1x512xf32>
    %142 = vector.broadcast %141 : vector<1x512xf32> to vector<32x512xf32>
    %143 = arith.mulf %115, %142 : vector<32x512xf32>
    %144 = arith.truncf %143 : vector<32x512xf32> to vector<32x512xbf16>
    %c128_55 = arith.constant 128 : index
    %c0_56 = arith.constant 0 : index
    %145 = vector.load %arg16[%c128_55, %c0_56] : memref<288x512xbf16, #tpu.memory_space<vmem>>, vector<32x512xbf16>
    tpu.vector_store %arg16[%c128_55, %c0_56], %144 {strides = array<i32>} : memref<288x512xbf16, #tpu.memory_space<vmem>>, vector<32x512xbf16>,
    %c510_i32 = arith.constant 510 : i32
    %146 = tpu.dynamic_rotate %115 by %c510_i32 dim 1 : vector<32x512xf32>, i32 -> vector<32x512xf32>
    %147 = vector.extract_strided_slice %116 {offsets = [5, 0], sizes = [1, 512], strides = [1, 1]} : vector<9x512xf32> to vector<1x512xf32>
    %148 = vector.broadcast %147 : vector<1x512xf32> to vector<32x512xf32>
    %149 = arith.mulf %146, %148 : vector<32x512xf32>
    %150 = arith.truncf %149 : vector<32x512xf32> to vector<32x512xbf16>
    %c160_57 = arith.constant 160 : index
    %c0_58 = arith.constant 0 : index
    %151 = vector.load %arg16[%c160_57, %c0_58] : memref<288x512xbf16, #tpu.memory_space<vmem>>, vector<32x512xbf16>
    tpu.vector_store %arg16[%c160_57, %c0_58], %150 {strides = array<i32>} : memref<288x512xbf16, #tpu.memory_space<vmem>>, vector<32x512xbf16>,
    %c482_i32 = arith.constant 482 : i32
    %152 = tpu.dynamic_rotate %115 by %c482_i32 dim 1 : vector<32x512xf32>, i32 -> vector<32x512xf32>
    %153 = vector.extract_strided_slice %116 {offsets = [6, 0], sizes = [1, 512], strides = [1, 1]} : vector<9x512xf32> to vector<1x512xf32>
    %154 = vector.broadcast %153 : vector<1x512xf32> to vector<32x512xf32>
    %155 = arith.mulf %152, %154 : vector<32x512xf32>
    %156 = arith.truncf %155 : vector<32x512xf32> to vector<32x512xbf16>
    %c192_59 = arith.constant 192 : index
    %c0_60 = arith.constant 0 : index
    %157 = vector.load %arg16[%c192_59, %c0_60] : memref<288x512xbf16, #tpu.memory_space<vmem>>, vector<32x512xbf16>
    tpu.vector_store %arg16[%c192_59, %c0_60], %156 {strides = array<i32>} : memref<288x512xbf16, #tpu.memory_space<vmem>>, vector<32x512xbf16>,
    %c480_i32 = arith.constant 480 : i32
    %158 = tpu.dynamic_rotate %115 by %c480_i32 dim 1 : vector<32x512xf32>, i32 -> vector<32x512xf32>
    %159 = vector.extract_strided_slice %116 {offsets = [7, 0], sizes = [1, 512], strides = [1, 1]} : vector<9x512xf32> to vector<1x512xf32>
    %160 = vector.broadcast %159 : vector<1x512xf32> to vector<32x512xf32>
    %161 = arith.mulf %158, %160 : vector<32x512xf32>
    %162 = arith.truncf %161 : vector<32x512xf32> to vector<32x512xbf16>
    %c224_61 = arith.constant 224 : index
    %c0_62 = arith.constant 0 : index
    %163 = vector.load %arg16[%c224_61, %c0_62] : memref<288x512xbf16, #tpu.memory_space<vmem>>, vector<32x512xbf16>
    tpu.vector_store %arg16[%c224_61, %c0_62], %162 {strides = array<i32>} : memref<288x512xbf16, #tpu.memory_space<vmem>>, vector<32x512xbf16>,
    %c478_i32 = arith.constant 478 : i32
    %164 = tpu.dynamic_rotate %115 by %c478_i32 dim 1 : vector<32x512xf32>, i32 -> vector<32x512xf32>
    %165 = vector.extract_strided_slice %116 {offsets = [8, 0], sizes = [1, 512], strides = [1, 1]} : vector<9x512xf32> to vector<1x512xf32>
    %166 = vector.broadcast %165 : vector<1x512xf32> to vector<32x512xf32>
    %167 = arith.mulf %164, %166 : vector<32x512xf32>
    %168 = arith.truncf %167 : vector<32x512xf32> to vector<32x512xbf16>
    %c256_63 = arith.constant 256 : index
    %c0_64 = arith.constant 0 : index
    %169 = vector.load %arg16[%c256_63, %c0_64] : memref<288x512xbf16, #tpu.memory_space<vmem>>, vector<32x512xbf16>
    tpu.vector_store %arg16[%c256_63, %c0_64], %168 {strides = array<i32>} : memref<288x512xbf16, #tpu.memory_space<vmem>>, vector<32x512xbf16>,
    %c0_65 = arith.constant 0 : index
    %c0_66 = arith.constant 0 : index
    %170 = vector.load %arg10[%c0_65, %c0_66] : memref<16x288xbf16, #tpu.memory_space<vmem>>, vector<16x288xbf16>
    %c0_67 = arith.constant 0 : index
    %c0_68 = arith.constant 0 : index
    %171 = vector.load %arg16[%c0_67, %c0_68] : memref<288x512xbf16, #tpu.memory_space<vmem>>, vector<288x512xbf16>
    %cst_69 = arith.constant dense<0.000000e+00> : vector<16x512xf32>
    %172 = tpu.matmul %170, %171, %cst_69 {dimension_numbers = #tpu.dot_dimension_numbers<[1], [0], [0], [1], [0, 0, 1, 1], [], []>} : vector<16x288xbf16>, vector<288x512xbf16>, vector<16x512xf32> -> vector<16x512xf32>
    %c0_70 = arith.constant 0 : index
    %c0_71 = arith.constant 0 : index
    %173 = vector.load %arg11[%c0_70, %c0_71] : memref<16x1xf32, #tpu.memory_space<vmem>>, vector<16x1xf32>
    %174 = vector.broadcast %173 : vector<16x1xf32> to vector<16x512xf32>
    %175 = arith.addf %172, %174 : vector<16x512xf32>
    %cst_72 = arith.constant dense<0.000000e+00> : vector<16xf32>
    %176 = vector.multi_reduction <add>, %175, %cst_72 [1] : vector<16x512xf32> to vector<16xf32>
    %177 = vector.shape_cast %176 : vector<16xf32> to vector<16x1xf32>
    %cst_73 = arith.constant 0.001953125 : f32
    %178 = vector.broadcast %cst_73 : f32 to vector<16x1xf32>
    %179 = arith.mulf %177, %178 : vector<16x1xf32>
    %180 = arith.mulf %175, %175 : vector<16x512xf32>
    %cst_74 = arith.constant dense<0.000000e+00> : vector<16xf32>
    %181 = vector.multi_reduction <add>, %180, %cst_74 [1] : vector<16x512xf32> to vector<16xf32>
    %182 = vector.shape_cast %181 : vector<16xf32> to vector<16x1xf32>
    %cst_75 = arith.constant 0.001953125 : f32
    %183 = vector.broadcast %cst_75 : f32 to vector<16x1xf32>
    %184 = arith.mulf %182, %183 : vector<16x1xf32>
    %185 = arith.mulf %179, %179 : vector<16x1xf32>
    %186 = arith.subf %184, %185 : vector<16x1xf32>
    %c0_76 = arith.constant 0 : index
    %c0_77 = arith.constant 0 : index
    %187 = vector.load %arg7[%c0_76, %c0_77] : memref<16x2xf32, #tpu.memory_space<vmem>>, vector<16x1xf32>
    %cst_78 = arith.constant 8.000000e-01 : f32
    %188 = vector.broadcast %cst_78 : f32 to vector<16x1xf32>
    %189 = arith.addf %186, %188 : vector<16x1xf32>
    %190 = math.rsqrt %189 : vector<16x1xf32>
    %191 = arith.mulf %187, %190 : vector<16x1xf32>
    %c0_79 = arith.constant 0 : index
    %c1_80 = arith.constant 1 : index
    %192 = vector.load %arg7[%c0_79, %c1_80] : memref<16x2xf32, #tpu.memory_space<vmem>>, vector<16x1xf32>
    %193 = arith.mulf %179, %191 : vector<16x1xf32>
    %194 = arith.subf %192, %193 : vector<16x1xf32>
    %195 = vector.broadcast %191 : vector<16x1xf32> to vector<16x512xf32>
    %196 = arith.mulf %175, %195 : vector<16x512xf32>
    %197 = vector.broadcast %194 : vector<16x1xf32> to vector<16x512xf32>
    %198 = arith.addf %196, %197 : vector<16x512xf32>
    %cst_81 = arith.constant 0.000000e+00 : f32
    %199 = vector.broadcast %cst_81 : f32 to vector<16x512xf32>
    %200 = arith.cmpf ogt, %198, %199 : vector<16x512xf32>
    %cst_82 = arith.constant 2.000000e-01 : f32
    %201 = vector.broadcast %cst_82 : f32 to vector<16x512xf32>
    %202 = arith.mulf %201, %198 : vector<16x512xf32>
    %203 = arith.select %200, %198, %202 : vector<16x512xi1>, vector<16x512xf32>
    %c34_i32_83 = arith.constant 34 : i32
    %204 = tpu.dynamic_rotate %203 by %c34_i32_83 dim 1 : vector<16x512xf32>, i32 -> vector<16x512xf32>
    %205 = vector.extract_strided_slice %116 {offsets = [0, 0], sizes = [1, 512], strides = [1, 1]} : vector<9x512xf32> to vector<1x512xf32>
    %206 = vector.broadcast %205 : vector<1x512xf32> to vector<16x512xf32>
    %207 = arith.mulf %204, %206 : vector<16x512xf32>
    %208 = arith.truncf %207 : vector<16x512xf32> to vector<16x512xbf16>
    %c0_84 = arith.constant 0 : index
    %c0_85 = arith.constant 0 : index
    %209 = vector.load %arg17[%c0_84, %c0_85] : memref<144x512xbf16, #tpu.memory_space<vmem>>, vector<16x512xbf16>
    tpu.vector_store %arg17[%c0_84, %c0_85], %208 {strides = array<i32>} : memref<144x512xbf16, #tpu.memory_space<vmem>>, vector<16x512xbf16>,
    %c32_i32_86 = arith.constant 32 : i32
    %210 = tpu.dynamic_rotate %203 by %c32_i32_86 dim 1 : vector<16x512xf32>, i32 -> vector<16x512xf32>
    %211 = vector.extract_strided_slice %116 {offsets = [1, 0], sizes = [1, 512], strides = [1, 1]} : vector<9x512xf32> to vector<1x512xf32>
    %212 = vector.broadcast %211 : vector<1x512xf32> to vector<16x512xf32>
    %213 = arith.mulf %210, %212 : vector<16x512xf32>
    %214 = arith.truncf %213 : vector<16x512xf32> to vector<16x512xbf16>
    %c16 = arith.constant 16 : index
    %c0_87 = arith.constant 0 : index
    %215 = vector.load %arg17[%c16, %c0_87] : memref<144x512xbf16, #tpu.memory_space<vmem>>, vector<16x512xbf16>
    tpu.vector_store %arg17[%c16, %c0_87], %214 {strides = array<i32>} : memref<144x512xbf16, #tpu.memory_space<vmem>>, vector<16x512xbf16>,
    %c30_i32_88 = arith.constant 30 : i32
    %216 = tpu.dynamic_rotate %203 by %c30_i32_88 dim 1 : vector<16x512xf32>, i32 -> vector<16x512xf32>
    %217 = vector.extract_strided_slice %116 {offsets = [2, 0], sizes = [1, 512], strides = [1, 1]} : vector<9x512xf32> to vector<1x512xf32>
    %218 = vector.broadcast %217 : vector<1x512xf32> to vector<16x512xf32>
    %219 = arith.mulf %216, %218 : vector<16x512xf32>
    %220 = arith.truncf %219 : vector<16x512xf32> to vector<16x512xbf16>
    %c32_89 = arith.constant 32 : index
    %c0_90 = arith.constant 0 : index
    %221 = vector.load %arg17[%c32_89, %c0_90] : memref<144x512xbf16, #tpu.memory_space<vmem>>, vector<16x512xbf16>
    tpu.vector_store %arg17[%c32_89, %c0_90], %220 {strides = array<i32>} : memref<144x512xbf16, #tpu.memory_space<vmem>>, vector<16x512xbf16>,
    %c2_i32_91 = arith.constant 2 : i32
    %222 = tpu.dynamic_rotate %203 by %c2_i32_91 dim 1 : vector<16x512xf32>, i32 -> vector<16x512xf32>
    %223 = vector.extract_strided_slice %116 {offsets = [3, 0], sizes = [1, 512], strides = [1, 1]} : vector<9x512xf32> to vector<1x512xf32>
    %224 = vector.broadcast %223 : vector<1x512xf32> to vector<16x512xf32>
    %225 = arith.mulf %222, %224 : vector<16x512xf32>
    %226 = arith.truncf %225 : vector<16x512xf32> to vector<16x512xbf16>
    %c48 = arith.constant 48 : index
    %c0_92 = arith.constant 0 : index
    %227 = vector.load %arg17[%c48, %c0_92] : memref<144x512xbf16, #tpu.memory_space<vmem>>, vector<16x512xbf16>
    tpu.vector_store %arg17[%c48, %c0_92], %226 {strides = array<i32>} : memref<144x512xbf16, #tpu.memory_space<vmem>>, vector<16x512xbf16>,
    %228 = vector.extract_strided_slice %116 {offsets = [4, 0], sizes = [1, 512], strides = [1, 1]} : vector<9x512xf32> to vector<1x512xf32>
    %229 = vector.broadcast %228 : vector<1x512xf32> to vector<16x512xf32>
    %230 = arith.mulf %203, %229 : vector<16x512xf32>
    %231 = arith.truncf %230 : vector<16x512xf32> to vector<16x512xbf16>
    %c64_93 = arith.constant 64 : index
    %c0_94 = arith.constant 0 : index
    %232 = vector.load %arg17[%c64_93, %c0_94] : memref<144x512xbf16, #tpu.memory_space<vmem>>, vector<16x512xbf16>
    tpu.vector_store %arg17[%c64_93, %c0_94], %231 {strides = array<i32>} : memref<144x512xbf16, #tpu.memory_space<vmem>>, vector<16x512xbf16>,
    %c510_i32_95 = arith.constant 510 : i32
    %233 = tpu.dynamic_rotate %203 by %c510_i32_95 dim 1 : vector<16x512xf32>, i32 -> vector<16x512xf32>
    %234 = vector.extract_strided_slice %116 {offsets = [5, 0], sizes = [1, 512], strides = [1, 1]} : vector<9x512xf32> to vector<1x512xf32>
    %235 = vector.broadcast %234 : vector<1x512xf32> to vector<16x512xf32>
    %236 = arith.mulf %233, %235 : vector<16x512xf32>
    %237 = arith.truncf %236 : vector<16x512xf32> to vector<16x512xbf16>
    %c80 = arith.constant 80 : index
    %c0_96 = arith.constant 0 : index
    %238 = vector.load %arg17[%c80, %c0_96] : memref<144x512xbf16, #tpu.memory_space<vmem>>, vector<16x512xbf16>
    tpu.vector_store %arg17[%c80, %c0_96], %237 {strides = array<i32>} : memref<144x512xbf16, #tpu.memory_space<vmem>>, vector<16x512xbf16>,
    %c482_i32_97 = arith.constant 482 : i32
    %239 = tpu.dynamic_rotate %203 by %c482_i32_97 dim 1 : vector<16x512xf32>, i32 -> vector<16x512xf32>
    %240 = vector.extract_strided_slice %116 {offsets = [6, 0], sizes = [1, 512], strides = [1, 1]} : vector<9x512xf32> to vector<1x512xf32>
    %241 = vector.broadcast %240 : vector<1x512xf32> to vector<16x512xf32>
    %242 = arith.mulf %239, %241 : vector<16x512xf32>
    %243 = arith.truncf %242 : vector<16x512xf32> to vector<16x512xbf16>
    %c96_98 = arith.constant 96 : index
    %c0_99 = arith.constant 0 : index
    %244 = vector.load %arg17[%c96_98, %c0_99] : memref<144x512xbf16, #tpu.memory_space<vmem>>, vector<16x512xbf16>
    tpu.vector_store %arg17[%c96_98, %c0_99], %243 {strides = array<i32>} : memref<144x512xbf16, #tpu.memory_space<vmem>>, vector<16x512xbf16>,
    %c480_i32_100 = arith.constant 480 : i32
    %245 = tpu.dynamic_rotate %203 by %c480_i32_100 dim 1 : vector<16x512xf32>, i32 -> vector<16x512xf32>
    %246 = vector.extract_strided_slice %116 {offsets = [7, 0], sizes = [1, 512], strides = [1, 1]} : vector<9x512xf32> to vector<1x512xf32>
    %247 = vector.broadcast %246 : vector<1x512xf32> to vector<16x512xf32>
    %248 = arith.mulf %245, %247 : vector<16x512xf32>
    %249 = arith.truncf %248 : vector<16x512xf32> to vector<16x512xbf16>
    %c112 = arith.constant 112 : index
    %c0_101 = arith.constant 0 : index
    %250 = vector.load %arg17[%c112, %c0_101] : memref<144x512xbf16, #tpu.memory_space<vmem>>, vector<16x512xbf16>
    tpu.vector_store %arg17[%c112, %c0_101], %249 {strides = array<i32>} : memref<144x512xbf16, #tpu.memory_space<vmem>>, vector<16x512xbf16>,
    %c478_i32_102 = arith.constant 478 : i32
    %251 = tpu.dynamic_rotate %203 by %c478_i32_102 dim 1 : vector<16x512xf32>, i32 -> vector<16x512xf32>
    %252 = vector.extract_strided_slice %116 {offsets = [8, 0], sizes = [1, 512], strides = [1, 1]} : vector<9x512xf32> to vector<1x512xf32>
    %253 = vector.broadcast %252 : vector<1x512xf32> to vector<16x512xf32>
    %254 = arith.mulf %251, %253 : vector<16x512xf32>
    %255 = arith.truncf %254 : vector<16x512xf32> to vector<16x512xbf16>
    %c128_103 = arith.constant 128 : index
    %c0_104 = arith.constant 0 : index
    %256 = vector.load %arg17[%c128_103, %c0_104] : memref<144x512xbf16, #tpu.memory_space<vmem>>, vector<16x512xbf16>
    tpu.vector_store %arg17[%c128_103, %c0_104], %255 {strides = array<i32>} : memref<144x512xbf16, #tpu.memory_space<vmem>>, vector<16x512xbf16>,
    %c0_105 = arith.constant 0 : index
    %c0_106 = arith.constant 0 : index
    %257 = vector.load %arg12[%c0_105, %c0_106] : memref<3x144xbf16, #tpu.memory_space<vmem>>, vector<3x144xbf16>
    %c0_107 = arith.constant 0 : index
    %c0_108 = arith.constant 0 : index
    %258 = vector.load %arg17[%c0_107, %c0_108] : memref<144x512xbf16, #tpu.memory_space<vmem>>, vector<144x512xbf16>
    %cst_109 = arith.constant dense<0.000000e+00> : vector<3x512xf32>
    %259 = tpu.matmul %257, %258, %cst_109 {dimension_numbers = #tpu.dot_dimension_numbers<[1], [0], [0], [1], [0, 0, 1, 1], [], []>} : vector<3x144xbf16>, vector<144x512xbf16>, vector<3x512xf32> -> vector<3x512xf32>
    %c0_110 = arith.constant 0 : index
    %c0_111 = arith.constant 0 : index
    %260 = vector.load %arg13[%c0_110, %c0_111] : memref<3x1xf32, #tpu.memory_space<vmem>>, vector<3x1xf32>
    %261 = vector.broadcast %260 : vector<3x1xf32> to vector<3x512xf32>
    %262 = arith.addf %259, %261 : vector<3x512xf32>
    %263 = math.tanh %262 : vector<3x512xf32>
    %c0_112 = arith.constant 0 : index
    %c0_113 = arith.constant 0 : index
    %264 = vector.load %arg14[%c0_112, %c0_113] : memref<3x512xf32, #tpu.memory_space<vmem>>, vector<3x512xf32>
    tpu.vector_store %arg14[%c0_112, %c0_113], %263 {strides = array<i32>} : memref<3x512xf32, #tpu.memory_space<vmem>>, vector<3x512xf32>,
    return
  }
}

</mosaic_0001>

<bundles_post_ra>
// kernel: dcgen_forward.2
= control target key start
LH: loop header
LB: loop body
LE: loop exit
PB: predicated region body
PF: predicated region fallthrough
CT: control target
= control target key end

     0   :  { %v1285_v0 = vmov 0   ;;  %vm625_vm0 = vcmask 261120   ;;  %vm1014_vm1 = vcmask 15360   ;;  %s1987_s2 = inlined_call_operand.vmem [shape: f32[512,1], index: 2, kind: input, shape index: {}]   ;;  %s1988_s1 = inlined_call_operand.vmem [shape: f32[2,32], index: 1, kind: input, shape index: {}]   ;;  %s1989_s0 = inlined_call_operand.vmem [shape: bf16[512,32], index: 0, kind: input, shape index: {}]   ;;  %s1990_s3 = inlined_call_operand.vmem [shape: f32[512,2], index: 3, kind: output, shape index: {}]  }
   0x1   :  { %1252 = vset.pattern.permute.xlu1 %v1285_v0  ;;  %1251 = vset.pattern.permute.xlu0 %v1285_v0  ;;  %v83_v1 = vld [vmem:[%s1987_s2 + $0x10] sm:$0xff]  ;;  %v81_v2 = vld [vmem:[%s1987_s2] sm:$0xff]  ;;  %v84_v5 = vld [vmem:[%s1987_s2 + $0x18] sm:$0xff] }
   0x2   :  { %v15_v3 = vld [vmem:[%s1988_s1] sm:$0x3]  ;;  %157 = vperm.xlu1 %1252, %v83_v1   ;;  %147 = vperm.xlu0 %1251, %v81_v2   ;;  %v82_v6 = vld [vmem:[%s1987_s2 + $0x8] sm:$0xff]  ;;  %v88_v14 = vld [vmem:[%s1987_s2 + $0x38] sm:$0xff] }
   0x3   :  { %v16_v4 = vpack.c.bf16 %v15_v3, %v15_v3  ;;  %v1253_v8 = vld [vmem:[%s1989_s0] sm:$0xff]   ;;  %v86_v10 = vld [vmem:[%s1987_s2 + $0x28] sm:$0xff]  ;;  %v1257_v15 = vld [vmem:[%s1989_s0 + $0x10] sm:$0xff]  }
   0x4   :  { %v1254_v9 = vld [vmem:[%s1989_s0 + $0x80] sm:$0xff]   ;;  %1182 = vmatprep.mubr.msk.bf16.mxu0 %vm625_vm0, %v1253_v8  ;;  %v1255_v12 = vld [vmem:[%s1989_s0 + $0x8] sm:$0xff]   ;;  %v1258_v16 = vld [vmem:[%s1989_s0 + $0x90] sm:$0xff]  }
   0x5   :  { %1248 = vmatprep.subr.msk.bf16.mxu0 %vm625_vm0, %v16_v4  ;;  %1249 = vmatprep.subr.msk.bf16.mxu1 %vm625_vm0, %v16_v4  ;;  %v723_v7 = vsel %vm625_vm0, %v16_v4, 0  ;;  %v85_v11 = vld [vmem:[%s1987_s2 + $0x20] sm:$0xff]  ;;  %v1256_v13 = vld [vmem:[%s1989_s0 + $0x88] sm:$0xff]   ;;  %v87_v17 = vld [vmem:[%s1987_s2 + $0x30] sm:$0xff] }
   0x6   :  { %1181 = vmatpush3.bf16.xpose.msra.mxu0 %v723_v7  ;;  %1247 = vmatpush3.bf16.xpose.msra.mxu1 %v723_v7  ;;  %v90_v18 = vld [vmem:[%s1987_s2 + $0x48] sm:$0xff]  ;;  %v89_v19 = vld [vmem:[%s1987_s2 + $0x40] sm:$0xff]  ;;  %v1259_v20 = vld [vmem:[%s1989_s0 + $0x18] sm:$0xff]  }
   0x7   :  { %162 = vperm.xlu1 %1252, %v84_v5   ;;  %152 = vperm.xlu0 %1251, %v82_v6   ;;  %v1260_v21 = vld [vmem:[%s1989_s0 + $0x98] sm:$0xff]   ;;  %v1261_v22 = vld [vmem:[%s1989_s0 + $0x20] sm:$0xff]   ;;  %v91_v25 = vld [vmem:[%s1987_s2 + $0x50] sm:$0xff] }
   0x8   :  { %1214 = vmatprep.mubr.msk.bf16.mxu1 %vm625_vm0, %v1254_v9  ;;  %v1262_v23 = vld [vmem:[%s1989_s0 + $0xa0] sm:$0xff]   ;;  %v92_v24 = vld [vmem:[%s1987_s2 + $0x58] sm:$0xff]  ;;  %v94_v26 = vld [vmem:[%s1987_s2 + $0x68] sm:$0xff] }
   0x9   :  { %v93_v27 = vld [vmem:[%s1987_s2 + $0x60] sm:$0xff]  ;;  %v1263_v28 = vld [vmem:[%s1989_s0 + $0x28] sm:$0xff]   ;;  %v1265_v30 = vld [vmem:[%s1989_s0 + $0x30] sm:$0xff]  }
   0xa   :  { %v1264_v29 = vld [vmem:[%s1989_s0 + $0xa8] sm:$0xff]   ;;  %v1266_v31 = vld [vmem:[%s1989_s0 + $0xb0] sm:$0xff]   ;;  %v96_v32 = vld [vmem:[%s1987_s2 + $0x78] sm:$0xff] }
   0xb   :  { %172 = vperm.xlu1 %1252, %v86_v10   ;;  %167 = vperm.xlu0 %1251, %v85_v11   ;;  %v95_v33 = vld [vmem:[%s1987_s2 + $0x70] sm:$0xff]  ;;  %v98_v34 = vld [vmem:[%s1987_s2 + $0x88] sm:$0xff]  ;;  %v97_v35 = vld [vmem:[%s1987_s2 + $0x80] sm:$0xff] }
   0xc   :  { %v1267_v36 = vld [vmem:[%s1989_s0 + $0x38] sm:$0xff]   ;;  %v1269_v38 = vld [vmem:[%s1989_s0 + $0x40] sm:$0xff]   ;;  %v99_v41 = vld [vmem:[%s1987_s2 + $0x90] sm:$0xff] }
   0xd   :  { %1183 = vmatmul.mubr.msk.bf16.vlgmr.msra.gmra.mxu0 %vm625_vm0, %v1255_v12  ;;  %1215 = vmatmul.mubr.msk.bf16.vlgmr.msra.gmra.mxu1 %vm625_vm0, %v1256_v13  ;;  %v1268_v37 = vld [vmem:[%s1989_s0 + $0xb8] sm:$0xff]   ;;  %v1270_v39 = vld [vmem:[%s1989_s0 + $0xc0] sm:$0xff]   ;;  %v102_v42 = vld [vmem:[%s1987_s2 + $0xa8] sm:$0xff] }
   0xe   :  { %1186 = vmatprep.mubr.msk.bf16.mxu0 %vm625_vm0, %v1257_v15  ;;  %1218 = vmatprep.mubr.msk.bf16.mxu1 %vm625_vm0, %v1258_v16  ;;  %v100_v40 = vld [vmem:[%s1987_s2 + $0x98] sm:$0xff]  ;;  %v101_v43 = vld [vmem:[%s1987_s2 + $0xa0] sm:$0xff]  ;;  %v1271_v44 = vld [vmem:[%s1989_s0 + $0x48] sm:$0xff]  }
   0xf   :  { %182 = vperm.xlu1 %1252, %v88_v14   ;;  %177 = vperm.xlu0 %1251, %v87_v17   ;;  %v1272_v45 = vld [vmem:[%s1989_s0 + $0xc8] sm:$0xff]   ;;  %v1273_v46 = vld [vmem:[%s1989_s0 + $0x50] sm:$0xff]   ;;  %v104_v48 = vld [vmem:[%s1987_s2 + $0xb8] sm:$0xff] }
  0x10   :  { %v1274_v47 = vld [vmem:[%s1989_s0 + $0xd0] sm:$0xff]   ;;  %v106_v50 = vld [vmem:[%s1987_s2 + $0xc8] sm:$0xff]  ;;  %v105_v51 = vld [vmem:[%s1987_s2 + $0xc0] sm:$0xff] }
  0x11   :  { %v103_v49 = vld [vmem:[%s1987_s2 + $0xb0] sm:$0xff]  ;;  %v1275_v52 = vld [vmem:[%s1989_s0 + $0x58] sm:$0xff]   ;;  %v1277_v54 = vld [vmem:[%s1989_s0 + $0x60] sm:$0xff]  }
  0x12   :  { %v1276_v53 = vld [vmem:[%s1989_s0 + $0xd8] sm:$0xff]   ;;  %v1278_v55 = vld [vmem:[%s1989_s0 + $0xe0] sm:$0xff]   ;;  %v107_v57 = vld [vmem:[%s1987_s2 + $0xd0] sm:$0xff] }
  0x13   :  { %192 = vperm.xlu1 %1252, %v90_v18   ;;  %187 = vperm.xlu0 %1251, %v89_v19   ;;  %v108_v56 = vld [vmem:[%s1987_s2 + $0xd8] sm:$0xff]  ;;  %v110_v58 = vld [vmem:[%s1987_s2 + $0xe8] sm:$0xff]  ;;  %v109_v59 = vld [vmem:[%s1987_s2 + $0xe0] sm:$0xff] }
  0x14   :  { %v1279_v60 = vld [vmem:[%s1989_s0 + $0x68] sm:$0xff]   ;;  %v1281_v62 = vld [vmem:[%s1989_s0 + $0x70] sm:$0xff]   ;;  %v112_v0 = vld [vmem:[%s1987_s2 + $0xf8] sm:$0xff] }
  0x15   :  { %1187 = vmatmul.mubr.msk.bf16.gmra.mxu0 %vm625_vm0, %v1259_v20  ;;  %1219 = vmatmul.mubr.msk.bf16.gmra.mxu1 %vm625_vm0, %v1260_v21  ;;  %v1280_v61 = vld [vmem:[%s1989_s0 + $0xe8] sm:$0xff]   ;;  %v1282_v63 = vld [vmem:[%s1989_s0 + $0xf0] sm:$0xff]   ;;  %v113_v3 = vld [vmem:[%s1987_s2 + $0x100] sm:$0xff] }
  0x16   :  { %1190 = vmatprep.mubr.msk.bf16.mxu0 %vm625_vm0, %v1261_v22  ;;  %1222 = vmatprep.mubr.msk.bf16.mxu1 %vm625_vm0, %v1262_v23  ;;  %v111_v1 = vld [vmem:[%s1987_s2 + $0xf0] sm:$0xff]  ;;  %v114_v2 = vld [vmem:[%s1987_s2 + $0x108] sm:$0xff]  ;;  %v1283_v4 = vld [vmem:[%s1989_s0 + $0x78] sm:$0xff]  }
  0x17   :  { %202 = vperm.xlu1 %1252, %v92_v24   ;;  %197 = vperm.xlu0 %1251, %v91_v25   ;;  %v1284_v5 = vld [vmem:[%s1989_s0 + $0xf8] sm:$0xff]   ;;  %v115_v7 = vld [vmem:[%s1987_s2 + $0x110] sm:$0xff]  ;;  %v118_v8 = vld [vmem:[%s1987_s2 + $0x128] sm:$0xff] }
  0x18   :  { %v116_v6 = vld [vmem:[%s1987_s2 + $0x118] sm:$0xff]  ;;  %v117_v9 = vld [vmem:[%s1987_s2 + $0x120] sm:$0xff]  ;;  %v119_v11 = vld [vmem:[%s1987_s2 + $0x130] sm:$0xff] }
  0x19   :  { %v120_v10 = vld [vmem:[%s1987_s2 + $0x138] sm:$0xff]  ;;  %v122_v12 = vld [vmem:[%s1987_s2 + $0x148] sm:$0xff]  ;;  %v121_v13 = vld [vmem:[%s1987_s2 + $0x140] sm:$0xff] }
  0x1a   :  { %v124_v14 = vld [vmem:[%s1987_s2 + $0x158] sm:$0xff]  ;;  %v123_v15 = vld [vmem:[%s1987_s2 + $0x150] sm:$0xff]  ;;  %v126_v16 = vld [vmem:[%s1987_s2 + $0x168] sm:$0xff] }
  0x1b   :  { %212 = vperm.xlu1 %1252, %v94_v26   ;;  %207 = vperm.xlu0 %1251, %v93_v27   ;;  %v125_v17 = vld [vmem:[%s1987_s2 + $0x160] sm:$0xff]  ;;  %v128_v18 = vld [vmem:[%s1987_s2 + $0x178] sm:$0xff]  ;;  %v127_v19 = vld [vmem:[%s1987_s2 + $0x170] sm:$0xff] }
  0x1c   :  { %v130_v20 = vld [vmem:[%s1987_s2 + $0x188] sm:$0xff]  ;;  %v129_v21 = vld [vmem:[%s1987_s2 + $0x180] sm:$0xff]  ;;  %v132_v22 = vld [vmem:[%s1987_s2 + $0x198] sm:$0xff] }
  0x1d   :  { %1191 = vmatmul.mubr.msk.bf16.gmra.mxu0 %vm625_vm0, %v1263_v28  ;;  %1223 = vmatmul.mubr.msk.bf16.gmra.mxu1 %vm625_vm0, %v1264_v29  ;;  %v131_v23 = vld [vmem:[%s1987_s2 + $0x190] sm:$0xff]  ;;  %v134_v24 = vld [vmem:[%s1987_s2 + $0x1a8] sm:$0xff]  ;;  %v133_v25 = vld [vmem:[%s1987_s2 + $0x1a0] sm:$0xff] }
  0x1e   :  { %1194 = vmatprep.mubr.msk.bf16.mxu0 %vm625_vm0, %v1265_v30  ;;  %1226 = vmatprep.mubr.msk.bf16.mxu1 %vm625_vm0, %v1266_v31  ;;  %v136_v26 = vld [vmem:[%s1987_s2 + $0x1b8] sm:$0xff]  ;;  %v135_v27 = vld [vmem:[%s1987_s2 + $0x1b0] sm:$0xff]  ;;  %v138_v28 = vld [vmem:[%s1987_s2 + $0x1c8] sm:$0xff] }
  0x1f   :  { %222 = vperm.xlu1 %1252, %v96_v32   ;;  %217 = vperm.xlu0 %1251, %v95_v33   ;;  %v137_v29 = vld [vmem:[%s1987_s2 + $0x1c0] sm:$0xff]  ;;  %v140_v30 = vld [vmem:[%s1987_s2 + $0x1d8] sm:$0xff]  ;;  %v139_v31 = vld [vmem:[%s1987_s2 + $0x1d0] sm:$0xff] }
  0x20   :  { %v142_v32 = vld [vmem:[%s1987_s2 + $0x1e8] sm:$0xff]  ;;  %v141_v33 = vld [vmem:[%s1987_s2 + $0x1e0] sm:$0xff] }
  0x23   :  { %232 = vperm.xlu1 %1252, %v98_v34   ;;  %227 = vperm.xlu0 %1251, %v97_v35   ;;  %v144_v34 = vld [vmem:[%s1987_s2 + $0x1f8] sm:$0xff]  ;;  %v143_v35 = vld [vmem:[%s1987_s2 + $0x1f0] sm:$0xff] }
  0x25   :  { %1195 = vmatmul.mubr.msk.bf16.gmra.mxu0 %vm625_vm0, %v1267_v36  ;;  %1227 = vmatmul.mubr.msk.bf16.gmra.mxu1 %vm625_vm0, %v1268_v37 }
  0x26   :  { %1198 = vmatprep.mubr.msk.bf16.mxu0 %vm625_vm0, %v1269_v38  ;;  %1230 = vmatprep.mubr.msk.bf16.mxu1 %vm625_vm0, %v1270_v39 }
  0x27   :  { %242 = vperm.xlu1 %1252, %v100_v40   ;;  %237 = vperm.xlu0 %1251, %v99_v41  }
  0x2b   :  { %252 = vperm.xlu1 %1252, %v102_v42   ;;  %247 = vperm.xlu0 %1251, %v101_v43  }
  0x2d   :  { %1199 = vmatmul.mubr.msk.bf16.gmra.mxu0 %vm625_vm0, %v1271_v44  ;;  %1231 = vmatmul.mubr.msk.bf16.gmra.mxu1 %vm625_vm0, %v1272_v45 }
  0x2e   :  { %1202 = vmatprep.mubr.msk.bf16.mxu0 %vm625_vm0, %v1273_v46  ;;  %1234 = vmatprep.mubr.msk.bf16.mxu1 %vm625_vm0, %v1274_v47 }
  0x2f   :  { %262 = vperm.xlu1 %1252, %v104_v48   ;;  %257 = vperm.xlu0 %1251, %v103_v49  }
  0x33   :  { %272 = vperm.xlu1 %1252, %v106_v50   ;;  %267 = vperm.xlu0 %1251, %v105_v51  }
  0x35   :  { %1203 = vmatmul.mubr.msk.bf16.gmra.mxu0 %vm625_vm0, %v1275_v52  ;;  %1235 = vmatmul.mubr.msk.bf16.gmra.mxu1 %vm625_vm0, %v1276_v53 }
  0x36   :  { %1206 = vmatprep.mubr.msk.bf16.mxu0 %vm625_vm0, %v1277_v54  ;;  %1238 = vmatprep.mubr.msk.bf16.mxu1 %vm625_vm0, %v1278_v55 }
  0x37   :  { %282 = vperm.xlu1 %1252, %v108_v56   ;;  %277 = vperm.xlu0 %1251, %v107_v57  }
  0x3b   :  { %292 = vperm.xlu1 %1252, %v110_v58   ;;  %287 = vperm.xlu0 %1251, %v109_v59  }
  0x3d   :  { %1207 = vmatmul.mubr.msk.bf16.gmra.mxu0 %vm625_vm0, %v1279_v60  ;;  %1239 = vmatmul.mubr.msk.bf16.gmra.mxu1 %vm625_vm0, %v1280_v61 }
  0x3e   :  { %1210 = vmatprep.mubr.msk.bf16.mxu0 %vm625_vm0, %v1281_v62  ;;  %1242 = vmatprep.mubr.msk.bf16.mxu1 %vm625_vm0, %v1282_v63 }
  0x3f   :  { %302 = vperm.xlu1 %1252, %v112_v0   ;;  %297 = vperm.xlu0 %1251, %v111_v1  }
  0x43   :  { %312 = vperm.xlu1 %1252, %v114_v2   ;;  %307 = vperm.xlu0 %1251, %v113_v3  }
  0x45   :  { %1211 = vmatmul.mubr.msk.bf16.gmra.mxu0 %vm625_vm0, %v1283_v4  ;;  %1243 = vmatmul.mubr.msk.bf16.gmra.mxu1 %vm625_vm0, %v1284_v5 }
  0x47   :  { %322 = vperm.xlu1 %1252, %v116_v6   ;;  %317 = vperm.xlu0 %1251, %v115_v7  }
  0x4b   :  { %332 = vperm.xlu1 %1252, %v118_v8   ;;  %327 = vperm.xlu0 %1251, %v117_v9  }
  0x4f   :  { %342 = vperm.xlu1 %1252, %v120_v10   ;;  %337 = vperm.xlu0 %1251, %v119_v11  }
  0x53   :  { %352 = vperm.xlu1 %1252, %v122_v12   ;;  %347 = vperm.xlu0 %1251, %v121_v13  }
  0x57   :  { %362 = vperm.xlu1 %1252, %v124_v14   ;;  %357 = vperm.xlu0 %1251, %v123_v15  }
  0x5b   :  { %372 = vperm.xlu1 %1252, %v126_v16   ;;  %367 = vperm.xlu0 %1251, %v125_v17  }
  0x5f   :  { %382 = vperm.xlu1 %1252, %v128_v18   ;;  %377 = vperm.xlu0 %1251, %v127_v19  }
  0x63   :  { %392 = vperm.xlu1 %1252, %v130_v20   ;;  %387 = vperm.xlu0 %1251, %v129_v21  }
  0x67   :  { %402 = vperm.xlu1 %1252, %v132_v22   ;;  %397 = vperm.xlu0 %1251, %v131_v23  }
  0x6b   :  { %412 = vperm.xlu1 %1252, %v134_v24   ;;  %407 = vperm.xlu0 %1251, %v133_v25  }
  0x6f   :  { %422 = vperm.xlu1 %1252, %v136_v26   ;;  %417 = vperm.xlu0 %1251, %v135_v27  }
  0x73   :  { %432 = vperm.xlu1 %1252, %v138_v28   ;;  %427 = vperm.xlu0 %1251, %v137_v29  }
  0x77   :  { %442 = vperm.xlu1 %1252, %v140_v30   ;;  %437 = vperm.xlu0 %1251, %v139_v31  }
  0x7b   :  { %452 = vperm.xlu1 %1252, %v142_v32   ;;  %447 = vperm.xlu0 %1251, %v141_v33  }
  0x7d   :  { %v158_v36 = vpop.permute.xlu1 %157  ;;  %v148_v37 = vpop.permute.xlu0 %147 }
  0x7f   :  { %462 = vperm.xlu1 %1252, %v144_v34   ;;  %457 = vperm.xlu0 %1251, %v143_v35  }
  0x82   :  { %v163_v38 = vpop.permute.xlu1 %162  ;;  %v1632_v39 = vpop.permute.xlu0 %152 }
  0x86   :  { %v1634_v40 = vpop.permute.xlu1 %172  ;;  %v1636_v41 = vpop.permute.xlu0 %167 }
  0x8a   :  { %v1638_v42 = vpop.permute.xlu1 %182  ;;  %v1640_v43 = vpop.permute.xlu0 %177 }
  0x8e   :  { %v1642_v44 = vpop.permute.xlu1 %192  ;;  %v1644_v45 = vpop.permute.xlu0 %187 }
  0x92   :  { %v1646_v46 = vpop.permute.xlu1 %202  ;;  %v1648_v47 = vpop.permute.xlu0 %197 }
  0x96   :  { %v1650_v48 = vpop.permute.xlu1 %212  ;;  %v1652_v49 = vpop.permute.xlu0 %207 }
  0x9a   :  { %v1654_v50 = vpop.permute.xlu1 %222  ;;  %v1656_v51 = vpop.permute.xlu0 %217 }
  0x9e   :  { %v1658_v52 = vpop.permute.xlu1 %232  ;;  %v1660_v53 = vpop.permute.xlu0 %227 }
  0xa2   :  { %v1662_v54 = vpop.permute.xlu1 %242  ;;  %v1664_v55 = vpop.permute.xlu0 %237 }
  0xa6   :  { %v1666_v56 = vpop.permute.xlu1 %252  ;;  %v1668_v57 = vpop.permute.xlu0 %247 }
  0xaa   :  { %v1670_v58 = vpop.permute.xlu1 %262  ;;  %v1672_v59 = vpop.permute.xlu0 %257 }
  0xae   :  { %v1674_v60 = vpop.permute.xlu1 %272  ;;  %v1676_v61 = vpop.permute.xlu0 %267 }
  0xb2   :  { %v1678_v62 = vpop.permute.xlu1 %282  ;;  %v1680_v63 = vpop.permute.xlu0 %277 }
  0xb6   :  { %v1682_v0 = vpop.permute.xlu1 %292  ;;  %v1684_v1 = vpop.permute.xlu0 %287 }
  0xba   :  { %v1686_v2 = vpop.permute.xlu1 %302  ;;  %v1688_v3 = vpop.permute.xlu0 %297 }
  0xbe   :  { %v313_v4 = vpop.permute.xlu1 %312  ;;  %v308_v5 = vpop.permute.xlu0 %307 }
  0xc2   :  { %v323_v6 = vpop.permute.xlu1 %322  ;;  %v318_v7 = vpop.permute.xlu0 %317 }
  0xc6   :  { %v333_v8 = vpop.permute.xlu1 %332  ;;  %v328_v9 = vpop.permute.xlu0 %327 }
  0xca   :  { %v343_v10 = vpop.permute.xlu1 %342  ;;  %v338_v11 = vpop.permute.xlu0 %337 }
  0xcd   :  { %v1184_v12 = vpop.f32.mrf.mxu0  ;;  %v1216_v13 = vpop.f32.mrf.mxu1 }
  0xce   :  { %v768_v14 = vadd.f32 %v1184_v12, %v158_v36  ;;  %v896_v15 = vadd.f32 %v1216_v13, %v318_v7  ;;  %v1690_v16 = vpop.permute.xlu1 %352  ;;  %v348_v17 = vpop.permute.xlu0 %347 }
  0xcf   :  { %v759_v18 = vpop.f32.mrf.mxu0  ;;  %v887_v19 = vpop.f32.mrf.mxu1 }
  0xd0   :  { %1017 = vst.msk [vmem:[%s1990_s3 + $0x10] sm:$0xff] %vm1014_vm1, %v768_v14  ;;  %1049 = vst.msk [vmem:[%s1990_s3 + $0x110] sm:$0xff] %vm1014_vm1, %v896_v15  ;;  %v760_v20 = vadd.f32 %v759_v18, %v148_v37  ;;  %v888_v21 = vadd.f32 %v887_v19, %v308_v5 }
  0xd1   :  { %v1185_v22 = vpop.f32.mrf.mxu0  ;;  %v1217_v23 = vpop.f32.mrf.mxu1 }
  0xd2   :  { %1015 = vst.msk [vmem:[%s1990_s3] sm:$0xff] %vm1014_vm1, %v760_v20  ;;  %1047 = vst.msk [vmem:[%s1990_s3 + $0x100] sm:$0xff] %vm1014_vm1, %v888_v21  ;;  %v771_v24 = vadd.f32 %v1185_v22, %v163_v38  ;;  %v899_v25 = vadd.f32 %v1217_v23, %v323_v6  ;;  %v363_v26 = vpop.permute.xlu1 %362  ;;  %v358_v27 = vpop.permute.xlu0 %357 }
  0xd3   :  { %v762_v28 = vpop.f32.mrf.mxu0  ;;  %v890_v29 = vpop.f32.mrf.mxu1 }
  0xd4   :  { %1018 = vst.msk [vmem:[%s1990_s3 + $0x18] sm:$0xff] %vm1014_vm1, %v771_v24  ;;  %1050 = vst.msk [vmem:[%s1990_s3 + $0x118] sm:$0xff] %vm1014_vm1, %v899_v25  ;;  %v763_v30 = vadd.f32 %v762_v28, %v1632_v39  ;;  %v891_v31 = vadd.f32 %v890_v29, %v313_v4 }
  0xd5   :  { %v1188_v32 = vpop.f32.mrf.mxu0  ;;  %v1220_v33 = vpop.f32.mrf.mxu1 }
  0xd6   :  { %1016 = vst.msk [vmem:[%s1990_s3 + $0x8] sm:$0xff] %vm1014_vm1, %v763_v30  ;;  %1048 = vst.msk [vmem:[%s1990_s3 + $0x108] sm:$0xff] %vm1014_vm1, %v891_v31  ;;  %v784_v34 = vadd.f32 %v1188_v32, %v1640_v43  ;;  %v912_v35 = vadd.f32 %v1220_v33, %v338_v11  ;;  %v1726_v36 = vpop.permute.xlu1 %372  ;;  %v368_v37 = vpop.permute.xlu0 %367 }
  0xd7   :  { %v775_v38 = vpop.f32.mrf.mxu0  ;;  %v903_v39 = vpop.f32.mrf.mxu1 }
  0xd8   :  { %1021 = vst.msk [vmem:[%s1990_s3 + $0x30] sm:$0xff] %vm1014_vm1, %v784_v34  ;;  %1053 = vst.msk [vmem:[%s1990_s3 + $0x130] sm:$0xff] %vm1014_vm1, %v912_v35  ;;  %v776_v4 = vadd.f32 %v775_v38, %v1636_v41  ;;  %v904_v5 = vadd.f32 %v903_v39, %v328_v9 }
  0xd9   :  { %v1189_v43 = vpop.f32.mrf.mxu0  ;;  %v1221_v6 = vpop.f32.mrf.mxu1 }
  0xda   :  { %1019 = vst.msk [vmem:[%s1990_s3 + $0x20] sm:$0xff] %vm1014_vm1, %v776_v4  ;;  %1051 = vst.msk [vmem:[%s1990_s3 + $0x120] sm:$0xff] %vm1014_vm1, %v904_v5  ;;  %v787_v7 = vadd.f32 %v1189_v43, %v1638_v42  ;;  %v915_v11 = vadd.f32 %v1221_v6, %v343_v10  ;;  %v383_v12 = vpop.permute.xlu1 %382  ;;  %v378_v13 = vpop.permute.xlu0 %377 }
  0xdb   :  { %v778_v14 = vpop.f32.mrf.mxu0  ;;  %v906_v41 = vpop.f32.mrf.mxu1 }
  0xdc   :  { %1022 = vst.msk [vmem:[%s1990_s3 + $0x38] sm:$0xff] %vm1014_vm1, %v787_v7  ;;  %1054 = vst.msk [vmem:[%s1990_s3 + $0x138] sm:$0xff] %vm1014_vm1, %v915_v11  ;;  %v779_v9 = vadd.f32 %v778_v14, %v1634_v40  ;;  %v907_v15 = vadd.f32 %v906_v41, %v333_v8 }
  0xdd   :  { %v1192_v18 = vpop.f32.mrf.mxu0  ;;  %v1224_v42 = vpop.f32.mrf.mxu1 }
  0xde   :  { %1020 = vst.msk [vmem:[%s1990_s3 + $0x28] sm:$0xff] %vm1014_vm1, %v779_v9  ;;  %1052 = vst.msk [vmem:[%s1990_s3 + $0x128] sm:$0xff] %vm1014_vm1, %v907_v15  ;;  %v800_v10 = vadd.f32 %v1192_v18, %v1648_v47  ;;  %v928_v19 = vadd.f32 %v1224_v42, %v358_v27  ;;  %v1764_v20 = vpop.permute.xlu1 %392  ;;  %v388_v21 = vpop.permute.xlu0 %387 }
  0xdf   :  { %v791_v40 = vpop.f32.mrf.mxu0  ;;  %v919_v8 = vpop.f32.mrf.mxu1 }
  0xe0   :  { %1025 = vst.msk [vmem:[%s1990_s3 + $0x50] sm:$0xff] %vm1014_vm1, %v800_v10  ;;  %1057 = vst.msk [vmem:[%s1990_s3 + $0x150] sm:$0xff] %vm1014_vm1, %v928_v19  ;;  %v792_v22 = vadd.f32 %v791_v40, %v1644_v45  ;;  %v920_v23 = vadd.f32 %v919_v8, %v348_v17 }
  0xe1   :  { %v1193_v47 = vpop.f32.mrf.mxu0  ;;  %v1225_v24 = vpop.f32.mrf.mxu1 }
  0xe2   :  { %1023 = vst.msk [vmem:[%s1990_s3 + $0x40] sm:$0xff] %vm1014_vm1, %v792_v22  ;;  %1055 = vst.msk [vmem:[%s1990_s3 + $0x140] sm:$0xff] %vm1014_vm1, %v920_v23  ;;  %v803_v25 = vadd.f32 %v1193_v47, %v1646_v46  ;;  %v931_v27 = vadd.f32 %v1225_v24, %v363_v26  ;;  %v398_v28 = vpop.permute.xlu0 %397  ;;  %v403_v45 = vpop.permute.xlu1 %402 }
  0xe3   :  { %v794_v29 = vpop.f32.mrf.mxu0  ;;  %v922_v30 = vpop.f32.mrf.mxu1 }
  0xe4   :  { %1026 = vst.msk [vmem:[%s1990_s3 + $0x58] sm:$0xff] %vm1014_vm1, %v803_v25  ;;  %1058 = vst.msk [vmem:[%s1990_s3 + $0x158] sm:$0xff] %vm1014_vm1, %v931_v27  ;;  %v795_v17 = vadd.f32 %v794_v29, %v1642_v44  ;;  %v923_v31 = vadd.f32 %v922_v30, %v1690_v16 }
  0xe5   :  { %v1196_v46 = vpop.f32.mrf.mxu0  ;;  %v1228_v26 = vpop.f32.mrf.mxu1 }
  0xe6   :  { %1024 = vst.msk [vmem:[%s1990_s3 + $0x48] sm:$0xff] %vm1014_vm1, %v795_v17  ;;  %1056 = vst.msk [vmem:[%s1990_s3 + $0x148] sm:$0xff] %vm1014_vm1, %v923_v31  ;;  %v816_v32 = vadd.f32 %v1196_v46, %v1656_v51  ;;  %v944_v33 = vadd.f32 %v1228_v26, %v378_v13  ;;  %v408_v34 = vpop.permute.xlu0 %407  ;;  %v1812_v51 = vpop.permute.xlu1 %412 }
  0xe7   :  { %v807_v35 = vpop.f32.mrf.mxu0  ;;  %v935_v44 = vpop.f32.mrf.mxu1 }
  0xe8   :  { %1029 = vst.msk [vmem:[%s1990_s3 + $0x70] sm:$0xff] %vm1014_vm1, %v816_v32  ;;  %1061 = vst.msk [vmem:[%s1990_s3 + $0x170] sm:$0xff] %vm1014_vm1, %v944_v33  ;;  %v808_v16 = vadd.f32 %v807_v35, %v1652_v49  ;;  %v936_v38 = vadd.f32 %v935_v44, %v368_v37 }
  0xe9   :  { %v1197_v39 = vpop.f32.mrf.mxu0  ;;  %v1229_v4 = vpop.f32.mrf.mxu1 }
  0xea   :  { %1027 = vst.msk [vmem:[%s1990_s3 + $0x60] sm:$0xff] %vm1014_vm1, %v808_v16  ;;  %1059 = vst.msk [vmem:[%s1990_s3 + $0x160] sm:$0xff] %vm1014_vm1, %v936_v38  ;;  %v819_v5 = vadd.f32 %v1197_v39, %v1654_v50  ;;  %v947_v43 = vadd.f32 %v1229_v4, %v383_v12  ;;  %v418_v37 = vpop.permute.xlu0 %417 }
  0xeb   :  { %v810_v6 = vpop.f32.mrf.mxu0  ;;  %v938_v49 = vpop.f32.mrf.mxu1 }
  0xec   :  { %1030 = vst.msk [vmem:[%s1990_s3 + $0x78] sm:$0xff] %vm1014_vm1, %v819_v5  ;;  %1062 = vst.msk [vmem:[%s1990_s3 + $0x178] sm:$0xff] %vm1014_vm1, %v947_v43  ;;  %v811_v7 = vadd.f32 %v810_v6, %v1650_v48  ;;  %v939_v11 = vadd.f32 %v938_v49, %v1726_v36  ;;  %v423_v48 = vpop.permute.xlu1 %422 }
  0xed   :  { %v1200_v13 = vpop.f32.mrf.mxu0  ;;  %v1232_v50 = vpop.f32.mrf.mxu1 }
  0xee   :  { %1028 = vst.msk [vmem:[%s1990_s3 + $0x68] sm:$0xff] %vm1014_vm1, %v811_v7  ;;  %1060 = vst.msk [vmem:[%s1990_s3 + $0x168] sm:$0xff] %vm1014_vm1, %v939_v11  ;;  %v832_v12 = vadd.f32 %v1200_v13, %v1664_v55  ;;  %v960_v14 = vadd.f32 %v1232_v50, %v398_v28  ;;  %v428_v55 = vpop.permute.xlu0 %427 }
  0xef   :  { %v823_v41 = vpop.f32.mrf.mxu0  ;;  %v951_v9 = vpop.f32.mrf.mxu1 }
  0xf0   :  { %1033 = vst.msk [vmem:[%s1990_s3 + $0x90] sm:$0xff] %vm1014_vm1, %v832_v12  ;;  %1065 = vst.msk [vmem:[%s1990_s3 + $0x190] sm:$0xff] %vm1014_vm1, %v960_v14  ;;  %v824_v36 = vadd.f32 %v823_v41, %v1660_v53  ;;  %v952_v15 = vadd.f32 %v951_v9, %v388_v21 }
  0xf1   :  { %v1201_v18 = vpop.f32.mrf.mxu0  ;;  %v1233_v42 = vpop.f32.mrf.mxu1 }
  0xf2   :  { %1031 = vst.msk [vmem:[%s1990_s3 + $0x80] sm:$0xff] %vm1014_vm1, %v824_v36  ;;  %1063 = vst.msk [vmem:[%s1990_s3 + $0x180] sm:$0xff] %vm1014_vm1, %v952_v15  ;;  %v835_v10 = vadd.f32 %v1201_v18, %v1662_v54  ;;  %v963_v19 = vadd.f32 %v1233_v42, %v403_v45  ;;  %v433_v54 = vpop.permute.xlu1 %432  ;;  %v438_v27 = vpop.permute.xlu0 %437 }
  0xf3   :  { %v826_v40 = vpop.f32.mrf.mxu0  ;;  %v954_v8 = vpop.f32.mrf.mxu1 }
  0xf4   :  { %1034 = vst.msk [vmem:[%s1990_s3 + $0x98] sm:$0xff] %vm1014_vm1, %v835_v10  ;;  %1066 = vst.msk [vmem:[%s1990_s3 + $0x198] sm:$0xff] %vm1014_vm1, %v963_v19  ;;  %v827_v53 = vadd.f32 %v826_v40, %v1658_v52  ;;  %v955_v21 = vadd.f32 %v954_v8, %v1764_v20 }
  0xf5   :  { %v1204_v22 = vpop.f32.mrf.mxu0  ;;  %v1236_v23 = vpop.f32.mrf.mxu1 }
  0xf6   :  { %1032 = vst.msk [vmem:[%s1990_s3 + $0x88] sm:$0xff] %vm1014_vm1, %v827_v53  ;;  %1064 = vst.msk [vmem:[%s1990_s3 + $0x188] sm:$0xff] %vm1014_vm1, %v955_v21  ;;  %v848_v47 = vadd.f32 %v1204_v22, %v1672_v59  ;;  %v976_v24 = vadd.f32 %v1236_v23, %v418_v37  ;;  %v443_v46 = vpop.permute.xlu1 %442  ;;  %v448_v33 = vpop.permute.xlu0 %447 }
  0xf7   :  { %v839_v25 = vpop.f32.mrf.mxu0  ;;  %v967_v52 = vpop.f32.mrf.mxu1 }
  0xf8   :  { %1037 = vst.msk [vmem:[%s1990_s3 + $0xb0] sm:$0xff] %vm1014_vm1, %v848_v47  ;;  %1069 = vst.msk [vmem:[%s1990_s3 + $0x1b0] sm:$0xff] %vm1014_vm1, %v976_v24  ;;  %v840_v20 = vadd.f32 %v839_v25, %v1668_v57  ;;  %v968_v28 = vadd.f32 %v967_v52, %v408_v34 }
  0xf9   :  { %v1205_v29 = vpop.f32.mrf.mxu0  ;;  %v1237_v30 = vpop.f32.mrf.mxu1 }
  0xfa   :  { %1035 = vst.msk [vmem:[%s1990_s3 + $0xa0] sm:$0xff] %vm1014_vm1, %v840_v20  ;;  %1067 = vst.msk [vmem:[%s1990_s3 + $0x1a0] sm:$0xff] %vm1014_vm1, %v968_v28  ;;  %v851_v59 = vadd.f32 %v1205_v29, %v1670_v58  ;;  %v979_v45 = vadd.f32 %v1237_v30, %v423_v48 }
  0xfb   :  { %v842_v17 = vpop.f32.mrf.mxu0  ;;  %v970_v31 = vpop.f32.mrf.mxu1 }
  0xfc   :  { %1038 = vst.msk [vmem:[%s1990_s3 + $0xb8] sm:$0xff] %vm1014_vm1, %v851_v59  ;;  %1070 = vst.msk [vmem:[%s1990_s3 + $0x1b8] sm:$0xff] %vm1014_vm1, %v979_v45  ;;  %v843_v57 = vadd.f32 %v842_v17, %v1666_v56  ;;  %v971_v26 = vadd.f32 %v970_v31, %v1812_v51  ;;  %v453_v51 = vpop.permute.xlu1 %452 }
  0xfd   :  { %v1208_v32 = vpop.f32.mrf.mxu0  ;;  %v1240_v58 = vpop.f32.mrf.mxu1 }
  0xfe   :  { %1036 = vst.msk [vmem:[%s1990_s3 + $0xa8] sm:$0xff] %vm1014_vm1, %v843_v57  ;;  %1068 = vst.msk [vmem:[%s1990_s3 + $0x1a8] sm:$0xff] %vm1014_vm1, %v971_v26  ;;  %v864_v34 = vadd.f32 %v1208_v32, %v1680_v63  ;;  %v992_v35 = vadd.f32 %v1240_v58, %v438_v27 }
  0xff   :  { %v855_v44 = vpop.f32.mrf.mxu0  ;;  %v983_v56 = vpop.f32.mrf.mxu1 }
 0x100   :  { %1041 = vst.msk [vmem:[%s1990_s3 + $0xd0] sm:$0xff] %vm1014_vm1, %v864_v34  ;;  %1073 = vst.msk [vmem:[%s1990_s3 + $0x1d0] sm:$0xff] %vm1014_vm1, %v992_v35  ;;  %v856_v16 = vadd.f32 %v855_v44, %v1676_v61  ;;  %v984_v38 = vadd.f32 %v983_v56, %v428_v55  ;;  %v458_v61 = vpop.permute.xlu0 %457  ;;  %v463_v14 = vpop.permute.xlu1 %462 }
 0x101   :  { %v1209_v39 = vpop.f32.mrf.mxu0  ;;  %v1241_v4 = vpop.f32.mrf.mxu1 }
 0x102   :  { %1039 = vst.msk [vmem:[%s1990_s3 + $0xc0] sm:$0xff] %vm1014_vm1, %v856_v16  ;;  %1071 = vst.msk [vmem:[%s1990_s3 + $0x1c0] sm:$0xff] %vm1014_vm1, %v984_v38  ;;  %v867_v63 = vadd.f32 %v1209_v39, %v1678_v62  ;;  %v995_v5 = vadd.f32 %v1241_v4, %v443_v46 }
 0x103   :  { %v858_v43 = vpop.f32.mrf.mxu0  ;;  %v986_v6 = vpop.f32.mrf.mxu1 }
 0x104   :  { %1042 = vst.msk [vmem:[%s1990_s3 + $0xd8] sm:$0xff] %vm1014_vm1, %v867_v63  ;;  %1074 = vst.msk [vmem:[%s1990_s3 + $0x1d8] sm:$0xff] %vm1014_vm1, %v995_v5  ;;  %v859_v49 = vadd.f32 %v858_v43, %v1674_v60  ;;  %v987_v37 = vadd.f32 %v986_v6, %v433_v54 }
 0x105   :  { %v1212_v7 = vpop.f32.mrf.mxu0  ;;  %v1244_v11 = vpop.f32.mrf.mxu1 }
 0x106   :  { %1040 = vst.msk [vmem:[%s1990_s3 + $0xc8] sm:$0xff] %vm1014_vm1, %v859_v49  ;;  %1072 = vst.msk [vmem:[%s1990_s3 + $0x1c8] sm:$0xff] %vm1014_vm1, %v987_v37  ;;  %v880_v62 = vadd.f32 %v1212_v7, %v1688_v3  ;;  %v1008_v13 = vadd.f32 %v1244_v11, %v458_v61 }
 0x107   :  { %v871_v50 = vpop.f32.mrf.mxu0  ;;  %v999_v12 = vpop.f32.mrf.mxu1 }
 0x108   :  { %1045 = vst.msk [vmem:[%s1990_s3 + $0xf0] sm:$0xff] %vm1014_vm1, %v880_v62  ;;  %1077 = vst.msk [vmem:[%s1990_s3 + $0x1f0] sm:$0xff] %vm1014_vm1, %v1008_v13  ;;  %v872_v60 = vadd.f32 %v871_v50, %v1684_v1  ;;  %v1000_v41 = vadd.f32 %v999_v12, %v448_v33 }
 0x109   :  { %v1213_v9 = vpop.f32.mrf.mxu0  ;;  %v1245_v48 = vpop.f32.mrf.mxu1 }
 0x10a   :  { %1043 = vst.msk [vmem:[%s1990_s3 + $0xe0] sm:$0xff] %vm1014_vm1, %v872_v60  ;;  %1075 = vst.msk [vmem:[%s1990_s3 + $0x1e0] sm:$0xff] %vm1014_vm1, %v1000_v41  ;;  %v883_v3 = vadd.f32 %v1213_v9, %v1686_v2  ;;  %v1011_v36 = vadd.f32 %v1245_v48, %v463_v14 }
 0x10b   :  { %v874_v15 = vpop.f32.mrf.mxu0  ;;  %v1002_v18 = vpop.f32.mrf.mxu1 }
 0x10c   :  { %1046 = vst.msk [vmem:[%s1990_s3 + $0xf8] sm:$0xff] %vm1014_vm1, %v883_v3  ;;  %1078 = vst.msk [vmem:[%s1990_s3 + $0x1f8] sm:$0xff] %vm1014_vm1, %v1011_v36  ;;  %v875_v1 = vadd.f32 %v874_v15, %v1682_v0  ;;  %v1003_v42 = vadd.f32 %v1002_v18, %v453_v51 }
 0x10e   :  { %1044 = vst.msk [vmem:[%s1990_s3 + $0xe8] sm:$0xff] %vm1014_vm1, %v875_v1  ;;  %1076 = vst.msk [vmem:[%s1990_s3 + $0x1e8] sm:$0xff] %vm1014_vm1, %v1003_v42 }

// kernel: dcgen_forward.3
= control target key start
LH: loop header
LB: loop body
LE: loop exit
PB: predicated region body
PF: predicated region fallthrough
CT: control target
= control target key end

     0   :  { %vm52_vm0 = vcmask 261120   ;;  %v7326_v16 = vmov 0   ;;  %s4907_s24 = smov 1   ;;  %v7329_v60 = vmov 1   ;;  %s4910_s21 = smov 2   ;;  %s7311_s0 = inlined_call_operand.vmem [shape: f32[32,32], index: 0, kind: input, shape index: {}]   ;;  %s7312_s5 = inlined_call_operand.vmem [shape: f32[32,2], index: 5, kind: input, shape index: {}]   ;;  %s7313_s1 = inlined_call_operand.vmem [shape: f32[32,128], index: 1, kind: input, shape index: {}]   ;;  %s7314_s3 = inlined_call_operand.vmem [shape: f32[9,128], index: 3, kind: input, shape index: {}]   ;;  %s7315_s8 = inlined_call_operand.vmem [shape: bf16[32,288], index: 8, kind: input, shape index: {}]   ;;  %s7316_s9 = inlined_call_operand.vmem [shape: f32[32,1], index: 9, kind: input, shape index: {}]   ;;  %s7317_s6 = inlined_call_operand.vmem [shape: f32[32,2], index: 6, kind: input, shape index: {}]   ;;  %s7318_s2 = inlined_call_operand.vmem [shape: f32[128,512], index: 2, kind: input, shape index: {}]   ;;  %s7319_s10 = inlined_call_operand.vmem [shape: bf16[16,288], index: 10, kind: input, shape index: {}]   ;;  %s7320_s11 = inlined_call_operand.vmem [shape: f32[16,1], index: 11, kind: input, shape index: {}]   ;;  %s7321_s4 = inlined_call_operand.vmem [shape: f32[9,512], index: 4, kind: input, shape index: {}]   ;;  %s7322_s7 = inlined_call_operand.vmem [shape: f32[16,2], index: 7, kind: input, shape index: {}]   ;;  %s7323_s12 = inlined_call_operand.vmem [shape: bf16[3,144], index: 12, kind: input, shape index: {}]   ;;  %s7324_s13 = inlined_call_operand.vmem [shape: f32[3,1], index: 13, kind: input, shape index: {}]   ;;  %s7325_s14 = inlined_call_operand.vmem [shape: f32[3,512], index: 14, kind: output, shape index: {}]  }
   0x1   :  { %v5002_v0 = vld [vmem:[%s7311_s0] sm:$0xff]  ;;  %v5007_v1 = vld [vmem:[%s7311_s0 + $0x8] sm:$0xff]  ;;  %v5021_v7 = vld [vmem:[%s7311_s0 + $0x10] sm:$0xff]  ;;  %4827 = vset.pattern.permute.xlu0 %v7326_v16  ;;  %4828 = vset.pattern.permute.xlu1 %v7326_v16  ;;  %s4911_s22 = smov 114   ;;  %s4912_s23 = smov 14  }
   0x2   :  { %v53_v2 = vsel %vm52_vm0, %v5002_v0, 0.0  ;;  %v69_v3 = vmul.f32 %v5002_v0, %v5002_v0  ;;  %v70_v4 = vmul.f32 %v5007_v1, %v5007_v1  ;;  %v56_v6 = vsel %vm52_vm0, %v5007_v1, 0.0  ;;  %v5027_v9 = vld [vmem:[%s7311_s0 + $0x18] sm:$0xff]  ;;  %v97_v45 = vld [vmem:[%s7312_s5] sm:$0xff]  ;;  %v98_v48 = vld [vmem:[%s7312_s5 + $0x8] sm:$0xff]  ;;  %s4909_s0 = smov 112  }
   0x3   :  { %54 = vadd.xlane.f32.xlu0 %v53_v2  ;;  %v59_v10 = vsel %vm52_vm0, %v5021_v7, 0.0  ;;  %v71_v11 = vmul.f32 %v5021_v7, %v5021_v7  ;;  %v62_v12 = vsel %vm52_vm0, %v5027_v9, 0.0  ;;  %v72_v13 = vmul.f32 %v5027_v9, %v5027_v9  ;;  %v99_v53 = vld [vmem:[%s7312_s5 + $0x10] sm:$0xff]  ;;  %v100_v55 = vld [vmem:[%s7312_s5 + $0x18] sm:$0xff]  ;;  %v186_v2 = vld [vmem:[%s7313_s1 + $0x8] sm:$0xff]  ;;  %s4913_s25 = smov 126  }
   0x4   :  { %v73_v5 = vsel %vm52_vm0, %v69_v3, 0.0  ;;  %v76_v8 = vsel %vm52_vm0, %v70_v4, 0.0  ;;  %v188_v62 = vld [vmem:[%s7313_s1 + $0x18] sm:$0xff]  ;;  %v187_v63 = vld [vmem:[%s7313_s1 + $0x10] sm:$0xff]  ;;  %s4914_s26 = smov 16   ;;  %s4915_s27 = smov 18  }
   0x5   :  { %74 = vadd.xlane.f32.xlu1 %v73_v5  ;;  %v79_v14 = vsel %vm52_vm0, %v71_v11, 0.0  ;;  %v82_v15 = vsel %vm52_vm0, %v72_v13, 0.0  ;;  %4787 = vmatprep.subr.mxu0 %v188_v62  ;;  %v185_v5 = vld [vmem:[%s7313_s1] sm:$0xff]  ;;  %s4916_s28 = smov 110   ;;  %s4919_s29 = smov 32  }
   0x6   :  { %4788 = vmatpush3.msra.mxu0 %v188_v62  ;;  %s4920_s30 = smov 34   ;;  %s4921_s5 = smov 96  }
   0x7   :  { %57 = vadd.xlane.f32.xlu0 %v56_v6  ;;  %4789 = vmatprep.subr.mxu0 %v187_v63  ;;  %s4922_s15 = smov 98  }
   0x8   :  { %4790 = vmatpush3.msra.mxu0 %v187_v63 }
   0x9   :  { %77 = vadd.xlane.f32.xlu1 %v76_v8  ;;  %4791 = vmatprep.subr.mxu0 %v186_v2 }
   0xa   :  { %4792 = vmatpush3.msra.mxu0 %v186_v2 }
   0xb   :  { %60 = vadd.xlane.f32.xlu0 %v59_v10  ;;  %4793 = vmatprep.subr.mxu0 %v185_v5 }
   0xc   :  { %4794 = vmatpush3.msra.mxu0 %v185_v5 }
   0xd   :  { %63 = vadd.xlane.f32.xlu1 %v62_v12 }
   0xf   :  { %80 = vadd.xlane.f32.xlu0 %v79_v14 }
  0x11   :  { %83 = vadd.xlane.f32.xlu1 %v82_v15 }
  0x8c   :  { %v55_v17 = vpop.xlane.xlu0 %54 }
  0x8d   :  { %v65_v18 = vmul.f32 0.03125, %v55_v17 }
  0x8e   :  { %v75_v19 = vpop.xlane.xlu1 %74 }
  0x8f   :  { %v89_v20 = vmul.f32 %v65_v18, %v65_v18  ;;  %v85_v21 = vmul.f32 0.03125, %v75_v19 }
  0x90   :  { %v58_v22 = vpop.xlane.xlu0 %57 }
  0x91   :  { %v93_v23 = vsub.f32 %v85_v21, %v89_v20  ;;  %v66_v24 = vmul.f32 0.03125, %v58_v22 }
  0x92   :  { %v78_v25 = vpop.xlane.xlu1 %77 }
  0x93   :  { %v101_v26 = vadd.f32 1e-05, %v93_v23  ;;  %v90_v27 = vmul.f32 %v66_v24, %v66_v24  ;;  %v86_v28 = vmul.f32 0.03125, %v78_v25 }
  0x94   :  { %v61_v29 = vpop.xlane.xlu0 %60 }
  0x95   :  { %4874 = vrsqrt.f32 %v101_v26  ;;  %v94_v30 = vsub.f32 %v86_v28, %v90_v27  ;;  %v67_v31 = vmul.f32 0.03125, %v61_v29 }
  0x96   :  { %v64_v32 = vpop.xlane.xlu1 %63 }
  0x97   :  { %v102_v33 = vadd.f32 1e-05, %v94_v30  ;;  %v91_v34 = vmul.f32 %v67_v31, %v67_v31  ;;  %v68_v35 = vmul.f32 0.03125, %v64_v32 }
  0x98   :  { %v81_v36 = vpop.xlane.xlu0 %80 }
  0x99   :  { %4876 = vrsqrt.f32 %v102_v33  ;;  %v92_v37 = vmul.f32 %v68_v35, %v68_v35  ;;  %v87_v38 = vmul.f32 0.03125, %v81_v36 }
  0x9a   :  { %v84_v39 = vpop.xlane.xlu1 %83 }
  0x9b   :  { %v95_v40 = vsub.f32 %v87_v38, %v91_v34  ;;  %v88_v41 = vmul.f32 0.03125, %v84_v39 }
  0x9d   :  { %v103_v42 = vadd.f32 1e-05, %v95_v40  ;;  %v96_v43 = vsub.f32 %v88_v41, %v92_v37 }
  0x9f   :  { %4878 = vrsqrt.f32 %v103_v42  ;;  %v104_v44 = vadd.f32 1e-05, %v96_v43  ;;  %v4863_v42 = vld [vmem:[%s7315_s8 + $0x4] ss:$12 sps:$4 sm:$0xff]   ;;  %v4865_v43 = vld [vmem:[%s7315_s8 + $0x8] ss:$12 sps:$4 sm:$0xff]  }
  0xa0   :  { %848 = vmatprep.mubr.bf16.mxu1 %v4863_v42 }
  0xa1   :  { %4880 = vrsqrt.f32 %v104_v44  ;;  %v648_v44 = vld [vmem:[%s7316_s9] sm:$0xff] }
  0xa2   :  { %v4875_v46 = vpop.eup %4874 }
  0xa3   :  { %v109_v47 = vmul.f32 %v4875_v46, %v97_v45  ;;  %v651_v46 = vld [vmem:[%s7316_s9 + $0x18] sm:$0xff] }
  0xa5   :  { %v113_v49 = vmul.f32 %v109_v47, %v65_v18 }
  0xa6   :  { %v4877_v50 = vpop.eup %4876 }
  0xa7   :  { %121 = vrot.lane.b32.xlu0 %v113_v49, %s4907_s24  ;;  %v110_v51 = vmul.f32 %v4877_v50, %v98_v48 }
  0xa9   :  { %v114_v52 = vmul.f32 %v110_v51, %v66_v24 }
  0xab   :  { %139 = vperm.xlu0 %4827, %v109_v47   ;;  %123 = vrot.lane.b32.xlu1 %v114_v52, %s4907_s24  ;;  %v650_v47 = vld [vmem:[%s7316_s9 + $0x10] sm:$0xff] }
  0xac   :  { %v4879_v54 = vpop.eup %4878 }
  0xad   :  { %v111_v56 = vmul.f32 %v4879_v54, %v99_v53 }
  0xae   :  { %v4881_v57 = vpop.eup %4880 }
  0xaf   :  { %v115_v58 = vmul.f32 %v111_v56, %v67_v31  ;;  %v112_v59 = vmul.f32 %v4881_v57, %v100_v55  ;;  %4831 = vset.pattern.permute.xlu0 %v7329_v60 }
  0xb1   :  { %125 = vrot.lane.b32.xlu1 %v115_v58, %s4907_s24  ;;  %v116_v61 = vmul.f32 %v112_v59, %v68_v35 }
  0xb5   :  { %127 = vrot.lane.b32.xlu1 %v116_v61, %s4907_s24 }
  0xb9   :  { %144 = vperm.xlu1 %4828, %v110_v51  }
  0xbd   :  { %149 = vperm.xlu1 %4828, %v111_v56  }
  0xc1   :  { %4829 = vset.pattern.permute.xlu1 %v7329_v60 }
 0x119   :  { %v122_v3 = vpop.permute.xlu0 %121 }
 0x11a   :  { %v133_v4 = vsub.f32 %v97_v45, %v122_v3  ;;  %v649_v45 = vld [vmem:[%s7316_s9 + $0x8] sm:$0xff] }
 0x11c   :  { %163 = vperm.xlu1 %4829, %v133_v4  }
 0x11d   :  { %v124_v6 = vpop.permute.xlu1 %123 }
 0x11e   :  { %v134_v8 = vsub.f32 %v98_v48, %v124_v6 }
 0x120   :  { %168 = vperm.xlu0 %4831, %v134_v8   ;;  %4830 = vset.pattern.permute.xlu1 %v7326_v16 }
 0x121   :  { %154 = vperm.xlu1 %4830, %v112_v59  }
 0x123   :  { %v126_v10 = vpop.permute.xlu1 %125 }
 0x124   :  { %v135_v11 = vsub.f32 %v99_v53, %v126_v10 }
 0x125   :  { %4832 = vset.pattern.permute.xlu1 %v7329_v60 }
 0x126   :  { %173 = vperm.xlu0 %4831, %v135_v11   ;;  %v140_v15 = vpop.permute.xlu0 %139 }
 0x127   :  { %v128_v12 = vpop.permute.xlu1 %127  ;;  %v157_v18 = vmul.f32 %v140_v15, %v5002_v0 }
 0x128   :  { %v136_v13 = vsub.f32 %v100_v55, %v128_v12 }
 0x12a   :  { %178 = vperm.xlu1 %4832, %v136_v13   ;;  %4833 = vset.pattern.permute.xlu0 %v7326_v16 }
 0x12e   :  { %4834 = vset.pattern.permute.xlu1 %v7326_v16 }
 0x134   :  { %v145_v14 = vpop.permute.xlu1 %144 }
 0x135   :  { %v158_v21 = vmul.f32 %v145_v14, %v5007_v1  ;;  %v7328_v1 = vlaneseq }
 0x137   :  { %v5084_v30 = vshrl.u32 %v7328_v1, 7 }
 0x138   :  { %v150_v17 = vpop.permute.xlu1 %149 }
 0x139   :  { %v159_v24 = vmul.f32 %v150_v17, %v5021_v7  ;;  %v5087_v31 = vsub.s32 4, %v5084_v30  ;;  %v5092_v7 = vld [vmem:[%s7314_s3] sm:$0xff]  ;;  %v5125_v48 = vsub.s32 7, %v5084_v30  ;;  %v5130_v50 = vsub.s32 3, %v5084_v30 }
 0x13a   :  { %v5135_v56 = vsub.s32 6, %v5084_v30  ;;  %v5140_v2 = vsub.s32 2, %v5084_v30  ;;  %v5145_v11 = vsub.s32 5, %v5084_v30 }
 0x13b   :  { %v543_v49 = vrot.slane %v5092_v7, %v5125_v48  ;;  %v407_v55 = vrot.slane %v5092_v7, %v5130_v50 }
 0x13c   :  { %v507_v63 = vrot.slane %v5092_v7, %v5135_v56  ;;  %v371_v10 = vrot.slane %v5092_v7, %v5140_v2  ;;  %7441 = vst [vmem:[#allocation5_spill] sm:$0xff] %v5145_v11 }
 0x197   :  { %v164_v19 = vpop.permute.xlu1 %163 }
 0x198   :  { %v181_v20 = vadd.f32 %v164_v19, %v157_v18  ;;  %v471_v18 = vrot.slane %v5092_v7, %v5145_v11  ;;  %v5150_v19 = vsub.s32 1, %v5084_v30 }
 0x19a   :  { %4795 = vmatprep.mubr.msk.f32.mxu0 %vm52_vm0, %v181_v20 }
 0x19b   :  { %v169_v22 = vpop.permute.xlu0 %168 }
 0x19c   :  { %v182_v23 = vadd.f32 %v169_v22, %v158_v21  ;;  %v155_v25 = vpop.permute.xlu1 %154 }
 0x19d   :  { %v160_v28 = vmul.f32 %v155_v25, %v5027_v9  ;;  %v435_v9 = vrot.slane %v5092_v7, %v5087_v31  ;;  %v335_v25 = vrot.slane %v5092_v7, %v5150_v19 }
 0x19e   :  { %4796 = vmatmul.mubr.msk.f32.vlgmr.msra.gmra.mxu0 %vm52_vm0, %v182_v23 }
 0x1a1   :  { %v174_v26 = vpop.permute.xlu0 %173 }
 0x1a2   :  { %v183_v27 = vadd.f32 %v174_v26, %v159_v24 }
 0x1a4   :  { %4798 = vmatprep.mubr.msk.f32.mxu0 %vm52_vm0, %v183_v27 }
 0x1a5   :  { %v179_v0 = vpop.permute.xlu1 %178 }
 0x1a6   :  { %v184_v29 = vadd.f32 %v179_v0, %v160_v28 }
 0x1a8   :  { %4799 = vmatmul.mubr.msk.f32.gmra.mxu0 %vm52_vm0, %v184_v29 }
 0x1a9   :  { %4805 = vmatprep.mubr.msk.bf16.mxu0 %vm52_vm0, %v4865_v43 }
 0x25e   :  { %v4797_v32 = vpop.f32.mrf.mxu0 }
 0x25f   :  { %534 = vrot.lane.b32.xlu1 %v4797_v32, %s4909_s0  ;;  %v437_v34 = vmul.f32 %v4797_v32, %v435_v9 }
 0x260   :  { %v267_v33 = vpop.f32.mrf.mxu0 }
 0x261   :  { %v436_v35 = vmul.f32 %v435_v9, %v267_v33  ;;  %532 = vrot.lane.b32.xlu0 %v267_v33, %s4909_s0 }
 0x263   :  { %v4575_v36 = vpack.c.bf16 %v437_v34, %v436_v35  ;;  %398 = vrot.lane.b32.xlu1 %v4797_v32, %s4910_s21 }
 0x265   :  { %4629 = vst [vmem:[#allocation2 + $0x40] sm:$0xff] %v4575_v36   ;;  %396 = vrot.lane.b32.xlu0 %v267_v33, %s4910_s21 }
 0x267   :  { %498 = vrot.lane.b32.xlu1 %v4797_v32, %s4911_s22 }
 0x268   :  { %v4800_v37 = vpop.f32.mrf.mxu0 }
 0x269   :  { %496 = vrot.lane.b32.xlu0 %v267_v33, %s4911_s22  ;;  %v439_v39 = vmul.f32 %v4800_v37, %v435_v9 }
 0x26a   :  { %v277_v38 = vpop.f32.mrf.mxu0 }
 0x26b   :  { %v438_v40 = vmul.f32 %v435_v9, %v277_v38  ;;  %362 = vrot.lane.b32.xlu1 %v4797_v32, %s4912_s23 }
 0x26d   :  { %v4580_v41 = vpack.c.bf16 %v439_v39, %v438_v40  ;;  %360 = vrot.lane.b32.xlu0 %v267_v33, %s4912_s23 }
 0x26f   :  { %4630 = vst [vmem:[#allocation2 + $0x48] sm:$0xff] %v4580_v41   ;;  %462 = vrot.lane.b32.xlu1 %v4797_v32, %s4913_s25 }
 0x271   :  { %460 = vrot.lane.b32.xlu0 %v267_v33, %s4913_s25 }
 0x273   :  { %326 = vrot.lane.b32.xlu1 %v4797_v32, %s4914_s26 }
 0x275   :  { %324 = vrot.lane.b32.xlu0 %v267_v33, %s4914_s26 }
 0x277   :  { %538 = vrot.lane.b32.xlu1 %v4800_v37, %s4909_s0 }
 0x279   :  { %536 = vrot.lane.b32.xlu0 %v277_v38, %s4909_s0 }
 0x27b   :  { %402 = vrot.lane.b32.xlu1 %v4800_v37, %s4910_s21 }
 0x27d   :  { %400 = vrot.lane.b32.xlu0 %v277_v38, %s4910_s21 }
 0x27f   :  { %502 = vrot.lane.b32.xlu1 %v4800_v37, %s4911_s22 }
 0x281   :  { %500 = vrot.lane.b32.xlu0 %v277_v38, %s4911_s22 }
 0x283   :  { %366 = vrot.lane.b32.xlu1 %v4800_v37, %s4912_s23 }
 0x285   :  { %364 = vrot.lane.b32.xlu0 %v277_v38, %s4912_s23 }
 0x287   :  { %466 = vrot.lane.b32.xlu1 %v4800_v37, %s4913_s25 }
 0x289   :  { %464 = vrot.lane.b32.xlu0 %v277_v38, %s4913_s25 }
 0x28b   :  { %330 = vrot.lane.b32.xlu1 %v4800_v37, %s4914_s26 }
 0x28d   :  { %328 = vrot.lane.b32.xlu0 %v277_v38, %s4914_s26 }
 0x28f   :  { %294 = vrot.lane.b32.xlu1 %v4800_v37, %s4915_s27 }
 0x291   :  { %288 = vrot.lane.b32.xlu0 %v267_v33, %s4915_s27 }
 0x293   :  { %574 = vrot.lane.b32.xlu1 %v4800_v37, %s4916_s28 }
 0x295   :  { %292 = vrot.lane.b32.xlu0 %v277_v38, %s4915_s27 }
 0x297   :  { %290 = vrot.lane.b32.xlu1 %v4797_v32, %s4915_s27 }
 0x299   :  { %572 = vrot.lane.b32.xlu0 %v277_v38, %s4916_s28 }
 0x29b   :  { %570 = vrot.lane.b32.xlu1 %v4797_v32, %s4916_s28 }
 0x29d   :  { %568 = vrot.lane.b32.xlu0 %v267_v33, %s4916_s28 }
 0x29f   :  { %659 = vperm.xlu1 %4834, %v649_v45  }
 0x2a1   :  { %654 = vperm.xlu0 %4833, %v648_v44  }
 0x2a3   :  { %664 = vperm.xlu1 %4834, %v650_v47  }
 0x2a5   :  { %669 = vperm.xlu0 %4833, %v651_v46  }
 0x2a9   :  { %4835 = vset.pattern.permute.xlu0 %v7329_v60 }
 0x2d1   :  { %v535_v51 = vpop.permute.xlu1 %534 }
 0x2d2   :  { %v545_v53 = vmul.f32 %v543_v49, %v535_v51 }
 0x2d3   :  { %v533_v52 = vpop.permute.xlu0 %532 }
 0x2d4   :  { %v544_v54 = vmul.f32 %v543_v49, %v533_v52 }
 0x2d5   :  { %v399_v57 = vpop.permute.xlu1 %398 }
 0x2d6   :  { %v4605_v58 = vpack.c.bf16 %v545_v53, %v544_v54  ;;  %v409_v61 = vmul.f32 %v407_v55, %v399_v57 }
 0x2d7   :  { %v397_v59 = vpop.permute.xlu0 %396 }
 0x2d8   :  { %4635 = vst [vmem:[#allocation2 + $0x70] sm:$0xff] %v4605_v58   ;;  %v408_v62 = vmul.f32 %v407_v55, %v397_v59 }
 0x2d9   :  { %v499_v3 = vpop.permute.xlu1 %498 }
 0x2da   :  { %v4565_v4 = vpack.c.bf16 %v409_v61, %v408_v62  ;;  %v509_v6 = vmul.f32 %v507_v63, %v499_v3 }
 0x2db   :  { %v497_v5 = vpop.permute.xlu0 %496 }
 0x2dc   :  { %4627 = vst [vmem:[#allocation2 + $0x30] sm:$0xff] %v4565_v4   ;;  %v508_v8 = vmul.f32 %v507_v63, %v497_v5 }
 0x2dd   :  { %v363_v12 = vpop.permute.xlu1 %362 }
 0x2de   :  { %v4595_v13 = vpack.c.bf16 %v509_v6, %v508_v8  ;;  %v373_v15 = vmul.f32 %v371_v10, %v363_v12 }
 0x2df   :  { %v361_v14 = vpop.permute.xlu0 %360  ;;  %v4846_v62 = vld [vmem:[#allocation2 + $0x70] sm:$0xff]  }
 0x2e0   :  { %4633 = vst [vmem:[#allocation2 + $0x60] sm:$0xff] %v4595_v13   ;;  %v372_v17 = vmul.f32 %v371_v10, %v361_v14 }
 0x2e1   :  { %v463_v20 = vpop.permute.xlu1 %462 }
 0x2e2   :  { %v4555_v21 = vpack.c.bf16 %v373_v15, %v372_v17  ;;  %v473_v23 = vmul.f32 %v471_v18, %v463_v20 }
 0x2e3   :  { %v461_v22 = vpop.permute.xlu0 %460 }
 0x2e4   :  { %4625 = vst [vmem:[#allocation2 + $0x20] sm:$0xff] %v4555_v21   ;;  %v472_v24 = vmul.f32 %v471_v18, %v461_v22 }
 0x2e5   :  { %v327_v26 = vpop.permute.xlu1 %326 }
 0x2e6   :  { %v4585_v27 = vpack.c.bf16 %v473_v23, %v472_v24  ;;  %v337_v0 = vmul.f32 %v335_v25, %v327_v26  ;;  %v4129_v26 = vld [vmem:[%s7314_s3 + $0x8] ss:$0 sm:$0xff] }
 0x2e7   :  { %v325_v28 = vpop.permute.xlu0 %324  ;;  %v4850_v20 = vld [vmem:[#allocation2 + $0x60] sm:$0xff]  }
 0x2e8   :  { %4631 = vst [vmem:[#allocation2 + $0x50] sm:$0xff] %v4585_v27   ;;  %v336_v29 = vmul.f32 %v335_v25, %v325_v28 }
 0x2e9   :  { %v539_v9 = vpop.permute.xlu1 %538 }
 0x2ea   :  { %v4545_v32 = vpack.c.bf16 %v337_v0, %v336_v29  ;;  %v547_v34 = vmul.f32 %v543_v49, %v539_v9 }
 0x2eb   :  { %v537_v33 = vpop.permute.xlu0 %536  ;;  %v4851_v22 = vld [vmem:[#allocation2 + $0x20] sm:$0xff]  }
 0x2ec   :  { %4623 = vst [vmem:[#allocation2 + $0x10] sm:$0xff] %v4545_v32   ;;  %v546_v35 = vmul.f32 %v543_v49, %v537_v33 }
 0x2ed   :  { %v403_v36 = vpop.permute.xlu1 %402 }
 0x2ee   :  { %v4610_v37 = vpack.c.bf16 %v547_v34, %v546_v35  ;;  %v411_v39 = vmul.f32 %v407_v55, %v403_v36 }
 0x2ef   :  { %v401_v38 = vpop.permute.xlu0 %400  ;;  %v4854_v35 = vld [vmem:[#allocation2 + $0x50] sm:$0xff]  }
 0x2f0   :  { %4636 = vst [vmem:[#allocation2 + $0x78] sm:$0xff] %v4610_v37   ;;  %v410_v40 = vmul.f32 %v407_v55, %v401_v38 }
 0x2f1   :  { %v503_v41 = vpop.permute.xlu1 %502 }
 0x2f2   :  { %v4570_v42 = vpack.c.bf16 %v411_v39, %v410_v40  ;;  %v511_v44 = vmul.f32 %v507_v63, %v503_v41 }
 0x2f3   :  { %v501_v43 = vpop.permute.xlu0 %500  ;;  %v4855_v39 = vld [vmem:[#allocation2 + $0x10] sm:$0xff]  }
 0x2f4   :  { %4628 = vst [vmem:[#allocation2 + $0x38] sm:$0xff] %v4570_v42   ;;  %v510_v45 = vmul.f32 %v507_v63, %v501_v43  ;;  %v4847_v63 = vld [vmem:[#allocation2 + $0x30] sm:$0xff]   ;;  %v4856_v42 = vld [vmem:[#allocation2 + $0x48] sm:$0xff]  }
 0x2f5   :  { %v367_v46 = vpop.permute.xlu1 %366 }
 0x2f6   :  { %v4600_v47 = vpack.c.bf16 %v511_v44, %v510_v45  ;;  %v375_v53 = vmul.f32 %v371_v10, %v367_v46  ;;  %v4858_v45 = vld [vmem:[#allocation2 + $0x40] sm:$0xff]  }
 0x2f7   :  { %v365_v51 = vpop.permute.xlu0 %364  ;;  %v4844_v52 = vld [vmem:[#allocation2 + $0x78] sm:$0xff]  }
 0x2f8   :  { %4634 = vst [vmem:[#allocation2 + $0x68] sm:$0xff] %v4600_v47   ;;  %v374_v54 = vmul.f32 %v371_v10, %v365_v51  ;;  %4755 = vmatprep.subr.bf16.mxu1 %v4844_v52  ;;  %v5155_v10 = vsub.s32 0, %v5084_v30  ;;  %v4861_v51 = vld [vmem:[%s7315_s8] ss:$12 sps:$4 sm:$0xff]   ;;  %v4867_v52 = vld [vmem:[%s7315_s8 + $0x1c] ss:$12 sps:$4 sm:$0xff]  }
 0x2f9   :  { %v467_v49 = vpop.permute.xlu1 %466 }
 0x2fa   :  { %v4560_v57 = vpack.c.bf16 %v375_v53, %v374_v54  ;;  %v475_v55 = vmul.f32 %v471_v18, %v467_v49  ;;  %v4866_v54 = vld [vmem:[%s7315_s8 + $0x20] ss:$12 sps:$4 sm:$0xff]   ;;  %v4869_v49 = vld [vmem:[%s7315_s8 + $0x18] ss:$12 sps:$4 sm:$0xff]   ;;  %s4923_s8 = smov 94  }
 0x2fb   :  { %v465_v58 = vpop.permute.xlu0 %464  ;;  %v4845_v59 = vld [vmem:[#allocation2 + $0x38] sm:$0xff]  }
 0x2fc   :  { %4626 = vst [vmem:[#allocation2 + $0x28] sm:$0xff] %v4560_v57   ;;  %v474_v61 = vmul.f32 %v471_v18, %v465_v58  ;;  %4756 = vmatpush3.bf16.msra.mxu1 %v4845_v59  ;;  %v299_v18 = vrot.slane %v5092_v7, %v5155_v10 }
 0x2fd   :  { %v331_v3 = vpop.permute.xlu1 %330  ;;  %4757 = vmatprep.subr.bf16.mxu1 %v4846_v62 }
 0x2fe   :  { %v4590_v4 = vpack.c.bf16 %v475_v55, %v474_v61  ;;  %v339_v8 = vmul.f32 %v335_v25, %v331_v3 }
 0x2ff   :  { %v329_v5 = vpop.permute.xlu0 %328  ;;  %v4848_v6 = vld [vmem:[#allocation2 + $0x68] sm:$0xff]  }
 0x300   :  { %4632 = vst [vmem:[#allocation2 + $0x58] sm:$0xff] %v4590_v4   ;;  %v338_v12 = vmul.f32 %v335_v25, %v329_v5  ;;  %4758 = vmatpush3.bf16.msra.mxu1 %v4847_v63 }
 0x301   :  { %v295_v13 = vpop.permute.xlu1 %294  ;;  %4759 = vmatprep.subr.bf16.mxu1 %v4848_v6 }
 0x302   :  { %v4550_v14 = vpack.c.bf16 %v339_v8, %v338_v12  ;;  %v303_v25 = vmul.f32 %v299_v18, %v295_v13 }
 0x303   :  { %v289_v15 = vpop.permute.xlu0 %288  ;;  %v4849_v17 = vld [vmem:[#allocation2 + $0x28] sm:$0xff]  }
 0x304   :  { %4624 = vst [vmem:[#allocation2 + $0x18] sm:$0xff] %v4550_v14   ;;  %4760 = vmatpush3.bf16.msra.mxu1 %v4849_v17  ;;  %v300_v28 = vmul.f32 %v299_v18, %v289_v15 }
 0x305   :  { %v575_v21 = vpop.permute.xlu1 %574  ;;  %4761 = vmatprep.subr.bf16.mxu1 %v4850_v20 }
 0x306   :  { %v583_v32 = vmul.f32 %v4129_v26, %v575_v21 }
 0x307   :  { %v293_v23 = vpop.permute.xlu0 %292  ;;  %v4852_v24 = vld [vmem:[#allocation2 + $0x58] sm:$0xff]  }
 0x308   :  { %v302_v30 = vmul.f32 %v299_v18, %v293_v23  ;;  %4762 = vmatpush3.bf16.msra.mxu1 %v4851_v22 }
 0x309   :  { %v291_v27 = vpop.permute.xlu1 %290  ;;  %4763 = vmatprep.subr.bf16.mxu1 %v4852_v24 }
 0x30a   :  { %v4540_v0 = vpack.c.bf16 %v303_v25, %v302_v30  ;;  %v301_v29 = vmul.f32 %v299_v18, %v291_v27 }
 0x30b   :  { %v573_v7 = vpop.permute.xlu0 %572  ;;  %v4853_v9 = vld [vmem:[#allocation2 + $0x18] sm:$0xff]  }
 0x30c   :  { %4622 = vst [vmem:[#allocation2 + $0x8] sm:$0xff] %v4540_v0   ;;  %v4535_v33 = vpack.c.bf16 %v301_v29, %v300_v28  ;;  %v582_v34 = vmul.f32 %v4129_v26, %v573_v7  ;;  %4764 = vmatpush3.bf16.msra.mxu1 %v4853_v9 }
 0x30d   :  { %v571_v36 = vpop.permute.xlu1 %570  ;;  %4765 = vmatprep.subr.bf16.mxu1 %v4854_v35 }
 0x30e   :  { %4536 = vst [vmem:[#allocation2] sm:$0xff] %v4535_v33   ;;  %v4620_v37 = vpack.c.bf16 %v583_v32, %v582_v34  ;;  %v581_v40 = vmul.f32 %v4129_v26, %v571_v36 }
 0x30f   :  { %v569_v38 = vpop.permute.xlu0 %568 }
 0x310   :  { %4638 = vst [vmem:[#allocation2 + $0x88] sm:$0xff] %v4620_v37   ;;  %v580_v41 = vmul.f32 %v4129_v26, %v569_v38  ;;  %4766 = vmatpush3.bf16.msra.mxu1 %v4855_v39 }
 0x311   :  { %4767 = vmatprep.subr.bf16.mxu1 %v4856_v42 }
 0x312   :  { %v4615_v43 = vpack.c.bf16 %v581_v40, %v580_v41 }
 0x313   :  { %v4857_v44 = vld [vmem:[#allocation2 + $0x8] sm:$0xff]  }
 0x314   :  { %4637 = vst [vmem:[#allocation2 + $0x80] sm:$0xff] %v4615_v43   ;;  %4768 = vmatpush3.bf16.msra.mxu1 %v4857_v44 }
 0x315   :  { %4769 = vmatprep.subr.bf16.mxu1 %v4858_v45  ;;  %v4859_v46 = vld [vmem:[#allocation2] sm:$0xff]  }
 0x317   :  { %v4860_v47 = vld [vmem:[#allocation2 + $0x88] sm:$0xff]  }
 0x318   :  { %4770 = vmatpush3.bf16.msra.mxu1 %v4859_v46  ;;  %4801 = vmatprep.subr.bf16.mxu0 %v4860_v47 }
 0x319   :  { %4802 = vmatpush3.bf16.msra.mxu0 %v4860_v47 }
 0x31a   :  { %v660_v62 = vpop.permute.xlu1 %659 }
 0x31b   :  { %v4864_v53 = vld [vmem:[#allocation2 + $0x80] sm:$0xff]   ;;  %849 = vmatmul.mubr.bf16.vlgmr.msra.gmra.mxu1 %v4861_v51 }
 0x31c   :  { %4803 = vmatprep.subr.bf16.mxu0 %v4864_v53  ;;  %856 = vmatprep.mubr.bf16.mxu1 %v4867_v52  ;;  %v655_v59 = vpop.permute.xlu0 %654 }
 0x31d   :  { %4804 = vmatpush3.bf16.msra.mxu0 %v4864_v53 }
 0x31e   :  { %v665_v17 = vpop.permute.xlu1 %664 }
 0x320   :  { %4806 = vmatmul.mubr.msk.bf16.vlgmr.msra.gmra.mxu0 %vm52_vm0, %v4866_v54  ;;  %v670_v27 = vpop.permute.xlu0 %669 }
 0x323   :  { %857 = vmatmul.mubr.bf16.gmra.mxu1 %v4869_v49 }
 0x3db   :  { %v4771_v57 = vpop.f32.mrf.mxu1 }
 0x3dd   :  { %v4772_v58 = vpop.f32.mrf.mxu1 }
 0x3de   :  { %v4773_v55 = vadd.f32 %v4772_v58, %v4771_v57 }
 0x3df   :  { %v4774_v61 = vpop.f32.mrf.mxu1 }
 0x3e0   :  { %v4807_v3 = vpop.f32.mrf.mxu0  ;;  %v851_v4 = vadd.f32 %v4773_v55, %v655_v59 }
 0x3e1   :  { %v4775_v63 = vpop.f32.mrf.mxu1 }
 0x3e2   :  { %v4776_v5 = vadd.f32 %v4775_v63, %v4774_v61  ;;  %v899_v6 = vpop.f32.mrf.mxu0 }
 0x3e3   :  { %v5175_v8 = vadd.f32 %v899_v6, %v851_v4  ;;  %v4777_v12 = vpop.f32.mrf.mxu1 }
 0x3e4   :  { %v4808_v13 = vpop.f32.mrf.mxu0  ;;  %v854_v14 = vadd.f32 %v4776_v5, %v660_v62  ;;  %v5198_v62 = vld [vmem:[%s7317_s6] sm:$0xff] }
 0x3e5   :  { %v4778_v15 = vpop.f32.mrf.mxu1  ;;  %914 = vadd.xlane.f32.xlu1 %v5175_v8  ;;  %v926_v18 = vmul.f32 %v5175_v8, %v5175_v8 }
 0x3e6   :  { %v4779_v20 = vadd.f32 %v4778_v15, %v4777_v12  ;;  %v902_v21 = vpop.f32.mrf.mxu0  ;;  %v5205_v12 = vld [vmem:[%s7317_s6 + $0x8] sm:$0xff]  ;;  %v5211_v15 = vld [vmem:[%s7317_s6 + $0x10] sm:$0xff] }
 0x3e7   :  { %v4780_v22 = vpop.f32.mrf.mxu1  ;;  %930 = vadd.xlane.f32.xlu0 %v926_v18  ;;  %v5180_v24 = vadd.f32 %v902_v21, %v854_v14  ;;  %v5220_v21 = vld [vmem:[%s7317_s6 + $0x18] sm:$0xff] }
 0x3e8   :  { %v859_v23 = vadd.f32 %v4779_v20, %v665_v17 }
 0x3e9   :  { %v4781_v25 = vpop.f32.mrf.mxu1  ;;  %v927_v0 = vmul.f32 %v5180_v24, %v5180_v24 }
 0x3ea   :  { %v5182_v30 = vadd.f32 %v4807_v3, %v859_v23  ;;  %v4782_v26 = vadd.f32 %v4781_v25, %v4780_v22 }
 0x3eb   :  { %916 = vadd.xlane.f32.xlu0 %v5180_v24 }
 0x3ec   :  { %v862_v28 = vadd.f32 %v4782_v26, %v670_v27  ;;  %918 = vadd.xlane.f32.xlu1 %v5182_v30  ;;  %v928_v7 = vmul.f32 %v5182_v30, %v5182_v30  ;;  %v1111_v27 = vld [vmem:[%s7318_s2 + $0x1e8] sm:$0xff] }
 0x3ed   :  { %1114 = vmatprep.subr.mxu0 %v1111_v27  ;;  %v1072_v27 = vld [vmem:[%s7318_s2 + $0xb0] sm:$0xff] }
 0x3ee   :  { %v5188_v29 = vadd.f32 %v4808_v13, %v862_v28  ;;  %v1113_v28 = vld [vmem:[%s7318_s2 + $0x1f8] sm:$0xff] }
 0x3ef   :  { %932 = vadd.xlane.f32.xlu0 %v927_v0  ;;  %v1110_v0 = vld [vmem:[%s7318_s2 + $0x1e0] sm:$0xff]  ;;  %1203 = vmatprep.subr.mxu1 %v1113_v28  ;;  %v1067_v28 = vld [vmem:[%s7318_s2 + $0x88] sm:$0xff] }
 0x3f0   :  { %920 = vadd.xlane.f32.xlu1 %v5188_v29  ;;  %v929_v9 = vmul.f32 %v5188_v29, %v5188_v29  ;;  %1115 = vmatpush1.msra.mxu0 %v1110_v0  ;;  %v1069_v0 = vld [vmem:[%s7318_s2 + $0x98] sm:$0xff] }
 0x3f3   :  { %934 = vadd.xlane.f32.xlu0 %v928_v7  ;;  %v1112_v7 = vld [vmem:[%s7318_s2 + $0x1f0] sm:$0xff] }
 0x3f4   :  { %1204 = vmatpush1.msra.mxu1 %v1112_v7  ;;  %v1066_v7 = vld [vmem:[%s7318_s2 + $0x80] sm:$0xff] }
 0x3f7   :  { %936 = vadd.xlane.f32.xlu0 %v929_v9  ;;  %v1107_v9 = vld [vmem:[%s7318_s2 + $0x1c8] sm:$0xff] }
 0x3f8   :  { %1116 = vmatprep.subr.mxu0 %v1107_v9  ;;  %v1068_v9 = vld [vmem:[%s7318_s2 + $0x90] sm:$0xff] }
 0x46e   :  { %v915_v32 = vpop.xlane.xlu1 %914 }
 0x46f   :  { %v922_v33 = vmul.f32 0.0078125, %v915_v32  ;;  %v1109_v32 = vld [vmem:[%s7318_s2 + $0x1d8] sm:$0xff] }
 0x470   :  { %v931_v34 = vpop.xlane.xlu0 %930  ;;  %1205 = vmatprep.subr.mxu1 %v1109_v32  ;;  %v1063_v32 = vld [vmem:[%s7318_s2 + $0x68] sm:$0xff] }
 0x471   :  { %v942_v35 = vmul.f32 %v922_v33, %v922_v33  ;;  %v938_v36 = vmul.f32 0.0078125, %v931_v34  ;;  %v1108_v34 = vld [vmem:[%s7318_s2 + $0x1d0] sm:$0xff] }
 0x472   :  { %1206 = vmatpush1.msra.mxu1 %v1108_v34  ;;  %v1062_v34 = vld [vmem:[%s7318_s2 + $0x60] sm:$0xff] }
 0x473   :  { %v946_v37 = vsub.f32 %v938_v36, %v942_v35  ;;  %v1103_v35 = vld [vmem:[%s7318_s2 + $0x1a8] sm:$0xff]  ;;  %v1105_v36 = vld [vmem:[%s7318_s2 + $0x1b8] sm:$0xff] }
 0x474   :  { %v917_v38 = vpop.xlane.xlu0 %916  ;;  %1207 = vmatprep.subr.mxu1 %v1105_v36  ;;  %v1059_v36 = vld [vmem:[%s7318_s2 + $0x48] sm:$0xff] }
 0x475   :  { %v954_v39 = vadd.f32 0.8, %v946_v37  ;;  %v923_v40 = vmul.f32 0.0078125, %v917_v38  ;;  %v919_v41 = vpop.xlane.xlu1 %918  ;;  %v1102_v37 = vld [vmem:[%s7318_s2 + $0x1a0] sm:$0xff]  ;;  %v1104_v38 = vld [vmem:[%s7318_s2 + $0x1b0] sm:$0xff] }
 0x476   :  { %v924_v44 = vmul.f32 0.0078125, %v919_v41  ;;  %v1098_v41 = vld [vmem:[%s7318_s2 + $0x180] sm:$0xff]  ;;  %1208 = vmatpush1.msra.mxu1 %v1104_v38 }
 0x477   :  { %4882 = vrsqrt.f32 %v954_v39  ;;  %v943_v43 = vmul.f32 %v923_v40, %v923_v40  ;;  %v1099_v39 = vld [vmem:[%s7318_s2 + $0x188] sm:$0xff]  ;;  %v1058_v38 = vld [vmem:[%s7318_s2 + $0x40] sm:$0xff] }
 0x478   :  { %v933_v42 = vpop.xlane.xlu0 %932  ;;  %v944_v52 = vmul.f32 %v924_v44, %v924_v44 }
 0x479   :  { %v939_v45 = vmul.f32 0.0078125, %v933_v42  ;;  %v921_v46 = vpop.xlane.xlu1 %920  ;;  %v1100_v42 = vld [vmem:[%s7318_s2 + $0x190] sm:$0xff] }
 0x47a   :  { %v925_v54 = vmul.f32 0.0078125, %v921_v46  ;;  %v1096_v46 = vld [vmem:[%s7318_s2 + $0x170] sm:$0xff] }
 0x47b   :  { %v947_v47 = vsub.f32 %v939_v45, %v943_v43  ;;  %v1095_v43 = vld [vmem:[%s7318_s2 + $0x168] sm:$0xff]  ;;  %v1094_v45 = vld [vmem:[%s7318_s2 + $0x160] sm:$0xff] }
 0x47c   :  { %v935_v51 = vpop.xlane.xlu0 %934  ;;  %v945_v59 = vmul.f32 %v925_v54, %v925_v54 }
 0x47d   :  { %v955_v53 = vadd.f32 0.8, %v947_v47  ;;  %v940_v49 = vmul.f32 0.0078125, %v935_v51  ;;  %v1091_v47 = vld [vmem:[%s7318_s2 + $0x148] sm:$0xff]  ;;  %v1093_v51 = vld [vmem:[%s7318_s2 + $0x158] sm:$0xff] }
 0x47f   :  { %4884 = vrsqrt.f32 %v955_v53  ;;  %v948_v57 = vsub.f32 %v940_v49, %v944_v52  ;;  %v1090_v52 = vld [vmem:[%s7318_s2 + $0x140] sm:$0xff]  ;;  %v1092_v53 = vld [vmem:[%s7318_s2 + $0x150] sm:$0xff]  ;;  %v1089_v49 = vld [vmem:[%s7318_s2 + $0x138] sm:$0xff] }
 0x480   :  { %v937_v58 = vpop.xlane.xlu0 %936 }
 0x481   :  { %v956_v55 = vadd.f32 0.8, %v948_v57  ;;  %v941_v61 = vmul.f32 0.0078125, %v937_v58  ;;  %v1086_v57 = vld [vmem:[%s7318_s2 + $0x120] sm:$0xff]  ;;  %v1088_v58 = vld [vmem:[%s7318_s2 + $0x130] sm:$0xff] }
 0x483   :  { %4886 = vrsqrt.f32 %v956_v55  ;;  %v949_v3 = vsub.f32 %v941_v61, %v945_v59  ;;  %v1083_v59 = vld [vmem:[%s7318_s2 + $0x108] sm:$0xff]  ;;  %v1085_v55 = vld [vmem:[%s7318_s2 + $0x118] sm:$0xff]  ;;  %v1082_v61 = vld [vmem:[%s7318_s2 + $0x100] sm:$0xff] }
 0x484   :  { %v4883_v4 = vpop.eup %4882 }
 0x485   :  { %v957_v63 = vadd.f32 0.8, %v949_v3  ;;  %v962_v5 = vmul.f32 %v4883_v4, %v5198_v62  ;;  %v1084_v3 = vld [vmem:[%s7318_s2 + $0x110] sm:$0xff]  ;;  %v1079_v4 = vld [vmem:[%s7318_s2 + $0xe8] sm:$0xff] }
 0x487   :  { %4888 = vrsqrt.f32 %v957_v63  ;;  %v966_v6 = vmul.f32 %v962_v5, %v922_v33  ;;  %v1106_v33 = vld [vmem:[%s7318_s2 + $0x1c0] sm:$0xff]  ;;  %v1081_v63 = vld [vmem:[%s7318_s2 + $0xf8] sm:$0xff] }
 0x488   :  { %1117 = vmatpush1.msra.mxu0 %v1106_v33  ;;  %v1065_v33 = vld [vmem:[%s7318_s2 + $0x78] sm:$0xff] }
 0x489   :  { %974 = vrot.lane.b32.xlu1 %v966_v6, %s4907_s24  ;;  %1118 = vmatprep.subr.mxu0 %v1103_v35  ;;  %v1080_v6 = vld [vmem:[%s7318_s2 + $0xf0] sm:$0xff] }
 0x48a   :  { %1119 = vmatpush1.msra.mxu0 %v1102_v37  ;;  %v1064_v35 = vld [vmem:[%s7318_s2 + $0x70] sm:$0xff]  ;;  %v1061_v37 = vld [vmem:[%s7318_s2 + $0x58] sm:$0xff] }
 0x48b   :  { %1120 = vmatprep.subr.mxu0 %v1099_v39  ;;  %v1060_v39 = vld [vmem:[%s7318_s2 + $0x50] sm:$0xff] }
 0x48c   :  { %v4885_v13 = vpop.eup %4884  ;;  %1121 = vmatpush1.msra.mxu0 %v1098_v41  ;;  %v1057_v41 = vld [vmem:[%s7318_s2 + $0x38] sm:$0xff] }
 0x48d   :  { %v963_v14 = vmul.f32 %v4885_v13, %v5205_v12  ;;  %1122 = vmatprep.subr.mxu0 %v1095_v43  ;;  %v1075_v13 = vld [vmem:[%s7318_s2 + $0xc8] sm:$0xff]  ;;  %v1054_v43 = vld [vmem:[%s7318_s2 + $0x20] sm:$0xff] }
 0x48e   :  { %1123 = vmatpush1.msra.mxu0 %v1094_v45 }
 0x48f   :  { %v967_v17 = vmul.f32 %v963_v14, %v923_v40  ;;  %v1101_v40 = vld [vmem:[%s7318_s2 + $0x198] sm:$0xff]  ;;  %1124 = vmatprep.subr.mxu0 %v1091_v47 }
 0x490   :  { %v4887_v18 = vpop.eup %4886  ;;  %1209 = vmatprep.subr.mxu1 %v1101_v40  ;;  %1125 = vmatpush1.msra.mxu0 %v1090_v52  ;;  %v1055_v40 = vld [vmem:[%s7318_s2 + $0x28] sm:$0xff]  ;;  %v1053_v47 = vld [vmem:[%s7318_s2 + $0x18] sm:$0xff]  ;;  %v4917_v52 = vmov 0.0  }
 0x491   :  { %976 = vrot.lane.b32.xlu0 %v967_v17, %s4907_s24  ;;  %v5215_v20 = vmul.f32 %v4887_v18, %v5211_v15  ;;  %1210 = vmatpush1.msra.mxu1 %v1100_v42  ;;  %v1074_v17 = vld [vmem:[%s7318_s2 + $0xc0] sm:$0xff]  ;;  %v1076_v18 = vld [vmem:[%s7318_s2 + $0xd0] sm:$0xff] }
 0x492   :  { %1178 = vmatprep.mubr.f32.mxu0 %v4917_v52  ;;  %1267 = vmatprep.mubr.f32.mxu1 %v4917_v52 }
 0x493   :  { %v968_v22 = vmul.f32 %v5215_v20, %v924_v44  ;;  %v1097_v44 = vld [vmem:[%s7318_s2 + $0x178] sm:$0xff] }
 0x494   :  { %v4889_v23 = vpop.eup %4888  ;;  %1211 = vmatprep.subr.mxu1 %v1097_v44  ;;  %v1056_v44 = vld [vmem:[%s7318_s2 + $0x30] sm:$0xff] }
 0x495   :  { %978 = vrot.lane.b32.xlu1 %v968_v22, %s4907_s24  ;;  %v5225_v25 = vmul.f32 %v4889_v23, %v5220_v21  ;;  %1212 = vmatpush1.msra.mxu1 %v1096_v46  ;;  %v1071_v22 = vld [vmem:[%s7318_s2 + $0xa8] sm:$0xff]  ;;  %v1073_v23 = vld [vmem:[%s7318_s2 + $0xb8] sm:$0xff] }
 0x496   :  { %1213 = vmatprep.subr.mxu1 %v1093_v51  ;;  %v1051_v46 = vld [vmem:[%s7318_s2 + $0x8] sm:$0xff]  ;;  %v1050_v51 = vld [vmem:[%s7318_s2] sm:$0xff] }
 0x497   :  { %v969_v26 = vmul.f32 %v5225_v25, %v925_v54  ;;  %v1087_v54 = vld [vmem:[%s7318_s2 + $0x128] sm:$0xff]  ;;  %1214 = vmatpush1.msra.mxu1 %v1092_v53 }
 0x498   :  { %1126 = vmatprep.subr.mxu0 %v1087_v54  ;;  %1215 = vmatprep.subr.mxu1 %v1089_v49 }
 0x499   :  { %980 = vrot.lane.b32.xlu1 %v969_v26, %s4907_s24  ;;  %1127 = vmatpush1.msra.mxu0 %v1086_v57  ;;  %v1070_v26 = vld [vmem:[%s7318_s2 + $0xa0] sm:$0xff] }
 0x49a   :  { %1216 = vmatpush1.msra.mxu1 %v1088_v58  ;;  %1128 = vmatprep.subr.mxu0 %v1083_v59 }
 0x49b   :  { %1217 = vmatprep.subr.mxu1 %v1085_v55  ;;  %1129 = vmatpush1.msra.mxu0 %v1082_v61 }
 0x49c   :  { %1218 = vmatpush1.msra.mxu1 %v1084_v3  ;;  %1130 = vmatprep.subr.mxu0 %v1079_v4 }
 0x49d   :  { %992 = vperm.xlu1 %4834, %v962_v5   ;;  %v1078_v5 = vld [vmem:[%s7318_s2 + $0xe0] sm:$0xff]  ;;  %1219 = vmatprep.subr.mxu1 %v1081_v63 }
 0x49e   :  { %1131 = vmatpush1.msra.mxu0 %v1078_v5  ;;  %1220 = vmatpush1.msra.mxu1 %v1080_v6 }
 0x49f   :  { %1132 = vmatprep.subr.mxu0 %v1075_v13 }
 0x4a0   :  { %1133 = vmatpush1.msra.mxu0 %v1074_v17 }
 0x4a1   :  { %997 = vperm.xlu1 %4834, %v963_v14   ;;  %v1077_v14 = vld [vmem:[%s7318_s2 + $0xd8] sm:$0xff]  ;;  %1134 = vmatprep.subr.mxu0 %v1071_v22 }
 0x4a2   :  { %1221 = vmatprep.subr.mxu1 %v1077_v14  ;;  %1135 = vmatpush1.msra.mxu0 %v1070_v26 }
 0x4a3   :  { %1222 = vmatpush1.msra.mxu1 %v1076_v18  ;;  %1136 = vmatprep.subr.mxu0 %v1067_v28 }
 0x4a4   :  { %1223 = vmatprep.subr.mxu1 %v1073_v23  ;;  %1137 = vmatpush1.msra.mxu0 %v1066_v7 }
 0x4a5   :  { %4837 = vset.pattern.permute.xlu1 %v7329_v60  ;;  %1224 = vmatpush1.msra.mxu1 %v1072_v27 }
 0x4a6   :  { %1225 = vmatprep.subr.mxu1 %v1069_v0  ;;  %1138 = vmatprep.subr.mxu0 %v1063_v32 }
 0x4a7   :  { %1226 = vmatpush1.msra.mxu1 %v1068_v9  ;;  %1139 = vmatpush1.msra.mxu0 %v1062_v34 }
 0x4a8   :  { %1227 = vmatprep.subr.mxu1 %v1065_v33  ;;  %1140 = vmatprep.subr.mxu0 %v1059_v36 }
 0x4a9   :  { %1228 = vmatpush1.msra.mxu1 %v1064_v35  ;;  %1141 = vmatpush1.msra.mxu0 %v1058_v38 }
 0x4aa   :  { %1229 = vmatprep.subr.mxu1 %v1061_v37  ;;  %1142 = vmatprep.subr.mxu0 %v1055_v40 }
 0x4ab   :  { %1230 = vmatpush1.msra.mxu1 %v1060_v39  ;;  %1143 = vmatpush1.msra.mxu0 %v1054_v43 }
 0x4ac   :  { %1231 = vmatprep.subr.mxu1 %v1057_v41  ;;  %1144 = vmatprep.subr.mxu0 %v1051_v46 }
 0x4ad   :  { %1232 = vmatpush1.msra.mxu1 %v1056_v44  ;;  %1145 = vmatpush1.msra.mxu0 %v1050_v51 }
 0x4ae   :  { %1233 = vmatprep.subr.mxu1 %v1053_v47 }
 0x4fb   :  { %v975_v42 = vpop.permute.xlu1 %974 }
 0x4fc   :  { %v986_v45 = vsub.f32 %v5198_v62, %v975_v42  ;;  %v1052_v62 = vld [vmem:[%s7318_s2 + $0x10] sm:$0xff]  ;;  %s4918_s2 = smov 30  }
 0x4fd   :  { %1234 = vmatpush1.msra.mxu1 %v1052_v62 }
 0x4fe   :  { %1016 = vperm.xlu0 %4835, %v986_v45  }
 0x502   :  { %4836 = vset.pattern.permute.xlu0 %v7326_v16 }
 0x503   :  { %1002 = vperm.xlu0 %4836, %v5215_v20   ;;  %v977_v53 = vpop.permute.xlu0 %976 }
 0x504   :  { %v987_v54 = vsub.f32 %v5205_v12, %v977_v53 }
 0x506   :  { %1021 = vperm.xlu1 %4837, %v987_v54  }
 0x507   :  { %v979_v49 = vpop.permute.xlu1 %978  ;;  %4839 = vset.pattern.permute.xlu0 %v7329_v60 }
 0x508   :  { %v988_v57 = vsub.f32 %v5211_v15, %v979_v49 }
 0x50a   :  { %1026 = vperm.xlu1 %4837, %v988_v57  }
 0x50b   :  { %v981_v58 = vpop.permute.xlu1 %980 }
 0x50c   :  { %v989_v59 = vsub.f32 %v5220_v21, %v981_v58 }
 0x50e   :  { %1031 = vperm.xlu0 %4839, %v989_v59   ;;  %4838 = vset.pattern.permute.xlu1 %v7326_v16 }
 0x50f   :  { %1007 = vperm.xlu1 %4838, %v5225_v25  }
 0x512   :  { %4840 = vset.pattern.permute.xlu0 %v7326_v16 }
 0x518   :  { %v993_v20 = vpop.permute.xlu1 %992 }
 0x519   :  { %v1010_v12 = vmul.f32 %v993_v20, %v5175_v8 }
 0x51c   :  { %v998_v4 = vpop.permute.xlu1 %997 }
 0x51d   :  { %v1011_v21 = vmul.f32 %v998_v4, %v5180_v24 }
 0x579   :  { %v1017_v55 = vpop.permute.xlu0 %1016 }
 0x57a   :  { %v1034_v61 = vadd.f32 %v1017_v55, %v1010_v12 }
 0x57c   :  { %v1042_v3 = vmul.f32 0.2, %v1034_v61  ;;  %vm1038_vm1 = vcmp.gt.f32.partialorder %v1034_v61, 0.0 }
 0x57e   :  { %v1046_v15 = vsel %vm1038_vm1, %v1034_v61, %v1042_v3  ;;  %v1003_v63 = vpop.permute.xlu0 %1002 }
 0x57f   :  { %1179 = vmatmul.mubr.f32.vlgmr.msra.gmra.mxu0 %v1046_v15  ;;  %1268 = vmatmul.mubr.f32.vlgmr.msra.gmra.mxu1 %v1046_v15  ;;  %v1012_v6 = vmul.f32 %v1003_v63, %v5182_v30 }
 0x580   :  { %1184 = vmatprep.mubr.f32.mxu0 %v4917_v52  ;;  %1273 = vmatprep.mubr.f32.mxu1 %v4917_v52 }
 0x581   :  { %v1022_v5 = vpop.permute.xlu1 %1021 }
 0x582   :  { %v1035_v25 = vadd.f32 %v1022_v5, %v1011_v21 }
 0x584   :  { %vm1039_vm2 = vcmp.gt.f32.partialorder %v1035_v25, 0.0  ;;  %v1043_v13 = vmul.f32 0.2, %v1035_v25 }
 0x585   :  { %v1027_v8 = vpop.permute.xlu1 %1026 }
 0x586   :  { %v1036_v14 = vadd.f32 %v1027_v8, %v1012_v6  ;;  %v1047_v17 = vsel %vm1039_vm2, %v1035_v25, %v1043_v13 }
 0x587   :  { %1185 = vmatmul.mubr.f32.gmra.mxu0 %v1047_v17  ;;  %1274 = vmatmul.mubr.f32.gmra.mxu1 %v1047_v17 }
 0x588   :  { %1190 = vmatprep.mubr.f32.mxu0 %v4917_v52  ;;  %1279 = vmatprep.mubr.f32.mxu1 %v4917_v52  ;;  %vm1040_vm3 = vcmp.gt.f32.partialorder %v1036_v14, 0.0  ;;  %v1044_v18 = vmul.f32 0.2, %v1036_v14 }
 0x589   :  { %v1032_v26 = vpop.permute.xlu0 %1031 }
 0x58a   :  { %v1008_v22 = vpop.permute.xlu1 %1007  ;;  %v1048_v24 = vsel %vm1040_vm3, %v1036_v14, %v1044_v18 }
 0x58b   :  { %v1013_v23 = vmul.f32 %v1008_v22, %v5188_v29  ;;  %1191 = vmatmul.mubr.f32.gmra.mxu0 %v1048_v24  ;;  %1280 = vmatmul.mubr.f32.gmra.mxu1 %v1048_v24 }
 0x58c   :  { %1196 = vmatprep.mubr.f32.mxu0 %v4917_v52  ;;  %1285 = vmatprep.mubr.f32.mxu1 %v4917_v52 }
 0x58d   :  { %v1037_v30 = vadd.f32 %v1032_v26, %v1013_v23 }
 0x58f   :  { %vm1041_vm4 = vcmp.gt.f32.partialorder %v1037_v30, 0.0  ;;  %v1045_v27 = vmul.f32 0.2, %v1037_v30 }
 0x591   :  { %v1049_v28 = vsel %vm1041_vm4, %v1037_v30, %v1045_v27 }
 0x592   :  { %1197 = vmatmul.mubr.f32.gmra.mxu0 %v1049_v28  ;;  %1286 = vmatmul.mubr.f32.gmra.mxu1 %v1049_v28 }
 0x63f   :  { %v5436_v0 = vpop.f32.mrf.mxu0  ;;  %v5444_v7 = vpop.f32.mrf.mxu1 }
 0x640   :  { %1713 = vrot.lane.b32.xlu0 %v5436_v0, %s4910_s21  ;;  %7442 = vst [vmem:[#allocation6_spill] sm:$0xff] %v5444_v7 }
 0x641   :  { %v5442_v29 = vpop.f32.mrf.mxu0  ;;  %v5456_v32 = vpop.f32.mrf.mxu1 }
 0x644   :  { %1576 = vrot.lane.b32.xlu0 %v5436_v0, %s4918_s2 }
 0x647   :  { %v5446_v9 = vpop.f32.mrf.mxu0  ;;  %v5458_v33 = vpop.f32.mrf.mxu1 }
 0x648   :  { %1729 = vrot.lane.b32.xlu0 %v5444_v7, %s4910_s21  ;;  %1715 = vrot.lane.b32.xlu1 %v5446_v9, %s4910_s21  ;;  %7443 = vst [vmem:[#allocation7_spill] sm:$0xff] %v5458_v33 }
 0x649   :  { %v5508_v34 = vpop.f32.mrf.mxu0  ;;  %v5514_v35 = vpop.f32.mrf.mxu1 }
 0x64a   :  { %7444 = vst [vmem:[#allocation8_spill] sm:$0xff] %v5514_v35 }
 0x64b   :  { %v5556_v36 = vpop.f32.mrf.mxu0  ;;  %v5562_v37 = vpop.f32.mrf.mxu1 }
 0x64c   :  { %1439 = vrot.lane.b32.xlu0 %v5436_v0, %s4919_s29  ;;  %1578 = vrot.lane.b32.xlu1 %v5446_v9, %s4918_s2  ;;  %7445 = vst [vmem:[#allocation9_spill] sm:$0xff] %v5562_v37 }
 0x64d   :  { %v5574_v39 = vpop.f32.mrf.mxu0  ;;  %v5592_v44 = vpop.f32.mrf.mxu1 }
 0x64e   :  { %7446 = vst [vmem:[#allocation10_spill] sm:$0xff] %v5592_v44 }
 0x650   :  { %1592 = vrot.lane.b32.xlu0 %v5444_v7, %s4918_s2  ;;  %1731 = vrot.lane.b32.xlu1 %v5458_v33, %s4910_s21 }
 0x652   :  { %v5578_v41 = vpop.f32.mrf.mxu0  ;;  %v5598_v47 = vpop.f32.mrf.mxu1 }
 0x653   :  { %7447 = vst [vmem:[#allocation11_spill] sm:$0xff] %v5598_v47 }
 0x654   :  { %1300 = vrot.lane.b32.xlu0 %v5436_v0, %s4920_s30  ;;  %1441 = vrot.lane.b32.xlu1 %v5446_v9, %s4919_s29  ;;  %v5712_v23 = vpop.f32.mrf.mxu0  ;;  %v5722_v27 = vpop.f32.mrf.mxu1 }
 0x655   :  { %7463 = vst [vmem:[#allocation27_spill] sm:$0xff] %v5722_v27 }
 0x658   :  { %1455 = vrot.lane.b32.xlu0 %v5444_v7, %s4919_s29  ;;  %1594 = vrot.lane.b32.xlu1 %v5458_v33, %s4918_s2 }
 0x65c   :  { %2228 = vrot.lane.b32.xlu0 %v5444_v7, %s4921_s5  ;;  %1302 = vrot.lane.b32.xlu1 %v5446_v9, %s4920_s30 }
 0x660   :  { %2212 = vrot.lane.b32.xlu0 %v5436_v0, %s4921_s5  ;;  %1457 = vrot.lane.b32.xlu1 %v5458_v33, %s4919_s29 }
 0x664   :  { %1316 = vrot.lane.b32.xlu0 %v5444_v7, %s4920_s30  ;;  %2230 = vrot.lane.b32.xlu1 %v5458_v33, %s4921_s5 }
 0x668   :  { %2091 = vrot.lane.b32.xlu0 %v5444_v7, %s4922_s15  ;;  %2214 = vrot.lane.b32.xlu1 %v5446_v9, %s4921_s5 }
 0x66c   :  { %2075 = vrot.lane.b32.xlu0 %v5436_v0, %s4922_s15  ;;  %1318 = vrot.lane.b32.xlu1 %v5458_v33, %s4920_s30 }
 0x670   :  { %1954 = vrot.lane.b32.xlu0 %v5444_v7, %s4913_s25  ;;  %2093 = vrot.lane.b32.xlu1 %v5458_v33, %s4922_s15 }
 0x674   :  { %1938 = vrot.lane.b32.xlu0 %v5436_v0, %s4913_s25  ;;  %2077 = vrot.lane.b32.xlu1 %v5446_v9, %s4922_s15 }
 0x678   :  { %1721 = vrot.lane.b32.xlu0 %v5442_v29, %s4910_s21  ;;  %1956 = vrot.lane.b32.xlu1 %v5458_v33, %s4913_s25 }
 0x67c   :  { %1737 = vrot.lane.b32.xlu0 %v5456_v32, %s4910_s21  ;;  %1940 = vrot.lane.b32.xlu1 %v5446_v9, %s4913_s25 }
 0x680   :  { %1584 = vrot.lane.b32.xlu0 %v5442_v29, %s4918_s2  ;;  %1723 = vrot.lane.b32.xlu1 %v5508_v34, %s4910_s21 }
 0x684   :  { %1600 = vrot.lane.b32.xlu0 %v5456_v32, %s4918_s2  ;;  %1739 = vrot.lane.b32.xlu1 %v5514_v35, %s4910_s21 }
 0x688   :  { %1447 = vrot.lane.b32.xlu0 %v5442_v29, %s4919_s29  ;;  %1586 = vrot.lane.b32.xlu1 %v5508_v34, %s4918_s2 }
 0x68c   :  { %1463 = vrot.lane.b32.xlu0 %v5456_v32, %s4919_s29  ;;  %1602 = vrot.lane.b32.xlu1 %v5514_v35, %s4918_s2 }
 0x690   :  { %1308 = vrot.lane.b32.xlu0 %v5442_v29, %s4920_s30  ;;  %1449 = vrot.lane.b32.xlu1 %v5508_v34, %s4919_s29 }
 0x694   :  { %1324 = vrot.lane.b32.xlu0 %v5456_v32, %s4920_s30  ;;  %1465 = vrot.lane.b32.xlu1 %v5514_v35, %s4919_s29 }
 0x698   :  { %2220 = vrot.lane.b32.xlu0 %v5442_v29, %s4921_s5  ;;  %1310 = vrot.lane.b32.xlu1 %v5508_v34, %s4920_s30 }
 0x69c   :  { %2083 = vrot.lane.b32.xlu0 %v5442_v29, %s4922_s15  ;;  %1326 = vrot.lane.b32.xlu1 %v5514_v35, %s4920_s30 }
 0x6a0   :  { %2236 = vrot.lane.b32.xlu0 %v5456_v32, %s4921_s5  ;;  %2222 = vrot.lane.b32.xlu1 %v5508_v34, %s4921_s5 }
 0x6a4   :  { %1946 = vrot.lane.b32.xlu0 %v5442_v29, %s4913_s25  ;;  %2085 = vrot.lane.b32.xlu1 %v5508_v34, %s4922_s15 }
 0x6a8   :  { %2099 = vrot.lane.b32.xlu0 %v5456_v32, %s4922_s15  ;;  %2238 = vrot.lane.b32.xlu1 %v5514_v35, %s4921_s5 }
 0x6ac   :  { %1948 = vrot.lane.b32.xlu1 %v5508_v34, %s4913_s25  ;;  %1580 = vrot.lane.b32.xlu0 %v5556_v36, %s4918_s2 }
 0x6b0   :  { %2101 = vrot.lane.b32.xlu1 %v5514_v35, %s4922_s15  ;;  %1733 = vrot.lane.b32.xlu0 %v5562_v37, %s4910_s21 }
 0x6b2   :  { %v5568_v38 = vpop.permute.xlu0 %1713 }
 0x6b4   :  { %1443 = vrot.lane.b32.xlu0 %v5556_v36, %s4919_s29  ;;  %1717 = vrot.lane.b32.xlu1 %v5556_v36, %s4910_s21 }
 0x6b6   :  { %v5576_v40 = vpop.permute.xlu0 %1576 }
 0x6b8   :  { %1596 = vrot.lane.b32.xlu0 %v5562_v37, %s4918_s2  ;;  %1719 = vrot.lane.b32.xlu1 %v5578_v41, %s4910_s21 }
 0x6ba   :  { %v5584_v42 = vpop.permute.xlu1 %1715  ;;  %v5586_v43 = vpop.permute.xlu0 %1729 }
 0x6bc   :  { %1304 = vrot.lane.b32.xlu0 %v5556_v36, %s4920_s30  ;;  %1582 = vrot.lane.b32.xlu1 %v5578_v41, %s4918_s2 }
 0x6be   :  { %v5594_v45 = vpop.permute.xlu1 %1578  ;;  %v5596_v46 = vpop.permute.xlu0 %1439 }
 0x6c0   :  { %1459 = vrot.lane.b32.xlu0 %v5562_v37, %s4919_s29  ;;  %1735 = vrot.lane.b32.xlu1 %v5598_v47, %s4910_s21 }
 0x6c2   :  { %v5604_v51 = vpop.permute.xlu1 %1731  ;;  %v5606_v62 = vpop.permute.xlu0 %1592 }
 0x6c4   :  { %2232 = vrot.lane.b32.xlu0 %v5562_v37, %s4921_s5  ;;  %1445 = vrot.lane.b32.xlu1 %v5578_v41, %s4919_s29 }
 0x6c6   :  { %v5612_v52 = vpop.permute.xlu1 %1441  ;;  %v5614_v53 = vpop.permute.xlu0 %1300 }
 0x6c7   :  { %7448 = vst [vmem:[#allocation12_spill] sm:$0xff] %v5614_v53 }
 0x6c8   :  { %2216 = vrot.lane.b32.xlu0 %v5556_v36, %s4921_s5  ;;  %1598 = vrot.lane.b32.xlu1 %v5598_v47, %s4918_s2 }
 0x6ca   :  { %v5620_v54 = vpop.permute.xlu1 %1594  ;;  %v5622_v49 = vpop.permute.xlu0 %1455 }
 0x6cc   :  { %1320 = vrot.lane.b32.xlu0 %v5562_v37, %s4920_s30  ;;  %1306 = vrot.lane.b32.xlu1 %v5578_v41, %s4920_s30 }
 0x6ce   :  { %v5628_v57 = vpop.permute.xlu1 %1302  ;;  %v5630_v58 = vpop.permute.xlu0 %2228 }
 0x6cf   :  { %7449 = vst [vmem:[#allocation13_spill] sm:$0xff] %v5628_v57  ;;  %7450 = vst [vmem:[#allocation14_spill] sm:$0xff] %v5630_v58 }
 0x6d0   :  { %2095 = vrot.lane.b32.xlu0 %v5562_v37, %s4922_s15  ;;  %1461 = vrot.lane.b32.xlu1 %v5598_v47, %s4919_s29 }
 0x6d2   :  { %v5636_v59 = vpop.permute.xlu1 %1457  ;;  %v5638_v20 = vpop.permute.xlu0 %2212 }
 0x6d3   :  { %7451 = vst [vmem:[#allocation15_spill] sm:$0xff] %v5638_v20 }
 0x6d4   :  { %2079 = vrot.lane.b32.xlu0 %v5556_v36, %s4922_s15  ;;  %2234 = vrot.lane.b32.xlu1 %v5598_v47, %s4921_s5 }
 0x6d6   :  { %v5644_v12 = vpop.permute.xlu1 %2230  ;;  %v5646_v55 = vpop.permute.xlu0 %1316 }
 0x6d7   :  { %7452 = vst [vmem:[#allocation16_spill] sm:$0xff] %v5644_v12 }
 0x6d8   :  { %1958 = vrot.lane.b32.xlu0 %v5562_v37, %s4913_s25  ;;  %2218 = vrot.lane.b32.xlu1 %v5578_v41, %s4921_s5 }
 0x6da   :  { %v5652_v61 = vpop.permute.xlu1 %2214  ;;  %v5654_v3 = vpop.permute.xlu0 %2091 }
 0x6db   :  { %7453 = vst [vmem:[#allocation17_spill] sm:$0xff] %v5652_v61  ;;  %7454 = vst [vmem:[#allocation18_spill] sm:$0xff] %v5654_v3 }
 0x6dc   :  { %1942 = vrot.lane.b32.xlu0 %v5556_v36, %s4913_s25  ;;  %1322 = vrot.lane.b32.xlu1 %v5598_v47, %s4920_s30 }
 0x6de   :  { %v5660_v4 = vpop.permute.xlu1 %1318  ;;  %v5662_v15 = vpop.permute.xlu0 %2075 }
 0x6df   :  { %7455 = vst [vmem:[#allocation19_spill] sm:$0xff] %v5660_v4  ;;  %7456 = vst [vmem:[#allocation20_spill] sm:$0xff] %v5662_v15 }
 0x6e0   :  { %2369 = vrot.lane.b32.xlu0 %v5562_v37, %s4923_s8  ;;  %2097 = vrot.lane.b32.xlu1 %v5598_v47, %s4922_s15 }
 0x6e2   :  { %v5668_v21 = vpop.permute.xlu1 %2093  ;;  %v5670_v63 = vpop.permute.xlu0 %1954 }
 0x6e3   :  { %7457 = vst [vmem:[#allocation21_spill] sm:$0xff] %v5668_v21  ;;  %7458 = vst [vmem:[#allocation22_spill] sm:$0xff] %v5670_v63 }
 0x6e4   :  { %2353 = vrot.lane.b32.xlu0 %v5556_v36, %s4923_s8  ;;  %2081 = vrot.lane.b32.xlu1 %v5578_v41, %s4922_s15 }
 0x6e6   :  { %v5676_v5 = vpop.permute.xlu1 %2077  ;;  %v5678_v25 = vpop.permute.xlu0 %1938 }
 0x6e7   :  { %7459 = vst [vmem:[#allocation23_spill] sm:$0xff] %v5676_v5  ;;  %7460 = vst [vmem:[#allocation24_spill] sm:$0xff] %v5678_v25 }
 0x6e8   :  { %1725 = vrot.lane.b32.xlu0 %v5574_v39, %s4910_s21  ;;  %1960 = vrot.lane.b32.xlu1 %v5598_v47, %s4913_s25 }
 0x6ea   :  { %v5684_v6 = vpop.permute.xlu1 %1956  ;;  %v5686_v13 = vpop.permute.xlu0 %1721 }
 0x6eb   :  { %7461 = vst [vmem:[#allocation25_spill] sm:$0xff] %v5684_v6 }
 0x6ec   :  { %1741 = vrot.lane.b32.xlu0 %v5592_v44, %s4910_s21  ;;  %1944 = vrot.lane.b32.xlu1 %v5578_v41, %s4913_s25 }
 0x6ee   :  { %v5692_v8 = vpop.permute.xlu1 %1940  ;;  %v5694_v14 = vpop.permute.xlu0 %1737 }
 0x6ef   :  { %7462 = vst [vmem:[#allocation26_spill] sm:$0xff] %v5692_v8 }
 0x6f0   :  { %1588 = vrot.lane.b32.xlu0 %v5574_v39, %s4918_s2  ;;  %2371 = vrot.lane.b32.xlu1 %v5598_v47, %s4923_s8 }
 0x6f2   :  { %v5700_v17 = vpop.permute.xlu1 %1723  ;;  %v5702_v18 = vpop.permute.xlu0 %1584 }
 0x6f4   :  { %1604 = vrot.lane.b32.xlu0 %v5592_v44, %s4918_s2  ;;  %2355 = vrot.lane.b32.xlu1 %v5578_v41, %s4923_s8 }
 0x6f6   :  { %v5708_v22 = vpop.permute.xlu1 %1739  ;;  %v5710_v24 = vpop.permute.xlu0 %1600 }
 0x6f8   :  { %1451 = vrot.lane.b32.xlu0 %v5574_v39, %s4919_s29  ;;  %1727 = vrot.lane.b32.xlu1 %v5712_v23, %s4910_s21 }
 0x6fa   :  { %v5718_v26 = vpop.permute.xlu1 %1586  ;;  %v5720_v30 = vpop.permute.xlu0 %1447 }
 0x6fc   :  { %1467 = vrot.lane.b32.xlu0 %v5592_v44, %s4919_s29  ;;  %1743 = vrot.lane.b32.xlu1 %v5722_v27, %s4910_s21 }
 0x6fe   :  { %v5728_v28 = vpop.permute.xlu1 %1602  ;;  %v5730_v16 = vpop.permute.xlu0 %1463 }
 0x700   :  { %1312 = vrot.lane.b32.xlu0 %v5574_v39, %s4920_s30  ;;  %1590 = vrot.lane.b32.xlu1 %v5712_v23, %s4918_s2 }
 0x702   :  { %v5736_v1 = vpop.permute.xlu1 %1449  ;;  %v5738_v60 = vpop.permute.xlu0 %1308 }
 0x703   :  { %7464 = vst [vmem:[#allocation28_spill] sm:$0xff] %v5738_v60 }
 0x704   :  { %1328 = vrot.lane.b32.xlu0 %v5592_v44, %s4920_s30  ;;  %1606 = vrot.lane.b32.xlu1 %v5722_v27, %s4918_s2 }
 0x706   :  { %v5744_v37 = vpop.permute.xlu1 %1465  ;;  %v5746_v47 = vpop.permute.xlu0 %1324 }
 0x707   :  { %7465 = vst [vmem:[#allocation29_spill] sm:$0xff] %v5744_v37  ;;  %7466 = vst [vmem:[#allocation30_spill] sm:$0xff] %v5746_v47 }
 0x708   :  { %1962 = vrot.lane.b32.xlu0 %v5456_v32, %s4913_s25  ;;  %1453 = vrot.lane.b32.xlu1 %v5712_v23, %s4919_s29 }
 0x70a   :  { %v5752_v8 = vpop.permute.xlu1 %1310  ;;  %v5754_v6 = vpop.permute.xlu0 %2220 }
 0x70b   :  { %7467 = vst [vmem:[#allocation31_spill] sm:$0xff] %v5752_v8  ;;  %7468 = vst [vmem:[#allocation32_spill] sm:$0xff] %v5754_v6 }
 0x70c   :  { %2224 = vrot.lane.b32.xlu0 %v5574_v39, %s4921_s5  ;;  %1469 = vrot.lane.b32.xlu1 %v5722_v27, %s4919_s29 }
 0x70e   :  { %v5760_v25 = vpop.permute.xlu1 %1326  ;;  %v5762_v63 = vpop.permute.xlu0 %2083 }
 0x70f   :  { %7469 = vst [vmem:[#allocation33_spill] sm:$0xff] %v5760_v25  ;;  %7470 = vst [vmem:[#allocation34_spill] sm:$0xff] %v5762_v63 }
 0x710   :  { %2087 = vrot.lane.b32.xlu0 %v5574_v39, %s4922_s15  ;;  %1314 = vrot.lane.b32.xlu1 %v5712_v23, %s4920_s30 }
 0x712   :  { %v5768_v5 = vpop.permute.xlu1 %2222  ;;  %v5770_v21 = vpop.permute.xlu0 %2236 }
 0x713   :  { %7471 = vst [vmem:[#allocation35_spill] sm:$0xff] %v5768_v5  ;;  %7472 = vst [vmem:[#allocation36_spill] sm:$0xff] %v5770_v21 }
 0x714   :  { %2240 = vrot.lane.b32.xlu0 %v5592_v44, %s4921_s5  ;;  %1330 = vrot.lane.b32.xlu1 %v5722_v27, %s4920_s30 }
 0x716   :  { %v5776_v15 = vpop.permute.xlu1 %2085  ;;  %v5778_v3 = vpop.permute.xlu0 %1946 }
 0x717   :  { %7473 = vst [vmem:[#allocation37_spill] sm:$0xff] %v5776_v15  ;;  %7474 = vst [vmem:[#allocation38_spill] sm:$0xff] %v5778_v3 }
 0x718   :  { %1950 = vrot.lane.b32.xlu0 %v5574_v39, %s4913_s25  ;;  %1964 = vrot.lane.b32.xlu1 %v5514_v35, %s4913_s25 }
 0x71a   :  { %v5784_v63 = vpop.permute.xlu1 %2238  ;;  %v5786_v61 = vpop.permute.xlu0 %2099 }
 0x71b   :  { %7475 = vst [vmem:[#allocation39_spill] sm:$0xff] %v5784_v63  ;;  %7476 = vst [vmem:[#allocation40_spill] sm:$0xff] %v5786_v61 }
 0x71c   :  { %2103 = vrot.lane.b32.xlu0 %v5592_v44, %s4922_s15  ;;  %2226 = vrot.lane.b32.xlu1 %v5712_v23, %s4921_s5 }
 0x71e   :  { %v5792_v21 = vpop.permute.xlu1 %1948  ;;  %v5794_v15 = vpop.permute.xlu0 %1580 }
 0x71f   :  { %7477 = vst [vmem:[#allocation41_spill] sm:$0xff] %v5792_v21 }
 0x720   :  { %1966 = vrot.lane.b32.xlu0 %v5592_v44, %s4913_s25  ;;  %2359 = vrot.lane.b32.xlu1 %v5508_v34, %s4923_s8 }
 0x722   :  { %v5800_v3 = vpop.permute.xlu1 %2101  ;;  %v5802_v63 = vpop.permute.xlu0 %1733 }
 0x723   :  { %7478 = vst [vmem:[#allocation42_spill] sm:$0xff] %v5800_v3 }
 0x724   :  { %2361 = vrot.lane.b32.xlu0 %v5574_v39, %s4923_s8  ;;  %2089 = vrot.lane.b32.xlu1 %v5712_v23, %s4922_s15 }
 0x726   :  { %v5808_v61 = vpop.permute.xlu1 %1717  ;;  %v5810_v21 = vpop.permute.xlu0 %1443 }
 0x727   :  { %7479 = vst [vmem:[#allocation43_spill] sm:$0xff] %v5810_v21 }
 0x728   :  { %2357 = vrot.lane.b32.xlu0 %v5442_v29, %s4923_s8  ;;  %2242 = vrot.lane.b32.xlu1 %v5722_v27, %s4921_s5 }
 0x72a   :  { %v5816_v20 = vpop.permute.xlu1 %1719  ;;  %v5818_v3 = vpop.permute.xlu0 %1596 }
 0x72c   :  { %2365 = vrot.lane.b32.xlu0 %v5444_v7, %s4923_s8  ;;  %1952 = vrot.lane.b32.xlu1 %v5712_v23, %s4913_s25  ;;  %v4872_v7 = vld [vmem:[%s7319_s10 + $0x4] ss:$12 sps:$4 sm:$0xff]  }
 0x72d   :  { %2984 = vmatprep.mubr.bf16.mxu0 %v4872_v7  ;;  %3070 = vmatprep.mubr.bf16.mxu1 %v4872_v7 }
 0x72e   :  { %v5824_v6 = vpop.permute.xlu1 %1582  ;;  %v5826_v58 = vpop.permute.xlu0 %1304 }
 0x72f   :  { %7480 = vst [vmem:[#allocation44_spill] sm:$0xff] %v5826_v58 }
 0x730   :  { %2349 = vrot.lane.b32.xlu0 %v5436_v0, %s4923_s8  ;;  %2105 = vrot.lane.b32.xlu1 %v5722_v27, %s4922_s15 }
 0x732   :  { %v5832_v5 = vpop.permute.xlu1 %1735  ;;  %v5834_v12 = vpop.permute.xlu0 %1459 }
 0x733   :  { %7481 = vst [vmem:[#allocation45_spill] sm:$0xff] %v5834_v12 }
 0x734   :  { %2377 = vrot.lane.b32.xlu0 %v5592_v44, %s4923_s8  ;;  %2367 = vrot.lane.b32.xlu1 %v5458_v33, %s4923_s8 }
 0x736   :  { %v5843_v4 = vpop.permute.xlu1 %1445  ;;  %v5845_v25 = vpop.permute.xlu0 %2232 }
 0x737   :  { %7482 = vst [vmem:[#allocation46_spill] sm:$0xff] %v5843_v4  ;;  %7483 = vst [vmem:[#allocation47_spill] sm:$0xff] %v5845_v25 }
 0x738   :  { %2373 = vrot.lane.b32.xlu0 %v5456_v32, %s4923_s8  ;;  %1968 = vrot.lane.b32.xlu1 %v5722_v27, %s4913_s25 }
 0x73a   :  { %v5851_v57 = vpop.permute.xlu1 %1598  ;;  %v5853_v8 = vpop.permute.xlu0 %2216 }
 0x73b   :  { %7484 = vst [vmem:[#allocation48_spill] sm:$0xff] %v5853_v8 }
 0x73c   :  { %2363 = vrot.lane.b32.xlu1 %v5712_v23, %s4923_s8 }
 0x73e   :  { %v5857_v44 = vpop.permute.xlu1 %1306  ;;  %v5859_v7 = vpop.permute.xlu0 %1320 }
 0x73f   :  { %7485 = vst [vmem:[#allocation49_spill] sm:$0xff] %v5857_v44  ;;  %7486 = vst [vmem:[#allocation50_spill] sm:$0xff] %v5859_v7  ;;  %v2562_v44 = vld [vmem:[%s7320_s11] sm:$0xff] }
 0x740   :  { %2351 = vrot.lane.b32.xlu1 %v5446_v9, %s4923_s8  ;;  %2566 = vperm.xlu0 %4840, %v2562_v44   ;;  %v5897_v44 = vld [vmem:[%s7321_s4 + $0x8] sm:$0xff] }
 0x741   :  { %v5970_v60 = vrot.slane %v5897_v44, %v5130_v50 }
 0x742   :  { %v5863_v33 = vpop.permute.xlu1 %1461  ;;  %v5865_v25 = vpop.permute.xlu0 %2095 }
 0x743   :  { %7487 = vst [vmem:[#allocation51_spill] sm:$0xff] %v5863_v33  ;;  %7488 = vst [vmem:[#allocation52_spill] sm:$0xff] %v5865_v25  ;;  %v7493_v25 = vmov 1  }
 0x744   :  { %2379 = vrot.lane.b32.xlu1 %v5722_v27, %s4923_s8  ;;  %v2563_v27 = vld [vmem:[%s7320_s11 + $0x8] sm:$0xff]  ;;  %4842 = vset.pattern.permute.xlu0 %v7493_v25  ;;  %7514 = vst [vmem:[#allocation76_spill] sm:$0xff] %v5970_v60 }
 0x746   :  { %v5869_v58 = vpop.permute.xlu1 %2234  ;;  %v5871_v8 = vpop.permute.xlu0 %2079 }
 0x747   :  { %7489 = vst [vmem:[#allocation53_spill] sm:$0xff] %v5869_v58  ;;  %7490 = vst [vmem:[#allocation54_spill] sm:$0xff] %v5871_v8 }
 0x748   :  { %2375 = vrot.lane.b32.xlu1 %v5514_v35, %s4923_s8  ;;  %v1292_v35 = vld [vmem:[%s7321_s4] sm:$0xff] }
 0x749   :  { %v5990_v21 = vrot.slane %v1292_v35, %v5130_v50 }
 0x74a   :  { %v5878_v7 = vpop.permute.xlu1 %2218  ;;  %v5880_v47 = vpop.permute.xlu0 %1958 }
 0x74b   :  { %7491 = vst [vmem:[#allocation55_spill] sm:$0xff] %v5878_v7  ;;  %7492 = vst [vmem:[#allocation56_spill] sm:$0xff] %v5880_v47  ;;  %v5916_v47 = vrot.slane %v1292_v35, %v5087_v31 }
 0x74c   :  { %2571 = vperm.xlu1 %4838, %v2563_v27   ;;  %v5905_v27 = vld [vmem:[%s7321_s4 + $0x18] sm:$0xff] }
 0x74d   :  { %7498 = vst [vmem:[#allocation61_spill] sm:$0xff] %v5905_v27  ;;  %7502 = vst [vmem:[#allocation65_spill] sm:$0xff] %v5916_v47  ;;  %v5936_v4 = vrot.slane %v5905_v27, %v5087_v31 }
 0x74e   :  { %v5886_v8 = vpop.permute.xlu1 %1322  ;;  %v5888_v58 = vpop.permute.xlu0 %1942 }
 0x74f   :  { %7494 = vst [vmem:[#allocation57_spill] sm:$0xff] %v5886_v8  ;;  %7495 = vst [vmem:[#allocation58_spill] sm:$0xff] %v5888_v58  ;;  %v5924_v8 = vld [vmem:[%s7321_s4 + $0x10] sm:$0xff] }
 0x750   :  { %7504 = vst [vmem:[#allocation66_spill] sm:$0xff] %v5924_v8  ;;  %7507 = vst [vmem:[#allocation69_spill] sm:$0xff] %v5936_v4 }
 0x752   :  { %v5890_v12 = vpop.permute.xlu1 %2097  ;;  %v5892_v33 = vpop.permute.xlu0 %2369 }
 0x753   :  { %7496 = vst [vmem:[#allocation59_spill] sm:$0xff] %v5890_v12  ;;  %7497 = vst [vmem:[#allocation60_spill] sm:$0xff] %v5892_v33  ;;  %v5913_v33 = vrot.slane %v5897_v44, %v5087_v31  ;;  %v7503_v12 = vlaneseq }
 0x755   :  { %7501 = vst [vmem:[#allocation64_spill] sm:$0xff] %v5913_v33  ;;  %v5919_v7 = vand.u32 127, %v7503_v12  ;;  %v5944_v53 = vmul.f32 %v5913_v33, %v5442_v29  ;;  %v5982_v29 = vmul.f32 %v5916_v47, %v5578_v41 }
 0x756   :  { %v5907_v25 = vpop.permute.xlu1 %2081  ;;  %v5909_v58 = vpop.permute.xlu0 %2353 }
 0x757   :  { %7499 = vst [vmem:[#allocation62_spill] sm:$0xff] %v5907_v25  ;;  %7500 = vst [vmem:[#allocation63_spill] sm:$0xff] %v5909_v58  ;;  %v5928_v25 = vmul.f32 %v5913_v33, %v5508_v34  ;;  %v5932_v58 = vmul.f32 %v5916_v47, %v5446_v9  ;;  %v5948_v34 = vmul.f32 %v5916_v47, %v5436_v0  ;;  %vm1608_vm5 = vcmp.lt.s32.totalorder %v5919_v7, 30 }
 0x758   :  { %7509 = vst [vmem:[#allocation71_spill] sm:$0xff] %v5944_v53  ;;  %vm1745_vm6 = vcmp.lt.s32.totalorder %v5919_v7, 2  ;;  %v5954_v9 = vrot.slane %v5924_v8, %v5087_v31  ;;  %v5966_v0 = vmul.f32 %v5936_v4, %v5456_v32  ;;  %v5974_v31 = vmul.f32 %v5913_v33, %v5574_v39  ;;  %7517 = vst [vmem:[#allocation79_spill] sm:$0xff] %v5982_v29 }
 0x759   :  { %7505 = vst [vmem:[#allocation67_spill] sm:$0xff] %v5928_v25  ;;  %7506 = vst [vmem:[#allocation68_spill] sm:$0xff] %v5932_v58  ;;  %vm1471_vm7 = vcmp.lt.s32.totalorder %v5919_v7, 32  ;;  %v5987_v32 = vrot.slane %v5924_v8, %v5130_v50  ;;  %v5994_v39 = vrot.slane %v5905_v27, %v5130_v50  ;;  %v6017_v50 = vrot.slane %v5897_v44, %v5150_v19 }
 0x75a   :  { %v5938_v37 = vpop.permute.xlu1 %1960  ;;  %v5940_v12 = vpop.permute.xlu0 %1725  ;;  %7510 = vst [vmem:[#allocation72_spill] sm:$0xff] %v5948_v34  ;;  %7511 = vst [vmem:[#allocation73_spill] sm:$0xff] %v5954_v9  ;;  %v6013_v9 = vrot.slane %v5905_v27, %v5140_v2  ;;  %v6021_v34 = vrot.slane %v5924_v8, %v5150_v19  ;;  %v6024_v58 = vrot.slane %v1292_v35, %v5150_v19  ;;  %vm1334_vm8 = vcmp.lt.s32.totalorder %v5919_v7, 34 }
 0x75b   :  { %7508 = vst [vmem:[#allocation70_spill] sm:$0xff] %v5938_v37  ;;  %v5958_v37 = vmul.f32 %v5916_v47, %v5556_v36  ;;  %7513 = vst [vmem:[#allocation75_spill] sm:$0xff] %v5966_v0  ;;  %v5978_v36 = vmul.f32 %v5913_v33, %v5712_v23  ;;  %v5998_v23 = vrot.slane %v5897_v44, %v5140_v2  ;;  %vm2244_vm9 = vcmp.lt.s32.totalorder %v5919_v7, 96 }
 0x75c   :  { %7515 = vst [vmem:[#allocation77_spill] sm:$0xff] %v5974_v31  ;;  %v6006_v47 = vrot.slane %v5924_v8, %v5140_v2  ;;  %v6009_v0 = vrot.slane %v1292_v35, %v5140_v2  ;;  %7521 = vst [vmem:[#allocation83_spill] sm:$0xff] %v6013_v9  ;;  %v6028_v53 = vrot.slane %v5905_v27, %v5150_v19  ;;  %vm1970_vm10 = vcmp.lt.s32.totalorder %v5919_v7, 126 }
 0x75d   :  { %7512 = vst [vmem:[#allocation74_spill] sm:$0xff] %v5958_v37  ;;  %7516 = vst [vmem:[#allocation78_spill] sm:$0xff] %v5978_v36  ;;  %v6032_v25 = vrot.slane %v5897_v44, %v5155_v10  ;;  %v6036_v2 = vrot.slane %v5924_v8, %v5155_v10  ;;  %v6039_v4 = vrot.slane %v1292_v35, %v5155_v10  ;;  %vm2107_vm11 = vcmp.lt.s32.totalorder %v5919_v7, 98 }
 0x75e   :  { %v6000_v33 = vpop.permute.xlu1 %1944  ;;  %v6002_v41 = vpop.permute.xlu0 %1741  ;;  %7519 = vst [vmem:[#allocation81_spill] sm:$0xff] %v6006_v47  ;;  %7520 = vst [vmem:[#allocation82_spill] sm:$0xff] %v6009_v0  ;;  %v6043_v36 = vrot.slane %v5905_v27, %v5155_v10  ;;  %v6046_v31 = vrot.slane %v1292_v35, %v5125_v48  ;;  %v6050_v19 = vrot.slane %v5897_v44, %v5125_v48  ;;  %vm2381_vm12 = vcmp.lt.s32.totalorder %v5919_v7, 94 }
 0x75f   :  { %7518 = vst [vmem:[#allocation80_spill] sm:$0xff] %v6000_v33  ;;  %7522 = vst [vmem:[#allocation84_spill] sm:$0xff] %v6017_v50  ;;  %v6053_v29 = vrot.slane %v1292_v35, %v5135_v56  ;;  %v6057_v37 = vrot.slane %v5897_v44, %v5135_v56  ;;  %v6061_v33 = vrot.slane %v5924_v8, %v5125_v48 }
 0x760   :  { %7523 = vst [vmem:[#allocation85_spill] sm:$0xff] %v6021_v34  ;;  %7524 = vst [vmem:[#allocation86_spill] sm:$0xff] %v6024_v58  ;;  %v1759_v8 = vsel %vm1745_vm6, %v5708_v22, %v5584_v42 }
 0x761   :  { %7525 = vst [vmem:[#allocation87_spill] sm:$0xff] %v6028_v53  ;;  %7526 = vst [vmem:[#allocation88_spill] sm:$0xff] %v6032_v25 }
 0x762   :  { %7527 = vst [vmem:[#allocation89_spill] sm:$0xff] %v6036_v2  ;;  %7528 = vst [vmem:[#allocation90_spill] sm:$0xff] %v6039_v4  ;;  %v6063_v10 = vpop.permute.xlu1 %2371  ;;  %v6065_v4 = vpop.permute.xlu0 %1588 }
 0x763   :  { %7529 = vst [vmem:[#allocation91_spill] sm:$0xff] %v6043_v36  ;;  %7530 = vst [vmem:[#allocation92_spill] sm:$0xff] %v6046_v31  ;;  %v1754_v31 = vsel %vm1745_vm6, %v5568_v38, %v5686_v13 }
 0x764   :  { %7531 = vst [vmem:[#allocation93_spill] sm:$0xff] %v6050_v19  ;;  %7532 = vst [vmem:[#allocation94_spill] sm:$0xff] %v6053_v29  ;;  %v1751_v29 = vsel %vm1745_vm6, %v5700_v17, %v5604_v51  ;;  %v1747_v19 = vsel %vm1745_vm6, %v5604_v51, %v5708_v22  ;;  %v1617_v51 = vsel %vm1608_vm5, %v5576_v40, %v5702_v18 }
 0x765   :  { %7533 = vst [vmem:[#allocation95_spill] sm:$0xff] %v6057_v37  ;;  %7534 = vst [vmem:[#allocation96_spill] sm:$0xff] %v6061_v33  ;;  %v1755_v37 = vsel %vm1745_vm6, %v5584_v42, %v5700_v17  ;;  %v1750_v33 = vsel %vm1745_vm6, %v5686_v13, %v5586_v43  ;;  %v6096_v17 = vrot.slane %v1292_v35, %v5145_v11 }
 0x766   :  { %7535 = vst [vmem:[#allocation97_spill] sm:$0xff] %v6063_v10  ;;  %v6081_v10 = vrot.slane %v5905_v27, %v5125_v48  ;;  %v1746_v48 = vsel %vm1745_vm6, %v5586_v43, %v5694_v14  ;;  %v1758_v13 = vsel %vm1745_vm6, %v5694_v14, %v5568_v38  ;;  %v6112_v42 = vrot.slane %v5897_v44, %v5145_v11  ;;  %v6127_v14 = vpop.permute.xlu0 %1604 }
 0x767   :  { %7537 = vst [vmem:[#allocation99_spill] sm:$0xff] %v6096_v17  ;;  %v6115_v35 = vmul.f32 %v5970_v60, %v1754_v31  ;;  %v6118_v22 = vmul.f32 %v5970_v60, %v1755_v37  ;;  %v6121_v43 = vmul.f32 %v5987_v32, %v1751_v29  ;;  %v1613_v38 = vsel %vm1608_vm5, %v5702_v18, %v5606_v62  ;;  %v6142_v29 = vpop.permute.xlu1 %2355 }
 0x768   :  { %7536 = vst [vmem:[#allocation98_spill] sm:$0xff] %v6081_v10  ;;  %7538 = vst [vmem:[#allocation100_spill] sm:$0xff] %v6112_v42  ;;  %v6130_v17 = vmul.f32 %v5987_v32, %v1750_v33  ;;  %v6133_v44 = vmul.f32 %v5990_v21, %v1759_v8  ;;  %v6136_v31 = vmul.f32 %v5994_v39, %v1747_v19 }
 0x769   :  { %v1621_v37 = vsel %vm1608_vm5, %v5710_v24, %v5576_v40  ;;  %7539 = vst [vmem:[#allocation101_spill] sm:$0xff] %v6142_v29  ;;  %v6145_v18 = vmul.f32 %v5990_v21, %v1758_v13  ;;  %v6148_v11 = vmul.f32 %v5994_v39, %v1746_v48  ;;  %v6151_v33 = vmul.f32 %v5998_v23, %v1617_v51 }
 0x76a   :  { %v1609_v8 = vsel %vm1608_vm5, %v5606_v62, %v5710_v24  ;;  %v6158_v19 = vmul.f32 %v6006_v47, %v1613_v38  ;;  %v1614_v40 = vsel %vm1608_vm5, %v5718_v26, %v5620_v54  ;;  %v1618_v48 = vsel %vm1608_vm5, %v5594_v45, %v5718_v26  ;;  %v6181_v38 = vpop.permute.xlu0 %1451 }
 0x76b   :  { %v1480_v13 = vsel %vm1471_vm7, %v5596_v46, %v5720_v30  ;;  %v6175_v24 = vmul.f32 %v6009_v0, %v1621_v37  ;;  %v1756_v51 = vsel %vm1745_vm6, %v5808_v61, %v5940_v12  ;;  %v4664_v26 = vpack.c.bf16 %v6118_v22, %v6115_v35  ;;  %v1728_v62 = vpop.permute.xlu1 %1727 }
 0x76c   :  { %v6188_v42 = vmul.f32 %v6013_v9, %v1609_v8  ;;  %v1476_v37 = vsel %vm1471_vm7, %v5720_v30, %v5622_v49  ;;  %v4666_v10 = vpack.c.bf16 %v6136_v31, %v6148_v11  ;;  %v6197_v27 = vmul.f32 %v5998_v23, %v1618_v48 }
 0x76d   :  { %v6200_v35 = vmul.f32 %v6006_v47, %v1614_v40  ;;  %v6203_v22 = vmul.f32 %v6017_v50, %v1480_v13  ;;  %v1757_v8 = vsel %vm1745_vm6, %v5816_v20, %v1728_v62  ;;  %v1622_v30 = vsel %vm1608_vm5, %v5728_v28, %v5594_v45 }
 0x76e   :  { %v1787_v11 = vmul.f32 %v5970_v60, %v1756_v51  ;;  %v1753_v31 = vsel %vm1745_vm6, %v1728_v62, %v5832_v5  ;;  %v1791_v40 = vmul.f32 %v5970_v60, %v1757_v8  ;;  %v6218_v48 = vmul.f32 %v6021_v34, %v1476_v37  ;;  %v6232_v51 = vpop.permute.xlu0 %1467 }
 0x76f   :  { %v1610_v13 = vsel %vm1608_vm5, %v5620_v54, %v5728_v28  ;;  %v1748_v45 = vsel %vm1745_vm6, %v5802_v63, %v6002_v41  ;;  %v1760_v62 = vsel %vm1745_vm6, %v6002_v41, %v5808_v61  ;;  %v1472_v37 = vsel %vm1471_vm7, %v5622_v49, %v5730_v16  ;;  %v1744_v8 = vpop.permute.xlu1 %1743 }
 0x770   :  { %v1484_v54 = vsel %vm1471_vm7, %v5730_v16, %v5596_v46  ;;  %v1752_v28 = vsel %vm1745_vm6, %v5940_v12, %v5802_v63  ;;  %v4668_v29 = vpack.c.bf16 %v1791_v40, %v1787_v11  ;;  %v6247_v61 = vmul.f32 %v6009_v0, %v1622_v30 }
 0x771   :  { %v1792_v41 = vmul.f32 %v5987_v32, %v1753_v31  ;;  %v1749_v49 = vsel %vm1745_vm6, %v5832_v5, %v1744_v8  ;;  %v1761_v16 = vsel %vm1745_vm6, %v1744_v8, %v5816_v20  ;;  %v1786_v46 = vmul.f32 %v5990_v21, %v1760_v62 }
 0x772   :  { %v1789_v60 = vmul.f32 %v5994_v39, %v1748_v45  ;;  %v1790_v63 = vmul.f32 %v5990_v21, %v1761_v16  ;;  %v1793_v12 = vmul.f32 %v5994_v39, %v1749_v49  ;;  %2952 = vmatprep.subr.bf16.mxu0 %v4668_v29  ;;  %v4657_v30 = vpack.c.bf16 %v6200_v35, %v6158_v19  ;;  %v6270_v31 = vpop.permute.xlu0 %1312 }
 0x773   :  { %v6263_v11 = vmul.f32 %v6013_v9, %v1610_v13  ;;  %v1788_v5 = vmul.f32 %v5987_v32, %v1752_v28  ;;  %v1619_v20 = vsel %vm1608_vm5, %v5794_v15, %v6065_v4  ;;  %v6273_v40 = vmul.f32 %v6024_v58, %v1484_v54  ;;  %v1591_v29 = vpop.permute.xlu1 %1590 }
 0x774   :  { %v4667_v45 = vpack.c.bf16 %v1790_v63, %v1786_v46  ;;  %v4670_v62 = vpack.c.bf16 %v1793_v12, %v1789_v60  ;;  %v4656_v8 = vpack.c.bf16 %v6197_v27, %v6151_v33  ;;  %v4655_v13 = vpack.c.bf16 %v6247_v61, %v6175_v24 }
 0x775   :  { %v6280_v28 = vmul.f32 %v6028_v53, %v1472_v37  ;;  %v4669_v49 = vpack.c.bf16 %v1792_v41, %v1788_v5  ;;  %v1620_v16 = vsel %vm1608_vm5, %v5824_v6, %v1591_v29  ;;  %v1650_v54 = vmul.f32 %v5998_v23, %v1619_v20 }
 0x776   :  { %v1616_v60 = vsel %vm1608_vm5, %v1591_v29, %v5851_v57  ;;  %v1654_v27 = vmul.f32 %v5998_v23, %v1620_v16  ;;  %2953 = vmatpush1.bf16.msra.mxu0 %v4667_v45  ;;  %3038 = vmatprep.subr.bf16.mxu1 %v4670_v62  ;;  %v1611_v33 = vsel %vm1608_vm5, %v5818_v3, %v6127_v14  ;;  %v6299_v41 = vpop.permute.xlu0 %1328 }
 0x777   :  { %v1623_v37 = vsel %vm1608_vm5, %v6127_v14, %v5794_v15  ;;  %2954 = vmatprep.subr.bf16.mxu0 %v4664_v26  ;;  %3039 = vmatpush1.bf16.msra.mxu1 %v4669_v49  ;;  %v4658_v46 = vpack.c.bf16 %v6263_v11, %v6188_v42  ;;  %v1477_v63 = vsel %vm1471_vm7, %v5736_v1, %v5636_v59  ;;  %v1607_v14 = vpop.permute.xlu1 %1606  ;;  %v7540_v42 = vld [vmem:[#allocation28_spill] sm:$0xff]  ;;  %v7542_v49 = vld [vmem:[#allocation43_spill] sm:$0xff] }
 0x778   :  { %v1481_v12 = vsel %vm1471_vm7, %v5612_v52, %v5736_v1  ;;  %v1615_v15 = vsel %vm1608_vm5, %v6065_v4, %v5818_v3  ;;  %3040 = vmatprep.subr.bf16.mxu1 %v4666_v10  ;;  %v4660_v26 = vpack.c.bf16 %v1654_v27, %v1650_v54  ;;  %v6319_v11 = vsel %vm1334_vm8, %v7540_v42, %v5646_v55 }
 0x779   :  { %v1655_v5 = vmul.f32 %v6006_v47, %v1616_v60  ;;  %v1612_v1 = vsel %vm1608_vm5, %v5851_v57, %v1607_v14  ;;  %v1624_v20 = vsel %vm1608_vm5, %v1607_v14, %v5824_v6  ;;  %v1649_v3 = vmul.f32 %v6009_v0, %v1623_v37 }
 0x77a   :  { %v1652_v4 = vmul.f32 %v6013_v9, %v1611_v33  ;;  %v1653_v10 = vmul.f32 %v6009_v0, %v1624_v20  ;;  %v1656_v45 = vmul.f32 %v6013_v9, %v1612_v1  ;;  %v7541_v29 = vpack.c.bf16 %v6133_v44, %v6145_v18  ;;  %v6346_v54 = vpop.permute.xlu0 %1962  ;;  %v7544_v18 = vld [vmem:[#allocation12_spill] sm:$0xff]  ;;  %v7594_v0 = vld [vmem:[#allocation25_spill] sm:$0xff] }
 0x77b   :  { %v6336_v62 = vmul.f32 %v6021_v34, %v1477_v63  ;;  %v1651_v57 = vmul.f32 %v6006_v47, %v1615_v15  ;;  %v1482_v6 = vsel %vm1471_vm7, %v7542_v49, %v6181_v38  ;;  %v7543_v16 = vpack.c.bf16 %v6121_v43, %v6130_v17  ;;  %v1454_v33 = vpop.permute.xlu1 %1453  ;;  %v7545_v63 = vld [vmem:[#allocation29_spill] sm:$0xff]  ;;  %v7593_v9 = vld [vmem:[#allocation40_spill] sm:$0xff] }
 0x77c   :  { %2955 = vmatpush1.bf16.msra.mxu0 %v7541_v29  ;;  %v1509_v44 = vmul.f32 %v6017_v50, %v1481_v12  ;;  %v6353_v60 = vsel %vm1334_vm8, %v7544_v18, %v7540_v42  ;;  %v4659_v27 = vpack.c.bf16 %v1653_v10, %v1649_v3  ;;  %v4662_v37 = vpack.c.bf16 %v1656_v45, %v1652_v4  ;;  %v7546_v12 = vld [vmem:[#allocation46_spill] sm:$0xff]  ;;  %v7547_v42 = vld [vmem:[#allocation51_spill] sm:$0xff]  ;;  %v7601_v47 = vld [vmem:[#allocation80_spill] sm:$0xff] }
 0x77d   :  { %2956 = vmatprep.subr.bf16.mxu0 %v4660_v26  ;;  %3041 = vmatpush1.bf16.msra.mxu1 %v7543_v16  ;;  %v1473_v15 = vsel %vm1471_vm7, %v5636_v59, %v7545_v63  ;;  %v1485_v17 = vsel %vm1471_vm7, %v7545_v63, %v5612_v52  ;;  %v4661_v43 = vpack.c.bf16 %v1655_v5, %v1651_v57  ;;  %v7548_v52 = vld [vmem:[#allocation45_spill] sm:$0xff] }
 0x77e   :  { %v1483_v14 = vsel %vm1471_vm7, %v7546_v12, %v1454_v33  ;;  %v1513_v26 = vmul.f32 %v6017_v50, %v1482_v6  ;;  %v1479_v1 = vsel %vm1471_vm7, %v1454_v33, %v7547_v42  ;;  %3042 = vmatprep.subr.bf16.mxu1 %v4662_v37  ;;  %v4649_v59 = vpack.c.bf16 %v6336_v62, %v6218_v48  ;;  %v6381_v4 = vpop.permute.xlu0 %2224  ;;  %v7549_v37 = vld [vmem:[#allocation30_spill] sm:$0xff]  ;;  %v7560_v62 = vld [vmem:[#allocation16_spill] sm:$0xff] }
 0x77f   :  { %v1517_v20 = vmul.f32 %v6017_v50, %v1483_v14  ;;  %v1474_v5 = vsel %vm1471_vm7, %v7548_v52, %v6232_v51  ;;  %v1486_v3 = vsel %vm1471_vm7, %v6232_v51, %v7542_v49  ;;  %v1508_v10 = vmul.f32 %v6024_v58, %v1485_v17  ;;  %v1470_v57 = vpop.permute.xlu1 %1469  ;;  %v7552_v14 = vld [vmem:[#allocation13_spill] sm:$0xff] }
 0x780   :  { %2957 = vmatpush1.bf16.msra.mxu0 %v4659_v27  ;;  %v1511_v45 = vmul.f32 %v6028_v53, %v1473_v15  ;;  %v1478_v29 = vsel %vm1471_vm7, %v6181_v38, %v7548_v52  ;;  %v1518_v16 = vmul.f32 %v6021_v34, %v1479_v1  ;;  %v1475_v51 = vsel %vm1471_vm7, %v7547_v42, %v1470_v57  ;;  %v7553_v42 = vld [vmem:[#allocation33_spill] sm:$0xff]  ;;  %v7554_v1 = vld [vmem:[#allocation19_spill] sm:$0xff] }
 0x781   :  { %2958 = vmatprep.subr.bf16.mxu0 %v4656_v8  ;;  %3043 = vmatpush1.bf16.msra.mxu1 %v4661_v43  ;;  %v4652_v6 = vpack.c.bf16 %v1517_v20, %v1513_v26  ;;  %v1487_v8 = vsel %vm1471_vm7, %v1470_v57, %v7546_v12  ;;  %v4648_v49 = vpack.c.bf16 %v1509_v44, %v6203_v22  ;;  %v7550_v22 = vld [vmem:[#allocation44_spill] sm:$0xff]  ;;  %v7551_v12 = vld [vmem:[#allocation31_spill] sm:$0xff]  ;;  %v7556_v52 = vld [vmem:[#allocation57_spill] sm:$0xff] }
 0x782   :  { %3044 = vmatprep.subr.bf16.mxu1 %v4658_v46  ;;  %v1512_v27 = vmul.f32 %v6024_v58, %v1486_v3  ;;  %v1515_v33 = vmul.f32 %v6028_v53, %v1474_v5  ;;  %v1516_v38 = vmul.f32 %v6024_v58, %v1487_v8  ;;  %v1519_v46 = vmul.f32 %v6028_v53, %v1475_v51  ;;  %v6416_v17 = vpop.permute.xlu0 %2087 }
 0x783   :  { %v1335_v63 = vsel %vm1334_vm8, %v5646_v55, %v7549_v37  ;;  %v1514_v15 = vmul.f32 %v6021_v34, %v1478_v29  ;;  %v1345_v44 = vsel %vm1334_vm8, %v7550_v22, %v6270_v31  ;;  %v4647_v24 = vpack.c.bf16 %v1508_v10, %v6273_v40  ;;  %v7557_v10 = vld [vmem:[#allocation50_spill] sm:$0xff] }
 0x784   :  { %2959 = vmatpush1.bf16.msra.mxu0 %v4655_v13  ;;  %v4651_v61 = vpack.c.bf16 %v1516_v38, %v1512_v27  ;;  %v1315_v13 = vpop.permute.xlu1 %1314  ;;  %v4654_v43 = vpack.c.bf16 %v1519_v46, %v1515_v33  ;;  %v4650_v55 = vpack.c.bf16 %v1511_v45, %v6280_v28  ;;  %v1344_v26 = vsel %vm1334_vm8, %v7552_v14, %v7551_v12  ;;  %v7558_v46 = vld [vmem:[#allocation90_spill] sm:$0xff] }
 0x785   :  { %2960 = vmatprep.subr.bf16.mxu0 %v4652_v6  ;;  %3045 = vmatpush1.bf16.msra.mxu1 %v4657_v30  ;;  %v1336_v19 = vsel %vm1334_vm8, %v7554_v1, %v7553_v42  ;;  %v4653_v35 = vpack.c.bf16 %v1518_v16, %v1514_v15  ;;  %v7555_v30 = vld [vmem:[#allocation49_spill] sm:$0xff]  ;;  %v1376_v20 = vmul.f32 %v6032_v25, %v1345_v44 }
 0x786   :  { %v1346_v40 = vsel %vm1334_vm8, %v7555_v30, %v1315_v13  ;;  %v1342_v28 = vsel %vm1334_vm8, %v1315_v13, %v7556_v52  ;;  %3046 = vmatprep.subr.bf16.mxu1 %v4654_v43  ;;  %v1340_v3 = vsel %vm1334_vm8, %v7551_v12, %v7554_v1  ;;  %v1337_v45 = vsel %vm1334_vm8, %v7557_v10, %v6299_v41  ;;  %v6448_v57 = vpop.permute.xlu0 %2240 }
 0x787   :  { %v1380_v5 = vmul.f32 %v6032_v25, %v1346_v40  ;;  %v1349_v29 = vsel %vm1334_vm8, %v6299_v41, %v7550_v22  ;;  %v1372_v6 = vmul.f32 %v6032_v25, %v1344_v26  ;;  %v1348_v16 = vsel %vm1334_vm8, %v7553_v42, %v7552_v14  ;;  %v7562_v40 = vld [vmem:[#allocation47_spill] sm:$0xff] }
 0x788   :  { %2961 = vmatpush1.bf16.msra.mxu0 %v4651_v61  ;;  %v1341_v51 = vsel %vm1334_vm8, %v6270_v31, %v7557_v10  ;;  %v1331_v8 = vpop.permute.xlu1 %1330  ;;  %v1374_v41 = vmul.f32 %v6043_v36, %v1336_v19  ;;  %v1375_v15 = vmul.f32 %v7558_v46, %v1349_v29  ;;  %v1378_v22 = vmul.f32 %v6043_v36, %v1337_v45  ;;  %v7565_v10 = vld [vmem:[#allocation32_spill] sm:$0xff] }
 0x789   :  { %2962 = vmatprep.subr.bf16.mxu0 %v4648_v49  ;;  %3047 = vmatpush1.bf16.msra.mxu1 %v4653_v35  ;;  %v4644_v27 = vpack.c.bf16 %v1380_v5, %v1376_v20  ;;  %v1381_v49 = vmul.f32 %v6036_v2, %v1342_v28  ;;  %v1338_v33 = vsel %vm1334_vm8, %v7556_v52, %v1331_v8  ;;  %v7563_v52 = vld [vmem:[#allocation48_spill] sm:$0xff] }
 0x78a   :  { %3048 = vmatprep.subr.bf16.mxu1 %v4650_v55  ;;  %v1350_v38 = vsel %vm1334_vm8, %v1331_v8, %v7555_v30  ;;  %v1382_v44 = vmul.f32 %v6043_v36, %v1338_v33  ;;  %v1368_v61 = vmul.f32 %v6032_v25, %v6353_v60  ;;  %v1347_v13 = vsel %vm1334_vm8, %v7549_v37, %v7544_v18  ;;  %v6482_v55 = vpop.permute.xlu0 %1950  ;;  %v7559_v18 = vld [vmem:[#allocation66_spill] sm:$0xff]  ;;  %v7589_v25 = vld [vmem:[#allocation100_spill] sm:$0xff] }
 0x78b   :  { %v1379_v31 = vmul.f32 %v7558_v46, %v1350_v38  ;;  %v1377_v43 = vmul.f32 %v6036_v2, %v1341_v51  ;;  %v1371_v12 = vmul.f32 %v7558_v46, %v1348_v16  ;;  %v1373_v42 = vmul.f32 %v6036_v2, %v1340_v3  ;;  %v7564_v3 = vld [vmem:[#allocation14_spill] sm:$0xff]  ;;  %v7567_v16 = vld [vmem:[#allocation17_spill] sm:$0xff]  ;;  %v7570_v38 = vld [vmem:[#allocation55_spill] sm:$0xff] }
 0x78c   :  { %2963 = vmatpush1.bf16.msra.mxu0 %v4647_v24  ;;  %v1370_v24 = vmul.f32 %v6043_v36, %v1335_v63  ;;  %v6486_v60 = vpop.permute.xlu1 %1964  ;;  %v4646_v26 = vpack.c.bf16 %v1382_v44, %v1378_v22  ;;  %v6491_v37 = vrot.slane %v7559_v18, %v5135_v56  ;;  %v4640_v19 = vpack.c.bf16 %v1372_v6, %v1368_v61  ;;  %v7571_v22 = vld [vmem:[#allocation92_spill] sm:$0xff] }
 0x78d   :  { %2964 = vmatprep.subr.bf16.mxu0 %v4644_v27  ;;  %3049 = vmatpush1.bf16.msra.mxu1 %v4649_v59  ;;  %v4643_v14 = vpack.c.bf16 %v1379_v31, %v1375_v15  ;;  %v4645_v1 = vpack.c.bf16 %v1381_v49, %v1377_v43  ;;  %v1367_v48 = vmul.f32 %v7558_v46, %v1347_v13  ;;  %v7561_v59 = vld [vmem:[#allocation35_spill] sm:$0xff]  ;;  %v7568_v27 = vld [vmem:[#allocation93_spill] sm:$0xff]  ;;  %v7586_v46 = vld [vmem:[#allocation96_spill] sm:$0xff] }
 0x78e   :  { %v2250_v63 = vsel %vm2244_vm9, %v7561_v59, %v7560_v62  ;;  %3050 = vmatprep.subr.bf16.mxu1 %v4646_v26  ;;  %v4642_v35 = vpack.c.bf16 %v1374_v41, %v1370_v24  ;;  %v1369_v30 = vmul.f32 %v6036_v2, %v6319_v11  ;;  %v2251_v20 = vsel %vm2244_vm9, %v6381_v4, %v7562_v40  ;;  %v6510_v5 = vpop.permute.xlu0 %2103  ;;  %v7566_v11 = vld [vmem:[#allocation15_spill] sm:$0xff]  ;;  %v7569_v49 = vld [vmem:[#allocation53_spill] sm:$0xff]  ;;  %v7572_v24 = vld [vmem:[#allocation18_spill] sm:$0xff] }
 0x78f   :  { %v2255_v28 = vsel %vm2244_vm9, %v7563_v52, %v6381_v4  ;;  %v2249_v45 = vsel %vm2244_vm9, %v7565_v10, %v7564_v3  ;;  %v2253_v29 = vsel %vm2244_vm9, %v7566_v11, %v7565_v10  ;;  %v4639_v6 = vpack.c.bf16 %v1371_v12, %v1367_v48  ;;  %v7573_v12 = vld [vmem:[#allocation34_spill] sm:$0xff]  ;;  %v7574_v26 = vld [vmem:[#allocation20_spill] sm:$0xff]  ;;  %v7575_v48 = vld [vmem:[#allocation21_spill] sm:$0xff] }
 0x790   :  { %2965 = vmatpush1.bf16.msra.mxu0 %v4643_v14  ;;  %v2254_v4 = vsel %vm2244_vm9, %v7567_v16, %v7561_v59  ;;  %v2227_v51 = vpop.permute.xlu1 %2226  ;;  %v4641_v8 = vpack.c.bf16 %v1373_v42, %v1369_v30  ;;  %v2282_v41 = vmul.f32 %v7568_v27, %v2250_v63  ;;  %v2285_v31 = vmul.f32 %v7571_v22, %v2255_v28  ;;  %v7576_v59 = vld [vmem:[#allocation37_spill] sm:$0xff] }
 0x791   :  { %2966 = vmatprep.subr.bf16.mxu0 %v4640_v19  ;;  %3051 = vmatpush1.bf16.msra.mxu1 %v4645_v1  ;;  %v2252_v33 = vsel %vm2244_vm9, %v2227_v51, %v7569_v49  ;;  %v2256_v15 = vsel %vm2244_vm9, %v7570_v38, %v2227_v51  ;;  %v2286_v44 = vmul.f32 %v7568_v27, %v2251_v20 }
 0x792   :  { %3052 = vmatprep.subr.bf16.mxu1 %v4642_v35  ;;  %v2289_v61 = vmul.f32 %v7571_v22, %v2256_v15  ;;  %v2290_v13 = vmul.f32 %v7568_v27, %v2252_v33  ;;  %v2278_v43 = vmul.f32 %v7568_v27, %v2249_v45  ;;  %v2112_v14 = vsel %vm2107_vm11, %v7573_v12, %v7572_v24  ;;  %v6545_v19 = vpop.permute.xlu0 %1966  ;;  %v7577_v35 = vld [vmem:[#allocation23_spill] sm:$0xff]  ;;  %v7580_v15 = vld [vmem:[#allocation94_spill] sm:$0xff] }
 0x793   :  { %v2116_v42 = vsel %vm2107_vm11, %v7574_v26, %v7573_v12  ;;  %v2281_v1 = vmul.f32 %v7571_v22, %v2254_v4  ;;  %v2113_v63 = vsel %vm2107_vm11, %v7576_v59, %v7575_v48  ;;  %v2117_v30 = vsel %vm2107_vm11, %v7577_v35, %v7576_v59 }
 0x794   :  { %2967 = vmatpush1.bf16.msra.mxu0 %v4639_v6  ;;  %v4699_v20 = vpack.c.bf16 %v2289_v61, %v2285_v31  ;;  %v6555_v28 = vpop.permute.xlu1 %2359  ;;  %v4700_v10 = vpack.c.bf16 %v2290_v13, %v2286_v44  ;;  %v2277_v45 = vmul.f32 %v7571_v22, %v2253_v29  ;;  %v7578_v6 = vld [vmem:[#allocation36_spill] sm:$0xff]  ;;  %v6571_v31 = vmul.f32 %v7580_v15, %v2116_v42  ;;  %v7581_v44 = vld [vmem:[#allocation95_spill] sm:$0xff]  ;;  %v7582_v29 = vld [vmem:[#allocation22_spill] sm:$0xff] }
 0x795   :  { %3053 = vmatpush1.bf16.msra.mxu1 %v4641_v8  ;;  %v2245_v4 = vsel %vm2244_vm9, %v7564_v3, %v7578_v6  ;;  %v2257_v51 = vsel %vm2244_vm9, %v7578_v6, %v7566_v11  ;;  %v7579_v8 = vld [vmem:[#allocation61_spill] sm:$0xff]  ;;  %v2141_v61 = vmul.f32 %v7581_v44, %v2112_v14  ;;  %v7583_v13 = vld [vmem:[#allocation38_spill] sm:$0xff]  ;;  %v4696_v3 = vpack.c.bf16 %v2282_v41, %v2278_v43  ;;  %v7584_v6 = vld [vmem:[#allocation52_spill] sm:$0xff] }
 0x796   :  { %v6568_v33 = vrot.slane %v7579_v8, %v5135_v56  ;;  %v1975_v12 = vsel %vm1970_vm10, %v7583_v13, %v7582_v29  ;;  %2968 = vmatprep.subr.bf16.mxu0 %v4700_v10  ;;  %v6579_v59 = vmul.f32 %v7580_v15, %v2117_v30  ;;  %v2145_v11 = vmul.f32 %v7581_v44, %v2113_v63  ;;  %v7585_v42 = vld [vmem:[#allocation54_spill] sm:$0xff]  ;;  %v7588_v30 = vld [vmem:[#allocation24_spill] sm:$0xff] }
 0x797   :  { %v2114_v56 = vsel %vm2107_vm11, %v6416_v17, %v7584_v6  ;;  %v2118_v14 = vsel %vm2107_vm11, %v7585_v42, %v6416_v17  ;;  %v4695_v36 = vpack.c.bf16 %v2281_v1, %v2277_v45  ;;  %v6591_v10 = vmul.f32 %v7586_v46, %v2245_v4  ;;  %v7587_v41 = vld [vmem:[#allocation98_spill] sm:$0xff]  ;;  %v7590_v17 = vld [vmem:[#allocation39_spill] sm:$0xff] }
 0x798   :  { %2969 = vmatpush2.bf16.msra.mxu0 %v4699_v20  ;;  %v2280_v43 = vmul.f32 %v7587_v41, %v2257_v51  ;;  %v6598_v63 = vsel %vm1970_vm10, %v7588_v30, %v7583_v13  ;;  %v2090_v2 = vpop.permute.xlu1 %2089  ;;  %v6601_v53 = vmul.f32 %v7589_v25, %v1975_v12  ;;  %v2258_v1 = vsel %vm2244_vm9, %v7590_v17, %v7567_v16  ;;  %v7591_v20 = vld [vmem:[#allocation59_spill] sm:$0xff]  ;;  %v7592_v4 = vld [vmem:[#allocation62_spill] sm:$0xff]  ;;  %v6613_v13 = vpop.permute.xlu0 %2361 }
 0x799   :  { %2970 = vmatprep.subr.bf16.mxu0 %v4696_v3  ;;  %v2115_v45 = vsel %vm2107_vm11, %v2090_v2, %v7591_v20  ;;  %v2119_v51 = vsel %vm2107_vm11, %v7592_v4, %v2090_v2  ;;  %v2148_v3 = vmul.f32 %v7580_v15, %v2118_v14  ;;  %v2149_v12 = vmul.f32 %v7581_v44, %v2114_v56 }
 0x79a   :  { %v2152_v58 = vmul.f32 %v7580_v15, %v2119_v51  ;;  %v2153_v34 = vmul.f32 %v7581_v44, %v2115_v45  ;;  %v4687_v16 = vpack.c.bf16 %v6579_v59, %v6571_v31  ;;  %v2247_v50 = vsel %vm2244_vm9, %v7562_v40, %v6448_v57 }
 0x79b   :  { %v2259_v2 = vsel %vm2244_vm9, %v6448_v57, %v7563_v52  ;;  %v4688_v14 = vpack.c.bf16 %v2145_v11, %v2141_v61  ;;  %v2246_v56 = vsel %vm2244_vm9, %v7560_v62, %v7590_v17  ;;  %v2284_v45 = vmul.f32 %v7587_v41, %v2258_v1  ;;  %v7595_v57 = vld [vmem:[#allocation41_spill] sm:$0xff]  ;;  %v7596_v17 = vld [vmem:[#allocation56_spill] sm:$0xff] }
 0x79c   :  { %2971 = vmatpush2.bf16.msra.mxu0 %v4695_v36  ;;  %v4691_v31 = vpack.c.bf16 %v2152_v58, %v2148_v3  ;;  %v2243_v59 = vpop.permute.xlu1 %2242  ;;  %v4692_v51 = vpack.c.bf16 %v2153_v34, %v2149_v12  ;;  %v6638_v40 = vsel %vm2107_vm11, %v7572_v24, %v7593_v9  ;;  %v1976_v36 = vsel %vm1970_vm10, %v7595_v57, %v7594_v0  ;;  %v6667_v3 = vpop.permute.xlu0 %2357  ;;  %v7598_v12 = vld [vmem:[#allocation26_spill] sm:$0xff] }
 0x79d   :  { %v2248_v62 = vsel %vm2244_vm9, %v7569_v49, %v2243_v59  ;;  %v2260_v58 = vsel %vm2244_vm9, %v2243_v59, %v7570_v38  ;;  %v2287_v34 = vmul.f32 %v7586_v46, %v2247_v50  ;;  %v2288_v52 = vmul.f32 %v7587_v41, %v2259_v2  ;;  %v7597_v50 = vld [vmem:[#allocation58_spill] sm:$0xff] }
 0x79e   :  { %v2291_v24 = vmul.f32 %v7586_v46, %v2248_v62  ;;  %v2292_v61 = vmul.f32 %v7587_v41, %v2260_v58  ;;  %2972 = vmatprep.subr.bf16.mxu0 %v4692_v51  ;;  %v2283_v11 = vmul.f32 %v7586_v46, %v2246_v56  ;;  %v2120_v49 = vsel %vm2107_vm11, %v7593_v9, %v7574_v26  ;;  %v7599_v62 = vld [vmem:[#allocation42_spill] sm:$0xff] }
 0x79f   :  { %v1977_v38 = vsel %vm1970_vm10, %v6482_v55, %v7596_v17  ;;  %v1981_v1 = vsel %vm1970_vm10, %v7597_v50, %v6482_v55  ;;  %v1980_v2 = vsel %vm1970_vm10, %v7598_v12, %v7595_v57  ;;  %v4698_v59 = vpack.c.bf16 %v2284_v45, %v2280_v43  ;;  %v7600_v58 = vld [vmem:[#allocation70_spill] sm:$0xff] }
 0x7a0   :  { %2973 = vmatpush2.bf16.msra.mxu0 %v4691_v31  ;;  %v4701_v56 = vpack.c.bf16 %v2291_v24, %v2287_v34  ;;  %v1953_v9 = vpop.permute.xlu1 %1952  ;;  %v4702_v26 = vpack.c.bf16 %v2292_v61, %v2288_v52  ;;  %v2008_v51 = vmul.f32 %v7589_v25, %v1976_v36  ;;  %v2121_v55 = vsel %vm2107_vm11, %v7599_v62, %v7577_v35  ;;  %v7602_v34 = vld [vmem:[#allocation99_spill] sm:$0xff] }
 0x7a1   :  { %2974 = vmatprep.subr.bf16.mxu0 %v4688_v14  ;;  %v1978_v31 = vsel %vm1970_vm10, %v1953_v9, %v7600_v58  ;;  %v1982_v57 = vsel %vm1970_vm10, %v7601_v47, %v1953_v9  ;;  %v2011_v24 = vmul.f32 %v7602_v34, %v1981_v1  ;;  %v2012_v14 = vmul.f32 %v7589_v25, %v1977_v38  ;;  %v6703_v9 = vpop.permute.xlu0 %2365 }
 0x7a2   :  { %v2015_v43 = vmul.f32 %v7602_v34, %v1982_v57  ;;  %v2016_v45 = vmul.f32 %v7589_v25, %v1978_v31  ;;  %3054 = vmatprep.subr.bf16.mxu1 %v4702_v26  ;;  %v4697_v36 = vpack.c.bf16 %v2283_v11, %v6591_v10  ;;  %v2110_v35 = vsel %vm2107_vm11, %v7584_v6, %v6510_v5 }
 0x7a3   :  { %v2122_v52 = vsel %vm2107_vm11, %v6510_v5, %v7585_v42  ;;  %3055 = vmatpush2.bf16.msra.mxu1 %v4701_v56  ;;  %v2007_v61 = vmul.f32 %v7602_v34, %v1980_v2  ;;  %v2109_v38 = vsel %vm2107_vm11, %v7575_v48, %v7599_v62  ;;  %v2147_v6 = vmul.f32 %v6568_v33, %v2121_v55  ;;  %v7605_v55 = vld [vmem:[#allocation5_spill] sm:$0xff] }
 0x7a4   :  { %2975 = vmatpush2.bf16.msra.mxu0 %v4687_v16  ;;  %v4683_v10 = vpack.c.bf16 %v2015_v43, %v2011_v24  ;;  %v2106_v11 = vpop.permute.xlu1 %2105  ;;  %3056 = vmatprep.subr.bf16.mxu1 %v4698_v59  ;;  %v4684_v1 = vpack.c.bf16 %v2016_v45, %v2012_v14  ;;  %v4680_v16 = vpack.c.bf16 %v2008_v51, %v6601_v53  ;;  %v7604_v53 = vld [vmem:[#allocation79_spill] sm:$0xff] }
 0x7a5   :  { %v2111_v5 = vsel %vm2107_vm11, %v7591_v20, %v2106_v11  ;;  %v2123_v42 = vsel %vm2107_vm11, %v2106_v11, %v7592_v4  ;;  %v2150_v48 = vmul.f32 %v6491_v37, %v2110_v35  ;;  %v2151_v2 = vmul.f32 %v6568_v33, %v2122_v52  ;;  %v7603_v4 = vld [vmem:[#allocation74_spill] sm:$0xff] }
 0x7a6   :  { %v2154_v56 = vmul.f32 %v6491_v37, %v2111_v5  ;;  %v2155_v26 = vmul.f32 %v6568_v33, %v2123_v42  ;;  %2976 = vmatprep.subr.bf16.mxu0 %v4684_v1  ;;  %v2003_v20 = vmul.f32 %v7602_v34, %v6598_v63  ;;  %v2146_v59 = vmul.f32 %v6491_v37, %v2109_v38  ;;  %v7607_v35 = vld [vmem:[#allocation78_spill] sm:$0xff]  ;;  %v7609_v38 = vld [vmem:[#allocation69_spill] sm:$0xff] }
 0x7a7   :  { %3057 = vmatpush2.bf16.msra.mxu1 %v4697_v36  ;;  %v4675_v51 = vpack.c.bf16 %v7604_v53, %v7603_v4  ;;  %v2143_v62 = vmul.f32 %v6568_v33, %v2120_v49  ;;  %v6725_v31 = vrot.slane %v7579_v8, %v7605_v55  ;;  %v2142_v63 = vmul.f32 %v6491_v37, %v6638_v40  ;;  %v7606_v36 = vld [vmem:[#allocation77_spill] sm:$0xff] }
 0x7a8   :  { %2977 = vmatpush2.bf16.msra.mxu0 %v4683_v10  ;;  %v4693_v57 = vpack.c.bf16 %v2154_v56, %v2150_v48  ;;  %v6727_v24 = vpop.permute.xlu1 %2367  ;;  %v4694_v14 = vpack.c.bf16 %v2155_v26, %v2151_v2  ;;  %v4679_v43 = vpack.c.bf16 %v2007_v61, %v2003_v20  ;;  %v1983_v45 = vsel %vm1970_vm10, %v6346_v54, %v7588_v30  ;;  %v7608_v61 = vld [vmem:[#allocation27_spill] sm:$0xff]  ;;  %v4225_v2 = vld [vmem:[%s7321_s4 + $0x28] ss:$0 sm:$0xff] }
 0x7a9   :  { %2978 = vmatprep.subr.bf16.mxu0 %v4680_v16  ;;  %v1984_v8 = vsel %vm1970_vm10, %v6486_v60, %v7598_v12  ;;  %v1973_v49 = vsel %vm1970_vm10, %v7596_v17, %v6545_v19  ;;  %v4676_v40 = vpack.c.bf16 %v7607_v35, %v7606_v36  ;;  %v4690_v52 = vpack.c.bf16 %v2147_v6, %v2143_v62  ;;  %v6757_v17 = vpop.permute.xlu0 %2349  ;;  %v7611_v56 = vld [vmem:[#allocation60_spill] sm:$0xff] }
 0x7aa   :  { %3058 = vmatprep.subr.bf16.mxu1 %v4694_v14  ;;  %v6747_v10 = vmul.f32 %v7609_v38, %v7608_v61  ;;  %v4689_v30 = vpack.c.bf16 %v2146_v59, %v2142_v63  ;;  %v6751_v11 = vrot.slane %v7559_v18, %v7605_v55  ;;  %v1985_v12 = vsel %vm1970_vm10, %v6545_v19, %v7597_v50  ;;  %v4224_v19 = vld [vmem:[%s7321_s4 + $0x20] ss:$0 sm:$0xff] }
 0x7ab   :  { %3059 = vmatpush2.bf16.msra.mxu1 %v4693_v57  ;;  %v2006_v1 = vmul.f32 %v6725_v31, %v1983_v45  ;;  %v1972_v6 = vsel %vm1970_vm10, %v7594_v0, %v6486_v60  ;;  %v2010_v5 = vmul.f32 %v6725_v31, %v1984_v8  ;;  %v7610_v50 = vld [vmem:[#allocation63_spill] sm:$0xff]  ;;  %v2014_v48 = vmul.f32 %v6725_v31, %v1985_v12  ;;  %v7615_v8 = vld [vmem:[#allocation97_spill] sm:$0xff] }
 0x7ac   :  { %2979 = vmatpush2.bf16.msra.mxu0 %v4679_v43  ;;  %v1969_v18 = vpop.permute.xlu1 %1968  ;;  %3060 = vmatprep.subr.bf16.mxu1 %v4690_v52  ;;  %v2013_v42 = vmul.f32 %v6751_v11, %v1973_v49  ;;  %v2392_v16 = vsel %vm2381_vm12, %v7610_v50, %v6613_v13  ;;  %v2388_v26 = vsel %vm2381_vm12, %v6613_v13, %v7611_v56  ;;  %v7612_v55 = vld [vmem:[#allocation67_spill] sm:$0xff]  ;;  %v7616_v49 = vld [vmem:[#allocation101_spill] sm:$0xff] }
 0x7ad   :  { %2980 = vmatprep.subr.bf16.mxu0 %v4676_v40  ;;  %v1974_v0 = vsel %vm1970_vm10, %v7600_v58, %v1969_v18  ;;  %v1986_v60 = vsel %vm1970_vm10, %v1969_v18, %v7601_v47  ;;  %v1971_v47 = vsel %vm1970_vm10, %v7582_v29, %v6346_v54  ;;  %v2009_v58 = vmul.f32 %v6751_v11, %v1972_v6  ;;  %v7613_v57 = vld [vmem:[#allocation71_spill] sm:$0xff]  ;;  %v2378_v29 = vpop.permute.xlu0 %2377  ;;  %v7618_v6 = vld [vmem:[#allocation72_spill] sm:$0xff]  ;;  %v7620_v18 = vld [vmem:[#allocation10_spill] sm:$0xff] }
 0x7ae   :  { %v2017_v20 = vmul.f32 %v6751_v11, %v1974_v0  ;;  %v2018_v59 = vmul.f32 %v6725_v31, %v1986_v60  ;;  %v2387_v4 = vsel %vm2381_vm12, %v6555_v28, %v6727_v24  ;;  %v2422_v53 = vmul.f32 %v4224_v19, %v2392_v16 }
 0x7af   :  { %3061 = vmatpush2.bf16.msra.mxu1 %v4689_v30  ;;  %v7614_v14 = vpack.c.bf16 %v7612_v55, %v7613_v57  ;;  %v4682_v43 = vpack.c.bf16 %v2010_v5, %v2006_v1  ;;  %v2423_v45 = vmul.f32 %v4225_v2, %v2388_v26  ;;  %v2386_v54 = vsel %vm2381_vm12, %v6667_v3, %v6703_v9  ;;  %v6818_v30 = vld [vmem:[%s7319_s10] ss:$12 sps:$4 sm:$0xff]   ;;  %v4226_v57 = vld [vmem:[%s7321_s4 + $0x30] ss:$0 sm:$0xff] }
 0x7b0   :  { %2981 = vmatpush2.bf16.msra.mxu0 %v4675_v51  ;;  %v4685_v13 = vpack.c.bf16 %v2017_v20, %v2013_v42  ;;  %v2364_v62 = vpop.permute.xlu1 %2363  ;;  %v4686_v63 = vpack.c.bf16 %v2018_v59, %v2014_v48  ;;  %v2390_v35 = vsel %vm2381_vm12, %v6757_v17, %v6667_v3  ;;  %v2419_v40 = vmul.f32 %v4225_v2, %v2387_v4  ;;  %v7617_v1 = vld [vmem:[#allocation68_spill] sm:$0xff]  ;;  %v7622_v20 = vld [vmem:[#allocation11_spill] sm:$0xff]  ;;  %v7623_v59 = vld [vmem:[#allocation73_spill] sm:$0xff] }
 0x7b1   :  { %2982 = vmatprep.subr.bf16.mxu0 %v7614_v14  ;;  %v2389_v51 = vsel %vm2381_vm12, %v2364_v62, %v7615_v8  ;;  %v2393_v36 = vsel %vm2381_vm12, %v7616_v49, %v2364_v62  ;;  %v2005_v12 = vmul.f32 %v6751_v11, %v1971_v47  ;;  %v7619_v5 = vpack.c.bf16 %v7617_v1, %v7618_v6  ;;  %v7621_v3 = vld [vmem:[#allocation8_spill] sm:$0xff]  ;;  %v4227_v14 = vld [vmem:[%s7321_s4 + $0x38] ss:$0 sm:$0xff] }
 0x7b2   :  { %v2426_v52 = vmul.f32 %v4224_v19, %v2393_v36  ;;  %v2427_v61 = vmul.f32 %v4225_v2, %v2389_v51  ;;  %3062 = vmatprep.subr.bf16.mxu1 %v4686_v63  ;;  %v1877_v42 = vmul.f32 %v7609_v38, %v7620_v18  ;;  %v1873_v16 = vmul.f32 %v7609_v38, %v7621_v3  ;;  %v7624_v63 = vld [vmem:[#allocation9_spill] sm:$0xff]  ;;  %v7626_v51 = vld [vmem:[#allocation7_spill] sm:$0xff] }
 0x7b3   :  { %3063 = vmatpush2.bf16.msra.mxu1 %v4685_v13  ;;  %v2415_v0 = vmul.f32 %v4225_v2, %v2386_v54  ;;  %v1880_v4 = vmul.f32 %v7623_v59, %v7622_v20  ;;  %v4681_v47 = vpack.c.bf16 %v2009_v58, %v2005_v12  ;;  %v2414_v62 = vmul.f32 %v4224_v19, %v2390_v35 }
 0x7b4   :  { %2983 = vmatpush2.bf16.msra.mxu0 %v7619_v5  ;;  %v4707_v60 = vpack.c.bf16 %v2426_v52, %v2422_v53  ;;  %v2352_v48 = vpop.permute.xlu1 %2351  ;;  %3064 = vmatprep.subr.bf16.mxu1 %v4682_v43  ;;  %v4708_v26 = vpack.c.bf16 %v2427_v61, %v2423_v45  ;;  %v4678_v55 = vpack.c.bf16 %v6747_v10, %v1877_v42  ;;  %v2374_v10 = vpop.permute.xlu0 %2373  ;;  %v7625_v45 = vld [vmem:[#allocation75_spill] sm:$0xff]  ;;  %v7627_v52 = vmov 0   ;;  %v4873_v5 = vld [vmem:[%s7319_s10 + $0x8] ss:$12 sps:$4 sm:$0xff]  }
 0x7b5   :  { %v2391_v13 = vsel %vm2381_vm12, %v2352_v48, %v6555_v28  ;;  %v2384_v2 = vsel %vm2381_vm12, %v7611_v56, %v2378_v29  ;;  %v4704_v58 = vpack.c.bf16 %v2419_v40, %v2415_v0  ;;  %v2396_v28 = vsel %vm2381_vm12, %v2378_v29, %v7610_v50 }
 0x7b6   :  { %v2418_v53 = vmul.f32 %v4224_v19, %v2391_v13  ;;  %3007 = vmatprep.subr.bf16.mxu0 %v4708_v26  ;;  %v1876_v43 = vmul.f32 %v7623_v59, %v7624_v63  ;;  %v4674_v54 = vpack.c.bf16 %v1873_v16, %v7625_v45  ;;  %v1872_v36 = vmul.f32 %v7623_v59, %v7626_v51 }
 0x7b7   :  { %2985 = vmatmul.mubr.bf16.vlgmr.msra.gmra.mxu0 %v6818_v30  ;;  %3065 = vmatpush2.bf16.msra.mxu1 %v4681_v47  ;;  %v2424_v35 = vmul.f32 %v4226_v57, %v2384_v2  ;;  %v2425_v61 = vmul.f32 %v4227_v14, %v2396_v28  ;;  %v2382_v12 = vsel %vm2381_vm12, %v6703_v9, %v2374_v10 }
 0x7b8   :  { %3008 = vmatpush1.bf16.msra.mxu0 %v4707_v60  ;;  %v4703_v56 = vpack.c.bf16 %v2418_v53, %v2414_v62  ;;  %v2380_v19 = vpop.permute.xlu1 %2379  ;;  %3066 = vmatprep.subr.bf16.mxu1 %v4678_v55  ;;  %v4677_v40 = vpack.c.bf16 %v1880_v4, %v1876_v43  ;;  %v2416_v9 = vmul.f32 %v4226_v57, %v2382_v12 }
 0x7b9   :  { %3009 = vmatprep.subr.bf16.mxu0 %v4704_v58  ;;  %v2385_v50 = vsel %vm2381_vm12, %v7615_v8, %v2380_v19  ;;  %v2397_v29 = vsel %vm2381_vm12, %v2380_v19, %v7616_v49  ;;  %3027 = vmatprep.mubr.bf16.mxu0 %v7627_v52  ;;  %v2394_v8 = vsel %vm2381_vm12, %v2374_v10, %v6757_v17  ;;  %v7628_v49 = vld [vmem:[#allocation6_spill] sm:$0xff] }
 0x7ba   :  { %v2428_v1 = vmul.f32 %v4226_v57, %v2385_v50  ;;  %v2429_v6 = vmul.f32 %v4227_v14, %v2397_v29  ;;  %v1868_v18 = vmul.f32 %v7623_v59, %v7628_v49  ;;  %v2417_v20 = vmul.f32 %v4227_v14, %v2394_v8 }
 0x7bb   :  { %3067 = vmatpush2.bf16.msra.mxu1 %v4677_v40 }
 0x7bc   :  { %3010 = vmatpush1.bf16.msra.mxu0 %v4703_v56  ;;  %v4709_v42 = vpack.c.bf16 %v2428_v1, %v2424_v35  ;;  %v2376_v3 = vpop.permute.xlu1 %2375  ;;  %3068 = vmatprep.subr.bf16.mxu1 %v4674_v54  ;;  %v4710_v16 = vpack.c.bf16 %v2429_v6, %v2425_v61  ;;  %v4673_v26 = vpack.c.bf16 %v1872_v36, %v1868_v18 }
 0x7bd   :  { %v2383_v0 = vsel %vm2381_vm12, %v6727_v24, %v2376_v3  ;;  %v2395_v60 = vsel %vm2381_vm12, %v2376_v3, %v2352_v48 }
 0x7be   :  { %v2420_v17 = vmul.f32 %v4226_v57, %v2383_v0  ;;  %v2421_v4 = vmul.f32 %v4227_v14, %v2395_v60  ;;  %3093 = vmatprep.subr.bf16.mxu0 %v4710_v16  ;;  %v2567_v57 = vpop.permute.xlu0 %2566 }
 0x7bf   :  { %4311 = vmatmul.mubr.msk.bf16.vlgmr.msra.gmra.mxu0 %vm52_vm0, %v4873_v5  ;;  %3069 = vmatpush2.bf16.msra.mxu1 %v4673_v26 }
 0x7c0   :  { %3094 = vmatpush1.bf16.msra.mxu0 %v4709_v42  ;;  %v4705_v47 = vpack.c.bf16 %v2420_v17, %v2416_v9  ;;  %v4706_v62 = vpack.c.bf16 %v2421_v4, %v2417_v20  ;;  %3113 = vmatprep.mubr.bf16.mxu0 %v7627_v52 }
 0x7c2   :  { %3071 = vmatmul.mubr.bf16.vlgmr.msra.gmra.mxu1 %v6818_v30  ;;  %3095 = vmatprep.subr.bf16.mxu0 %v4706_v62 }
 0x7c4   :  { %3096 = vmatpush1.bf16.msra.mxu0 %v4705_v47 }
 0x7c7   :  { %4312 = vmatmul.mubr.msk.bf16.vlgmr.msra.gmra.mxu0 %vm52_vm0, %v4873_v5  ;;  %v2572_v43 = vpop.permute.xlu1 %2571 }
 0x877   :  { %v2986_v24 = vpop.f32.mrf.mxu0 }
 0x878   :  { %v2987_v14 = vadd.f32 %v2986_v24, %v2567_v57 }
 0x879   :  { %v2988_v48 = vpop.f32.mrf.mxu0 }
 0x87a   :  { %v2989_v53 = vadd.f32 %v2988_v48, %v2567_v57 }
 0x87b   :  { %v2990_v13 = vpop.f32.mrf.mxu0 }
 0x87c   :  { %v2991_v36 = vadd.f32 %v2990_v13, %v2572_v43 }
 0x87d   :  { %v2992_v55 = vpop.f32.mrf.mxu0 }
 0x87e   :  { %v2993_v45 = vadd.f32 %v2992_v55, %v2572_v43 }
 0x87f   :  { %v3029_v2 = vpop.f32.mrf.mxu0 }
 0x880   :  { %v6881_v56 = vadd.f32 %v3029_v2, %v2987_v14 }
 0x881   :  { %v3031_v58 = vpop.f32.mrf.mxu0 }
 0x882   :  { %v6879_v28 = vadd.f32 %v3031_v58, %v2989_v53  ;;  %v3072_v63 = vpop.f32.mrf.mxu1  ;;  %v3136_v29 = vmul.f32 %v6881_v56, %v6881_v56 }
 0x883   :  { %v3033_v10 = vpop.f32.mrf.mxu0  ;;  %v3073_v51 = vadd.f32 %v3072_v63, %v2567_v57 }
 0x884   :  { %v3074_v19 = vpop.f32.mrf.mxu1  ;;  %v3137_v54 = vmul.f32 %v6879_v28, %v6879_v28  ;;  %v3124_v40 = vadd.f32 %v6879_v28, %v6881_v56  ;;  %v6893_v1 = vadd.f32 %v3033_v10, %v2991_v36 }
 0x885   :  { %v3035_v30 = vpop.f32.mrf.mxu0  ;;  %v3075_v6 = vadd.f32 %v3074_v19, %v2567_v57 }
 0x886   :  { %v3076_v35 = vpop.f32.mrf.mxu1  ;;  %v6889_v61 = vadd.f32 %v3035_v30, %v2993_v45  ;;  %v3144_v8 = vadd.f32 %v3137_v54, %v3136_v29  ;;  %v3140_v24 = vmul.f32 %v6893_v1, %v6893_v1 }
 0x887   :  { %v3115_v50 = vpop.f32.mrf.mxu0  ;;  %v3077_v49 = vadd.f32 %v3076_v35, %v2572_v43 }
 0x888   :  { %v6891_v12 = vadd.f32 %v3115_v50, %v3073_v51  ;;  %v3078_v3 = vpop.f32.mrf.mxu1  ;;  %v3129_v0 = vadd.f32 %v6889_v61, %v6893_v1  ;;  %v3141_v20 = vmul.f32 %v6889_v61, %v6889_v61 }
 0x889   :  { %v3117_v5 = vpop.f32.mrf.mxu0  ;;  %v3079_v17 = vadd.f32 %v3078_v3, %v2572_v43  ;;  %v3161_v3 = vld [vmem:[%s7322_s7 + $0x8] sm:$0xff] }
 0x88a   :  { %v3125_v18 = vadd.f32 %v3124_v40, %v6891_v12  ;;  %v3138_v42 = vmul.f32 %v6891_v12, %v6891_v12  ;;  %v6898_v16 = vadd.f32 %v3117_v5, %v3075_v6  ;;  %v3149_v2 = vadd.f32 %v3141_v20, %v3140_v24 }
 0x88b   :  { %v3119_v9 = vpop.f32.mrf.mxu0  ;;  %v7629_v20 = vmov 1  }
 0x88c   :  { %v6902_v60 = vadd.f32 %v3119_v9, %v3077_v49  ;;  %v3145_v26 = vadd.f32 %v3144_v8, %v3138_v42  ;;  %v3139_v4 = vmul.f32 %v6898_v16, %v6898_v16  ;;  %v3126_v62 = vadd.f32 %v3125_v18, %v6898_v16  ;;  %v3160_v8 = vld [vmem:[%s7322_s7] sm:$0xff] }
 0x88d   :  { %v3121_v47 = vpop.f32.mrf.mxu0 }
 0x88e   :  { %v3130_v48 = vadd.f32 %v3129_v0, %v6902_v60  ;;  %v3142_v13 = vmul.f32 %v6902_v60, %v6902_v60  ;;  %v6914_v55 = vadd.f32 %v3121_v47, %v3079_v17  ;;  %3127 = vadd.xlane.f32.xlu1 %v3126_v62  ;;  %v3146_v57 = vadd.f32 %v3145_v26, %v3139_v4 }
 0x890   :  { %3147 = vadd.xlane.f32.xlu0 %v3146_v57  ;;  %v3143_v53 = vmul.f32 %v6914_v55, %v6914_v55  ;;  %v3131_v58 = vadd.f32 %v3130_v48, %v6914_v55  ;;  %v3150_v14 = vadd.f32 %v3149_v2, %v3142_v13 }
 0x892   :  { %v3151_v10 = vadd.f32 %v3150_v14, %v3143_v53 }
 0x894   :  { %3132 = vadd.xlane.f32.xlu0 %v3131_v58 }
 0x898   :  { %3152 = vadd.xlane.f32.xlu0 %v3151_v10 }
 0x917   :  { %v3128_v63 = vpop.xlane.xlu1 %3127 }
 0x918   :  { %v3134_v43 = vmul.f32 0.001953125, %v3128_v63 }
 0x919   :  { %v3148_v30 = vpop.xlane.xlu0 %3147 }
 0x91a   :  { %v3156_v19 = vmul.f32 %v3134_v43, %v3134_v43  ;;  %v3154_v45 = vmul.f32 0.001953125, %v3148_v30 }
 0x91c   :  { %v3158_v54 = vsub.f32 %v3154_v45, %v3156_v19 }
 0x91d   :  { %v3133_v51 = vpop.xlane.xlu0 %3132 }
 0x91e   :  { %v3162_v36 = vadd.f32 0.8, %v3158_v54  ;;  %v3135_v35 = vmul.f32 0.001953125, %v3133_v51 }
 0x920   :  { %4890 = vrsqrt.f32 %v3162_v36  ;;  %v3157_v29 = vmul.f32 %v3135_v35, %v3135_v35 }
 0x921   :  { %v3153_v50 = vpop.xlane.xlu0 %3152 }
 0x922   :  { %v3155_v40 = vmul.f32 0.001953125, %v3153_v50 }
 0x924   :  { %v3159_v6 = vsub.f32 %v3155_v40, %v3157_v29 }
 0x926   :  { %v3163_v5 = vadd.f32 0.8, %v3159_v6 }
 0x928   :  { %4892 = vrsqrt.f32 %v3163_v5 }
 0x92d   :  { %v4891_v49 = vpop.eup %4890 }
 0x92e   :  { %v3166_v18 = vmul.f32 %v4891_v49, %v3160_v8 }
 0x930   :  { %v3168_v42 = vmul.f32 %v3166_v18, %v3134_v43 }
 0x932   :  { %3172 = vrot.lane.b32.xlu1 %v3168_v42, %s4907_s24 }
 0x935   :  { %v4893_v9 = vpop.eup %4892 }
 0x936   :  { %3182 = vperm.xlu1 %4838, %v3166_v18   ;;  %v3167_v0 = vmul.f32 %v4893_v9, %v3161_v3 }
 0x938   :  { %v3169_v26 = vmul.f32 %v3167_v0, %v3135_v35 }
 0x93a   :  { %3174 = vrot.lane.b32.xlu0 %v3169_v26, %s4907_s24  ;;  %3187 = vperm.xlu1 %4838, %v3167_v0   ;;  %v7078_v26 = vld.sshfl [vmem:[%s7323_s12] sm:$0x33 pattern:$0x76325410] }
 0x93e   :  { %4841 = vset.pattern.permute.xlu1 %v7629_v20 }
 0x9a4   :  { %v3173_v17 = vpop.permute.xlu1 %3172 }
 0x9a5   :  { %v3178_v4 = vsub.f32 %v3160_v8, %v3173_v17 }
 0x9a7   :  { %3200 = vperm.xlu1 %4841, %v3178_v4   ;;  %v3807_v4 = vcombine.high %v7078_v26, %v7078_v26 }
 0x9ac   :  { %v3175_v47 = vpop.permute.xlu0 %3174 }
 0x9ad   :  { %v3179_v62 = vsub.f32 %v3161_v3, %v3175_v47 }
 0x9af   :  { %3205 = vperm.xlu0 %4842, %v3179_v62  }
 0x9b1   :  { %v3183_v24 = vpop.permute.xlu1 %3182 }
 0x9b2   :  { %v3190_v13 = vmul.f32 %v3183_v24, %v6881_v56  ;;  %v3191_v57 = vmul.f32 %v3183_v24, %v6879_v28  ;;  %v3192_v2 = vmul.f32 %v3183_v24, %v6891_v12  ;;  %v3193_v63 = vmul.f32 %v3183_v24, %v6898_v16 }
 0x9b3   :  { %4843 = vset.pattern.permute.xlu0 %v7627_v52 }
 0x9b5   :  { %v3188_v48 = vpop.permute.xlu1 %3187 }
 0x9b6   :  { %v3194_v28 = vmul.f32 %v3188_v48, %v6893_v1  ;;  %v3195_v56 = vmul.f32 %v3188_v48, %v6889_v61  ;;  %v3196_v1 = vmul.f32 %v3188_v48, %v6902_v60  ;;  %v3197_v61 = vmul.f32 %v3188_v48, %v6914_v55 }
 0xa22   :  { %v3201_v53 = vpop.permute.xlu1 %3200 }
 0xa23   :  { %v3208_v58 = vadd.f32 %v3201_v53, %v3190_v13  ;;  %v3209_v14 = vadd.f32 %v3201_v53, %v3191_v57  ;;  %v3210_v10 = vadd.f32 %v3201_v53, %v3192_v2  ;;  %v3211_v19 = vadd.f32 %v3201_v53, %v3193_v63  ;;  %v3793_v13 = vld [vmem:[%s7324_s13] sm:$0x7] }
 0xa25   :  { %vm3216_vm13 = vcmp.gt.f32.partialorder %v3208_v58, 0.0  ;;  %vm3217_vm14 = vcmp.gt.f32.partialorder %v3209_v14, 0.0  ;;  %v3224_v43 = vmul.f32 0.2, %v3208_v58  ;;  %v3225_v30 = vmul.f32 0.2, %v3209_v14 }
 0xa26   :  { %v3226_v52 = vmul.f32 0.2, %v3210_v10  ;;  %vm3218_vm15 = vcmp.gt.f32.partialorder %v3210_v10, 0.0  ;;  %v3227_v51 = vmul.f32 0.2, %v3211_v19  ;;  %vm3219_vm0 = vcmp.gt.f32.partialorder %v3211_v19, 0.0 }
 0xa27   :  { %v6933_v45 = vsel %vm3216_vm13, %v3208_v58, %v3224_v43  ;;  %v6935_v54 = vsel %vm3217_vm14, %v3209_v14, %v3225_v30  ;;  %vm3989_vm13 = vcmask 130048  }
 0xa28   :  { %3640 = vrot.lane.b32.xlu0 %v6935_v54, %s4921_s5  ;;  %3636 = vrot.lane.b32.xlu1 %v6933_v45, %s4921_s5  ;;  %v6943_v36 = vsel %vm3218_vm15, %v3210_v10, %v3226_v52  ;;  %v6948_v29 = vsel %vm3219_vm0, %v3211_v19, %v3227_v51 }
 0xa29   :  { %4386 = vmatprep.mubr.msk.bf16.mxu0 %vm3989_vm13, %v3807_v4  ;;  %4387 = vmatprep.mubr.msk.bf16.mxu1 %vm3989_vm13, %v3807_v4 }
 0xa2a   :  { %v3206_v12 = vpop.permute.xlu0 %3205 }
 0xa2b   :  { %v3212_v16 = vadd.f32 %v3206_v12, %v3194_v28  ;;  %v3213_v35 = vadd.f32 %v3206_v12, %v3195_v56  ;;  %v3214_v40 = vadd.f32 %v3206_v12, %v3196_v1  ;;  %v3215_v8 = vadd.f32 %v3206_v12, %v3197_v61 }
 0xa2c   :  { %3644 = vrot.lane.b32.xlu0 %v6943_v36, %s4921_s5 }
 0xa2d   :  { %vm3220_vm1 = vcmp.gt.f32.partialorder %v3212_v16, 0.0  ;;  %v3228_v50 = vmul.f32 0.2, %v3212_v16  ;;  %v3229_v6 = vmul.f32 0.2, %v3213_v35  ;;  %vm3221_vm2 = vcmp.gt.f32.partialorder %v3213_v35, 0.0 }
 0xa2e   :  { %v3230_v49 = vmul.f32 0.2, %v3214_v40  ;;  %vm3222_vm3 = vcmp.gt.f32.partialorder %v3214_v40, 0.0  ;;  %v3231_v60 = vmul.f32 0.2, %v3215_v8  ;;  %vm3223_vm4 = vcmp.gt.f32.partialorder %v3215_v8, 0.0 }
 0xa2f   :  { %v6950_v5 = vsel %vm3220_vm1, %v3212_v16, %v3228_v50  ;;  %v6957_v18 = vsel %vm3221_vm2, %v3213_v35, %v3229_v6 }
 0xa30   :  { %3648 = vrot.lane.b32.xlu0 %v6948_v29, %s4921_s5  ;;  %3638 = vrot.lane.b32.xlu1 %v6950_v5, %s4921_s5  ;;  %v6963_v42 = vsel %vm3222_vm3, %v3214_v40, %v3230_v49  ;;  %v6969_v55 = vsel %vm3223_vm4, %v3215_v8, %v3231_v60 }
 0xa34   :  { %3576 = vrot.lane.b32.xlu0 %v6933_v45, %s4922_s15  ;;  %3642 = vrot.lane.b32.xlu1 %v6957_v18, %s4921_s5 }
 0xa38   :  { %3580 = vrot.lane.b32.xlu0 %v6935_v54, %s4922_s15  ;;  %3646 = vrot.lane.b32.xlu1 %v6963_v42, %s4921_s5 }
 0xa3c   :  { %3584 = vrot.lane.b32.xlu0 %v6943_v36, %s4922_s15  ;;  %3650 = vrot.lane.b32.xlu1 %v6969_v55, %s4921_s5 }
 0xa40   :  { %3588 = vrot.lane.b32.xlu0 %v6948_v29, %s4922_s15  ;;  %3578 = vrot.lane.b32.xlu1 %v6950_v5, %s4922_s15 }
 0xa44   :  { %3516 = vrot.lane.b32.xlu0 %v6933_v45, %s4913_s25  ;;  %3582 = vrot.lane.b32.xlu1 %v6957_v18, %s4922_s15 }
 0xa48   :  { %3520 = vrot.lane.b32.xlu0 %v6935_v54, %s4913_s25  ;;  %3586 = vrot.lane.b32.xlu1 %v6963_v42, %s4922_s15 }
 0xa4c   :  { %3524 = vrot.lane.b32.xlu0 %v6943_v36, %s4913_s25  ;;  %3590 = vrot.lane.b32.xlu1 %v6969_v55, %s4922_s15 }
 0xa50   :  { %3528 = vrot.lane.b32.xlu0 %v6948_v29, %s4913_s25  ;;  %3518 = vrot.lane.b32.xlu1 %v6950_v5, %s4913_s25 }
 0xa54   :  { %3420 = vrot.lane.b32.xlu0 %v6933_v45, %s4910_s21  ;;  %3522 = vrot.lane.b32.xlu1 %v6957_v18, %s4913_s25 }
 0xa58   :  { %3424 = vrot.lane.b32.xlu0 %v6935_v54, %s4910_s21  ;;  %3526 = vrot.lane.b32.xlu1 %v6963_v42, %s4913_s25 }
 0xa5c   :  { %3428 = vrot.lane.b32.xlu0 %v6943_v36, %s4910_s21  ;;  %3530 = vrot.lane.b32.xlu1 %v6969_v55, %s4913_s25 }
 0xa60   :  { %3432 = vrot.lane.b32.xlu0 %v6948_v29, %s4910_s21  ;;  %3422 = vrot.lane.b32.xlu1 %v6950_v5, %s4910_s21 }
 0xa64   :  { %3360 = vrot.lane.b32.xlu0 %v6933_v45, %s4918_s2  ;;  %3426 = vrot.lane.b32.xlu1 %v6957_v18, %s4910_s21 }
 0xa68   :  { %3364 = vrot.lane.b32.xlu0 %v6935_v54, %s4918_s2  ;;  %3430 = vrot.lane.b32.xlu1 %v6963_v42, %s4910_s21 }
 0xa6c   :  { %3368 = vrot.lane.b32.xlu0 %v6943_v36, %s4918_s2  ;;  %3434 = vrot.lane.b32.xlu1 %v6969_v55, %s4910_s21 }
 0xa70   :  { %3372 = vrot.lane.b32.xlu0 %v6948_v29, %s4918_s2  ;;  %3362 = vrot.lane.b32.xlu1 %v6950_v5, %s4918_s2 }
 0xa74   :  { %3300 = vrot.lane.b32.xlu0 %v6933_v45, %s4919_s29  ;;  %3366 = vrot.lane.b32.xlu1 %v6957_v18, %s4918_s2 }
 0xa78   :  { %3304 = vrot.lane.b32.xlu0 %v6935_v54, %s4919_s29  ;;  %3370 = vrot.lane.b32.xlu1 %v6963_v42, %s4918_s2 }
 0xa7c   :  { %3308 = vrot.lane.b32.xlu0 %v6943_v36, %s4919_s29  ;;  %3374 = vrot.lane.b32.xlu1 %v6969_v55, %s4918_s2 }
 0xa80   :  { %3312 = vrot.lane.b32.xlu0 %v6948_v29, %s4919_s29  ;;  %3302 = vrot.lane.b32.xlu1 %v6950_v5, %s4919_s29 }
 0xa84   :  { %3240 = vrot.lane.b32.xlu0 %v6933_v45, %s4920_s30  ;;  %3306 = vrot.lane.b32.xlu1 %v6957_v18, %s4919_s29 }
 0xa88   :  { %3244 = vrot.lane.b32.xlu0 %v6935_v54, %s4920_s30  ;;  %3310 = vrot.lane.b32.xlu1 %v6963_v42, %s4919_s29 }
 0xa8c   :  { %3248 = vrot.lane.b32.xlu0 %v6943_v36, %s4920_s30  ;;  %3314 = vrot.lane.b32.xlu1 %v6969_v55, %s4919_s29 }
 0xa90   :  { %3252 = vrot.lane.b32.xlu0 %v6948_v29, %s4920_s30  ;;  %3242 = vrot.lane.b32.xlu1 %v6950_v5, %s4920_s30 }
 0xa94   :  { %3696 = vrot.lane.b32.xlu0 %v6933_v45, %s4923_s8  ;;  %3246 = vrot.lane.b32.xlu1 %v6957_v18, %s4920_s30 }
 0xa98   :  { %3700 = vrot.lane.b32.xlu0 %v6935_v54, %s4923_s8  ;;  %3250 = vrot.lane.b32.xlu1 %v6963_v42, %s4920_s30 }
 0xa9a   :  { %v3641_v3 = vpop.permute.xlu0 %3640  ;;  %v3637_v9 = vpop.permute.xlu1 %3636 }
 0xa9b   :  { %v3656_v57 = vsel %vm2244_vm9, %v3637_v9, %v3641_v3 }
 0xa9c   :  { %3704 = vrot.lane.b32.xlu0 %v6943_v36, %s4923_s8  ;;  %3254 = vrot.lane.b32.xlu1 %v6969_v55, %s4920_s30  ;;  %v3660_v43 = vmul.f32 %v3656_v57, %v7571_v22 }
 0xa9e   :  { %v3645_v0 = vpop.permute.xlu0 %3644 }
 0xa9f   :  { %v3654_v48 = vsel %vm2244_vm9, %v3641_v3, %v3645_v0 }
 0xaa0   :  { %3708 = vrot.lane.b32.xlu0 %v6948_v29, %s4923_s8  ;;  %3698 = vrot.lane.b32.xlu1 %v6950_v5, %s4923_s8  ;;  %v3661_v10 = vmul.f32 %v3654_v48, %v7568_v27 }
 0xaa2   :  { %v3649_v20 = vpop.permute.xlu0 %3648  ;;  %v3639_v17 = vpop.permute.xlu1 %3638 }
 0xaa3   :  { %v3652_v30 = vsel %vm2244_vm9, %v3645_v0, %v3649_v20  ;;  %v3658_v19 = vsel %vm2244_vm9, %v3649_v20, %v3637_v9 }
 0xaa4   :  { %3702 = vrot.lane.b32.xlu1 %v6957_v18, %s4923_s8  ;;  %3796 = vperm.xlu0 %4843, %v3793_v13   ;;  %v3662_v51 = vmul.f32 %v3652_v30, %v7586_v46 }
 0xaa6   :  { %v3577_v47 = vpop.permute.xlu0 %3576  ;;  %v3643_v62 = vpop.permute.xlu1 %3642 }
 0xaa7   :  { %v3657_v24 = vsel %vm2244_vm9, %v3639_v17, %v3643_v62 }
 0xaa8   :  { %3706 = vrot.lane.b32.xlu1 %v6963_v42, %s4923_s8  ;;  %v3664_v58 = vmul.f32 %v3657_v24, %v7571_v22  ;;  %v3663_v22 = vmul.f32 %v3658_v19, %v7587_v41 }
 0xaaa   :  { %v3581_v2 = vpop.permute.xlu0 %3580  ;;  %v3647_v53 = vpop.permute.xlu1 %3646  ;;  %v4739_v12 = vpack.c.bf16 %v3664_v58, %v3660_v43 }
 0xaab   :  { %v3655_v14 = vsel %vm2244_vm9, %v3643_v62, %v3647_v53 }
 0xaac   :  { %v3665_v63 = vmul.f32 %v3655_v14, %v7568_v27  ;;  %3710 = vrot.lane.b32.xlu1 %v6969_v55, %s4923_s8 }
 0xaae   :  { %v3585_v52 = vpop.permute.xlu0 %3584  ;;  %v3651_v28 = vpop.permute.xlu1 %3650  ;;  %v4740_v56 = vpack.c.bf16 %v3665_v63, %v3661_v10 }
 0xaaf   :  { %v3653_v16 = vsel %vm2244_vm9, %v3647_v53, %v3651_v28  ;;  %v3659_v27 = vsel %vm2244_vm9, %v3651_v28, %v3639_v17  ;;  %v3594_v3 = vsel %vm2107_vm11, %v3581_v2, %v3585_v52 }
 0xab0   :  { %v3666_v35 = vmul.f32 %v3653_v16, %v7586_v46  ;;  %v3667_v1 = vmul.f32 %v3659_v27, %v7587_v41  ;;  %3993 = vmatprep.subr.bf16.mxu0 %v4740_v56  ;;  %v3596_v46 = vsel %vm2107_vm11, %v3577_v47, %v3581_v2  ;;  %v3601_v17 = vmul.f32 %v3594_v3, %v7581_v44 }
 0xab1   :  { %3994 = vmatpush1.bf16.msra.mxu0 %v4739_v12  ;;  %v3600_v62 = vmul.f32 %v3596_v46, %v7580_v15 }
 0xab2   :  { %v4741_v50 = vpack.c.bf16 %v3666_v35, %v3662_v51  ;;  %v3589_v40 = vpop.permute.xlu0 %3588  ;;  %v3579_v6 = vpop.permute.xlu1 %3578  ;;  %v4742_v61 = vpack.c.bf16 %v3667_v1, %v3663_v22  ;;  %v7630_v22 = vld [vmem:[#allocation64_spill] sm:$0xff] }
 0xab3   :  { %v3592_v24 = vsel %vm2107_vm11, %v3585_v52, %v3589_v40  ;;  %v3598_v48 = vsel %vm2107_vm11, %v3589_v40, %v3577_v47  ;;  %v3485_v35 = vmul.f32 %v6957_v18, %v7630_v22 }
 0xab4   :  { %4034 = vmatprep.subr.bf16.mxu1 %v4742_v61 }
 0xab5   :  { %4035 = vmatpush1.bf16.msra.mxu1 %v4741_v50 }
 0xab6   :  { %v3517_v8 = vpop.permute.xlu0 %3516  ;;  %v3583_v49 = vpop.permute.xlu1 %3582 }
 0xab7   :  { %v3597_v60 = vsel %vm2107_vm11, %v3579_v6, %v3583_v49 }
 0xab8   :  { %v3604_v0 = vmul.f32 %v3597_v60, %v7580_v15  ;;  %v3603_v15 = vmul.f32 %v3598_v48, %v6568_v33 }
 0xaba   :  { %v3521_v41 = vpop.permute.xlu0 %3520  ;;  %v3587_v9 = vpop.permute.xlu1 %3586  ;;  %v4735_v53 = vpack.c.bf16 %v3604_v0, %v3600_v62 }
 0xabb   :  { %v3595_v20 = vsel %vm2107_vm11, %v3583_v49, %v3587_v9  ;;  %v3481_v49 = vmul.f32 %v6935_v54, %v7630_v22 }
 0xabc   :  { %v3605_v4 = vmul.f32 %v3595_v20, %v7581_v44  ;;  %v3602_v44 = vmul.f32 %v3592_v24, %v6491_v37 }
 0xabe   :  { %v3525_v13 = vpop.permute.xlu0 %3524  ;;  %v3591_v57 = vpop.permute.xlu1 %3590  ;;  %v4736_v2 = vpack.c.bf16 %v3605_v4, %v3601_v17 }
 0xabf   :  { %v3593_v58 = vsel %vm2107_vm11, %v3587_v9, %v3591_v57  ;;  %v3599_v14 = vsel %vm2107_vm11, %v3591_v57, %v3579_v6  ;;  %v3534_v12 = vsel %vm1970_vm10, %v3521_v41, %v3525_v13 }
 0xac0   :  { %v3606_v10 = vmul.f32 %v3593_v58, %v6491_v37  ;;  %v3607_v63 = vmul.f32 %v3599_v14, %v6568_v33  ;;  %3995 = vmatprep.subr.bf16.mxu0 %v4736_v2  ;;  %v3536_v37 = vsel %vm1970_vm10, %v3517_v8, %v3521_v41  ;;  %v3541_v1 = vmul.f32 %v3534_v12, %v7589_v25  ;;  %v7631_v41 = vld [vmem:[#allocation65_spill] sm:$0xff]  ;;  %v7632_v14 = vld [vmem:[#allocation76_spill] sm:$0xff] }
 0xac1   :  { %3996 = vmatpush1.bf16.msra.mxu0 %v4735_v53  ;;  %v3540_v40 = vmul.f32 %v3536_v37, %v7602_v34  ;;  %v3484_v18 = vmul.f32 %v6950_v5, %v7631_v41  ;;  %v3480_v5 = vmul.f32 %v6933_v45, %v7631_v41  ;;  %v3486_v2 = vmul.f32 %v6963_v42, %v7623_v59 }
 0xac2   :  { %v4737_v47 = vpack.c.bf16 %v3606_v10, %v3602_v44  ;;  %v3529_v43 = vpop.permute.xlu0 %3528  ;;  %v3519_v30 = vpop.permute.xlu1 %3518  ;;  %v4738_v19 = vpack.c.bf16 %v3607_v63, %v3603_v15  ;;  %v3482_v45 = vmul.f32 %v6943_v36, %v7623_v59 }
 0xac3   :  { %v3532_v6 = vsel %vm1970_vm10, %v3525_v13, %v3529_v43  ;;  %v3538_v61 = vsel %vm1970_vm10, %v3529_v43, %v3517_v8  ;;  %v4728_v8 = vpack.c.bf16 %v3485_v35, %v3481_v49  ;;  %v3483_v13 = vmul.f32 %v6948_v29, %v7609_v38 }
 0xac4   :  { %4036 = vmatprep.subr.bf16.mxu1 %v4738_v19  ;;  %v3542_v20 = vmul.f32 %v3532_v6, %v6751_v11  ;;  %v3543_v54 = vmul.f32 %v3538_v61, %v6725_v31  ;;  %v4727_v57 = vpack.c.bf16 %v3484_v18, %v3480_v5  ;;  %v4729_v29 = vpack.c.bf16 %v3486_v2, %v3482_v45 }
 0xac5   :  { %4037 = vmatpush1.bf16.msra.mxu1 %v4737_v47 }
 0xac6   :  { %v3421_v52 = vpop.permute.xlu0 %3420  ;;  %v3523_v28 = vpop.permute.xlu1 %3522 }
 0xac7   :  { %v3537_v56 = vsel %vm1970_vm10, %v3519_v30, %v3523_v28 }
 0xac8   :  { %v3544_v27 = vmul.f32 %v3537_v56, %v7602_v34 }
 0xaca   :  { %v3425_v33 = vpop.permute.xlu0 %3424  ;;  %v3527_v16 = vpop.permute.xlu1 %3526  ;;  %v4731_v9 = vpack.c.bf16 %v3544_v27, %v3540_v40 }
 0xacb   :  { %v3535_v51 = vsel %vm1970_vm10, %v3523_v28, %v3527_v16 }
 0xacc   :  { %v3545_v50 = vmul.f32 %v3535_v51, %v7589_v25  ;;  %v3487_v25 = vmul.f32 %v6969_v55, %v7609_v38 }
 0xace   :  { %v3429_v60 = vpop.permute.xlu0 %3428  ;;  %v3531_v3 = vpop.permute.xlu1 %3530  ;;  %v4732_v46 = vpack.c.bf16 %v3545_v50, %v3541_v1 }
 0xacf   :  { %v3533_v34 = vsel %vm1970_vm10, %v3527_v16, %v3531_v3  ;;  %v3539_v0 = vsel %vm1970_vm10, %v3531_v3, %v3519_v30  ;;  %v3438_v43 = vsel %vm1745_vm6, %v3425_v33, %v3429_v60 }
 0xad0   :  { %v3546_v17 = vmul.f32 %v3533_v34, %v6751_v11  ;;  %v3547_v4 = vmul.f32 %v3539_v0, %v6725_v31  ;;  %3997 = vmatprep.subr.bf16.mxu0 %v4732_v46  ;;  %v4730_v11 = vpack.c.bf16 %v3487_v25, %v3483_v13  ;;  %v3440_v31 = vsel %vm1745_vm6, %v3421_v52, %v3425_v33  ;;  %v7633_v0 = vld [vmem:[#allocation81_spill] sm:$0xff] }
 0xad1   :  { %3998 = vmatpush1.bf16.msra.mxu0 %v4731_v9  ;;  %v3445_v44 = vmul.f32 %v3440_v31, %v7632_v14  ;;  %v3446_v33 = vmul.f32 %v3438_v43, %v5987_v32 }
 0xad2   :  { %v4733_v55 = vpack.c.bf16 %v3546_v17, %v3542_v20  ;;  %v3433_v62 = vpop.permute.xlu0 %3432  ;;  %3999 = vmatprep.subr.bf16.mxu0 %v4728_v8  ;;  %v3423_v24 = vpop.permute.xlu1 %3422  ;;  %v4734_v48 = vpack.c.bf16 %v3547_v4, %v3543_v54  ;;  %v7634_v54 = vld [vmem:[#allocation82_spill] sm:$0xff]  ;;  %v7635_v4 = vld [vmem:[#allocation83_spill] sm:$0xff] }
 0xad3   :  { %v3436_v59 = vsel %vm1745_vm6, %v3429_v60, %v3433_v62  ;;  %v3442_v36 = vsel %vm1745_vm6, %v3433_v62, %v3421_v52 }
 0xad4   :  { %4038 = vmatprep.subr.bf16.mxu1 %v4734_v48  ;;  %v3444_v37 = vmul.f32 %v3442_v36, %v5990_v21  ;;  %v3447_v16 = vmul.f32 %v3436_v59, %v5994_v39 }
 0xad5   :  { %4000 = vmatpush1.bf16.msra.mxu0 %v4727_v57  ;;  %4039 = vmatpush1.bf16.msra.mxu1 %v4733_v55 }
 0xad6   :  { %v3361_v53 = vpop.permute.xlu0 %3360  ;;  %4040 = vmatprep.subr.bf16.mxu1 %v4730_v11  ;;  %v3427_v58 = vpop.permute.xlu1 %3426 }
 0xad7   :  { %v3441_v38 = vsel %vm1745_vm6, %v3423_v24, %v3427_v58 }
 0xad8   :  { %v3449_v42 = vmul.f32 %v3441_v38, %v7632_v14  ;;  %v7636_v38 = vld [vmem:[#allocation84_spill] sm:$0xff] }
 0xad9   :  { %4041 = vmatpush1.bf16.msra.mxu1 %v4729_v29 }
 0xada   :  { %v3365_v15 = vpop.permute.xlu0 %3364  ;;  %v3431_v10 = vpop.permute.xlu1 %3430  ;;  %v4724_v63 = vpack.c.bf16 %v3449_v42, %v3445_v44 }
 0xadb   :  { %v3439_v47 = vsel %vm1745_vm6, %v3427_v58, %v3431_v10  ;;  %v3380_v40 = vsel %vm1608_vm5, %v3361_v53, %v3365_v15 }
 0xadc   :  { %4001 = vmatprep.subr.bf16.mxu0 %v4724_v63  ;;  %v3450_v28 = vmul.f32 %v3439_v47, %v5987_v32 }
 0xade   :  { %v3369_v30 = vpop.permute.xlu0 %3368  ;;  %v3435_v19 = vpop.permute.xlu1 %3434  ;;  %v4725_v50 = vpack.c.bf16 %v3450_v28, %v3446_v33 }
 0xadf   :  { %v3437_v56 = vsel %vm1745_vm6, %v3431_v10, %v3435_v19  ;;  %v3443_v12 = vsel %vm1745_vm6, %v3435_v19, %v3423_v24  ;;  %v3378_v25 = vsel %vm1608_vm5, %v3365_v15, %v3369_v30 }
 0xae0   :  { %v3448_v27 = vmul.f32 %v3443_v12, %v5990_v21  ;;  %v3451_v52 = vmul.f32 %v3437_v56, %v5994_v39  ;;  %v3385_v39 = vmul.f32 %v3380_v40, %v5998_v23  ;;  %v3386_v24 = vmul.f32 %v3378_v25, %v7633_v0  ;;  %v7638_v12 = vld [vmem:[#allocation86_spill] sm:$0xff] }
 0xae2   :  { %v4723_v51 = vpack.c.bf16 %v3448_v27, %v3444_v37  ;;  %v3373_v22 = vpop.permute.xlu0 %3372  ;;  %v3363_v35 = vpop.permute.xlu1 %3362  ;;  %v4726_v1 = vpack.c.bf16 %v3451_v52, %v3447_v16  ;;  %v7639_v16 = vld [vmem:[#allocation87_spill] sm:$0xff] }
 0xae3   :  { %v3376_v41 = vsel %vm1608_vm5, %v3369_v30, %v3373_v22  ;;  %v3382_v18 = vsel %vm1608_vm5, %v3373_v22, %v3361_v53  ;;  %v7637_v30 = vld [vmem:[#allocation85_spill] sm:$0xff] }
 0xae4   :  { %4002 = vmatpush1.bf16.msra.mxu0 %v4723_v51  ;;  %4042 = vmatprep.subr.bf16.mxu1 %v4726_v1  ;;  %v3384_v17 = vmul.f32 %v3382_v18, %v7634_v54  ;;  %v3387_v5 = vmul.f32 %v3376_v41, %v7635_v4 }
 0xae5   :  { %4043 = vmatpush1.bf16.msra.mxu1 %v4725_v50 }
 0xae6   :  { %v3301_v6 = vpop.permute.xlu0 %3300  ;;  %v3367_v61 = vpop.permute.xlu1 %3366 }
 0xae7   :  { %v3381_v21 = vsel %vm1608_vm5, %v3363_v35, %v3367_v61 }
 0xae8   :  { %v3389_v32 = vmul.f32 %v3381_v21, %v5998_v23 }
 0xaea   :  { %v3305_v49 = vpop.permute.xlu0 %3304  ;;  %v3371_v60 = vpop.permute.xlu1 %3370  ;;  %v4720_v3 = vpack.c.bf16 %v3389_v32, %v3385_v39  ;;  %v7640_v39 = vld [vmem:[#allocation88_spill] sm:$0xff] }
 0xaeb   :  { %v3379_v46 = vsel %vm1608_vm5, %v3367_v61, %v3371_v60  ;;  %v3320_v31 = vsel %vm1471_vm7, %v3301_v6, %v3305_v49 }
 0xaec   :  { %4003 = vmatprep.subr.bf16.mxu0 %v4720_v3  ;;  %v3390_v23 = vmul.f32 %v3379_v46, %v7633_v0  ;;  %v3325_v29 = vmul.f32 %v3320_v31, %v7636_v38 }
 0xaee   :  { %v3309_v9 = vpop.permute.xlu0 %3308  ;;  %v3375_v34 = vpop.permute.xlu1 %3374  ;;  %v4721_v11 = vpack.c.bf16 %v3390_v23, %v3386_v24  ;;  %v7641_v23 = vld [vmem:[#allocation89_spill] sm:$0xff] }
 0xaef   :  { %v3377_v8 = vsel %vm1608_vm5, %v3371_v60, %v3375_v34  ;;  %v3383_v20 = vsel %vm1608_vm5, %v3375_v34, %v3363_v35  ;;  %v3318_v59 = vsel %vm1471_vm7, %v3305_v49, %v3309_v9 }
 0xaf0   :  { %v3388_v55 = vmul.f32 %v3383_v20, %v7634_v54  ;;  %v3391_v62 = vmul.f32 %v3377_v8, %v7635_v4  ;;  %v3326_v51 = vmul.f32 %v3318_v59, %v7637_v30 }
 0xaf2   :  { %v4719_v48 = vpack.c.bf16 %v3388_v55, %v3384_v17  ;;  %v3313_v13 = vpop.permute.xlu0 %3312  ;;  %v3303_v57 = vpop.permute.xlu1 %3302  ;;  %v4722_v2 = vpack.c.bf16 %v3391_v62, %v3387_v5  ;;  %v7642_v17 = vld [vmem:[#allocation90_spill] sm:$0xff]  ;;  %v7643_v5 = vld [vmem:[#allocation91_spill] sm:$0xff] }
 0xaf3   :  { %v3316_v63 = vsel %vm1471_vm7, %v3309_v9, %v3313_v13  ;;  %v3322_v47 = vsel %vm1471_vm7, %v3313_v13, %v3301_v6 }
 0xaf4   :  { %4004 = vmatpush1.bf16.msra.mxu0 %v4719_v48  ;;  %4044 = vmatprep.subr.bf16.mxu1 %v4722_v2  ;;  %v3324_v37 = vmul.f32 %v3322_v47, %v7638_v12  ;;  %v3327_v27 = vmul.f32 %v3316_v63, %v7639_v16 }
 0xaf5   :  { %4045 = vmatpush1.bf16.msra.mxu1 %v4721_v11 }
 0xaf6   :  { %v3241_v45 = vpop.permute.xlu0 %3240  ;;  %v3307_v53 = vpop.permute.xlu1 %3306 }
 0xaf7   :  { %v3321_v58 = vsel %vm1471_vm7, %v3303_v57, %v3307_v53 }
 0xaf8   :  { %v3329_v14 = vmul.f32 %v3321_v58, %v7636_v38 }
 0xafa   :  { %v3245_v44 = vpop.permute.xlu0 %3244  ;;  %v3311_v42 = vpop.permute.xlu1 %3310  ;;  %v4716_v15 = vpack.c.bf16 %v3329_v14, %v3325_v29 }
 0xafb   :  { %v3319_v10 = vsel %vm1471_vm7, %v3307_v53, %v3311_v42  ;;  %v3260_v6 = vsel %vm1334_vm8, %v3241_v45, %v3245_v44 }
 0xafc   :  { %4005 = vmatprep.subr.bf16.mxu0 %v4716_v15  ;;  %v3330_v19 = vmul.f32 %v3319_v10, %v7637_v30  ;;  %v3265_v32 = vmul.f32 %v3260_v6, %v7640_v39  ;;  %v4903_v10 = vld [vmem:[%s7321_s4 + $0x28] ss:$0 sm:$0xff] }
 0xafe   :  { %v3249_v36 = vpop.permute.xlu0 %3248  ;;  %v3315_v43 = vpop.permute.xlu1 %3314  ;;  %v4717_v40 = vpack.c.bf16 %v3330_v19, %v3326_v51 }
 0xaff   :  { %v3317_v28 = vsel %vm1471_vm7, %v3311_v42, %v3315_v43  ;;  %v3323_v56 = vsel %vm1471_vm7, %v3315_v43, %v3303_v57  ;;  %v3258_v9 = vsel %vm1334_vm8, %v3245_v44, %v3249_v36  ;;  %v4902_v44 = vld [vmem:[%s7321_s4 + $0x20] ss:$0 sm:$0xff] }
 0xb00   :  { %v3328_v52 = vmul.f32 %v3323_v56, %v7638_v12  ;;  %v3331_v33 = vmul.f32 %v3317_v28, %v7639_v16  ;;  %v3266_v48 = vmul.f32 %v3258_v9, %v7641_v23 }
 0xb02   :  { %v4715_v22 = vpack.c.bf16 %v3328_v52, %v3324_v37  ;;  %v3253_v35 = vpop.permute.xlu0 %3252  ;;  %v3243_v1 = vpop.permute.xlu1 %3242  ;;  %v4718_v50 = vpack.c.bf16 %v3331_v33, %v3327_v27  ;;  %v4904_v37 = vld [vmem:[%s7321_s4 + $0x30] ss:$0 sm:$0xff]  ;;  %v4905_v27 = vld [vmem:[%s7321_s4 + $0x38] ss:$0 sm:$0xff] }
 0xb03   :  { %v3256_v18 = vsel %vm1334_vm8, %v3249_v36, %v3253_v35  ;;  %v3262_v25 = vsel %vm1334_vm8, %v3253_v35, %v3241_v45 }
 0xb04   :  { %4006 = vmatpush1.bf16.msra.mxu0 %v4715_v22  ;;  %4046 = vmatprep.subr.bf16.mxu1 %v4718_v50  ;;  %v3264_v4 = vmul.f32 %v3262_v25, %v7642_v17  ;;  %v3267_v55 = vmul.f32 %v3256_v18, %v7643_v5 }
 0xb05   :  { %4047 = vmatpush1.bf16.msra.mxu1 %v4717_v40 }
 0xb06   :  { %v3247_v61 = vpop.permute.xlu1 %3246  ;;  %v3697_v49 = vpop.permute.xlu0 %3696 }
 0xb07   :  { %v3261_v21 = vsel %vm1334_vm8, %v3243_v1, %v3247_v61 }
 0xb08   :  { %v3269_v60 = vmul.f32 %v3261_v21, %v7640_v39 }
 0xb0a   :  { %v3251_v3 = vpop.permute.xlu1 %3250  ;;  %v4712_v46 = vpack.c.bf16 %v3269_v60, %v3265_v32  ;;  %v3701_v34 = vpop.permute.xlu0 %3700 }
 0xb0b   :  { %v3259_v41 = vsel %vm1334_vm8, %v3247_v61, %v3251_v3  ;;  %v3716_v38 = vsel %vm2381_vm12, %v3697_v49, %v3701_v34 }
 0xb0c   :  { %4007 = vmatprep.subr.bf16.mxu0 %v4712_v46  ;;  %v3270_v8 = vmul.f32 %v3259_v41, %v7641_v23  ;;  %v3720_v59 = vmul.f32 %v4902_v44, %v3716_v38 }
 0xb0e   :  { %v3255_v0 = vpop.permute.xlu1 %3254  ;;  %v4713_v11 = vpack.c.bf16 %v3270_v8, %v3266_v48  ;;  %v3705_v31 = vpop.permute.xlu0 %3704 }
 0xb0f   :  { %v3257_v20 = vsel %vm1334_vm8, %v3251_v3, %v3255_v0  ;;  %v3263_v54 = vsel %vm1334_vm8, %v3255_v0, %v3243_v1  ;;  %v3714_v58 = vsel %vm2381_vm12, %v3701_v34, %v3705_v31 }
 0xb10   :  { %v3268_v62 = vmul.f32 %v3263_v54, %v7642_v17  ;;  %v3271_v24 = vmul.f32 %v3257_v20, %v7643_v5  ;;  %v3721_v63 = vmul.f32 %v4903_v10, %v3714_v58 }
 0xb12   :  { %v4711_v13 = vpack.c.bf16 %v3268_v62, %v3264_v4  ;;  %v3699_v57 = vpop.permute.xlu1 %3698  ;;  %v4714_v2 = vpack.c.bf16 %v3271_v24, %v3267_v55  ;;  %v3709_v29 = vpop.permute.xlu0 %3708 }
 0xb13   :  { %v3712_v36 = vsel %vm2381_vm12, %v3705_v31, %v3709_v29  ;;  %v3718_v43 = vsel %vm2381_vm12, %v3709_v29, %v3697_v49 }
 0xb14   :  { %4008 = vmatpush1.bf16.msra.mxu0 %v4711_v13  ;;  %4048 = vmatprep.subr.bf16.mxu1 %v4714_v2  ;;  %v3722_v16 = vmul.f32 %v4904_v37, %v3712_v36  ;;  %v3723_v52 = vmul.f32 %v4905_v27, %v3718_v43 }
 0xb15   :  { %4049 = vmatpush1.bf16.msra.mxu1 %v4713_v11 }
 0xb16   :  { %v3703_v45 = vpop.permute.xlu1 %3702 }
 0xb17   :  { %v3717_v53 = vsel %vm2381_vm12, %v3699_v57, %v3703_v45 }
 0xb18   :  { %v3724_v42 = vmul.f32 %v4902_v44, %v3717_v53 }
 0xb1a   :  { %v3707_v14 = vpop.permute.xlu1 %3706  ;;  %v4743_v28 = vpack.c.bf16 %v3724_v42, %v3720_v59 }
 0xb1b   :  { %v3715_v15 = vsel %vm2381_vm12, %v3703_v45, %v3707_v14 }
 0xb1c   :  { %v3725_v47 = vmul.f32 %v4903_v10, %v3715_v15 }
 0xb1e   :  { %v3711_v30 = vpop.permute.xlu1 %3710  ;;  %v4744_v19 = vpack.c.bf16 %v3725_v47, %v3721_v63 }
 0xb1f   :  { %v3713_v56 = vsel %vm2381_vm12, %v3707_v14, %v3711_v30  ;;  %v3719_v12 = vsel %vm2381_vm12, %v3711_v30, %v3699_v57  ;;  %v3797_v7 = vpop.permute.xlu0 %3796 }
 0xb20   :  { %v3726_v33 = vmul.f32 %v4904_v37, %v3713_v56  ;;  %v3727_v51 = vmul.f32 %v4905_v27, %v3719_v12  ;;  %4023 = vmatprep.subr.bf16.mxu0 %v4744_v19 }
 0xb21   :  { %4024 = vmatpush2.bf16.msra.mxu0 %v4743_v28 }
 0xb22   :  { %v4745_v22 = vpack.c.bf16 %v3726_v33, %v3722_v16  ;;  %v4746_v35 = vpack.c.bf16 %v3727_v51, %v3723_v52 }
 0xb24   :  { %4026 = vmatmul.mubr.bf16.vlgmr.msra.gmra.mxu0 %v7078_v26  ;;  %4064 = vmatprep.subr.bf16.mxu1 %v4746_v35 }
 0xb25   :  { %4065 = vmatpush2.bf16.msra.mxu1 %v4745_v22 }
 0xb28   :  { %4067 = vmatmul.mubr.bf16.vlgmr.msra.gmra.mxu1 %v7078_v26 }
 0xbe4   :  { %v4027_v1 = vpop.f32.mrf.mxu0 }
 0xbe5   :  { %v4028_v50 = vadd.f32 %v4027_v1, %v3797_v7 }
 0xbe6   :  { %v4029_v40 = vpop.f32.mrf.mxu0 }
 0xbe7   :  { %v4030_v6 = vadd.f32 %v4029_v40, %v3797_v7  ;;  %4894 = vtanh.f32 %v4028_v50 }
 0xbe8   :  { %v4031_v61 = vpop.f32.mrf.mxu0  ;;  %v4068_v21 = vpop.f32.mrf.mxu1 }
 0xbe9   :  { %v4069_v39 = vadd.f32 %v4068_v21, %v3797_v7  ;;  %4896 = vtanh.f32 %v4030_v6 }
 0xbea   :  { %v4032_v32 = vpop.f32.mrf.mxu0  ;;  %v4070_v49 = vpop.f32.mrf.mxu1 }
 0xbeb   :  { %v4071_v60 = vadd.f32 %v4070_v49, %v3797_v7  ;;  %4898 = vtanh.f32 %v4069_v39 }
 0xbec   :  { %v4072_v3 = vpop.f32.mrf.mxu1 }
 0xbed   :  { %4900 = vtanh.f32 %v4071_v60 }
 0xbee   :  { %v4073_v46 = vpop.f32.mrf.mxu1 }
 0xbf4   :  { %v4895_v41 = vpop.eup %4894 }
 0xbf6   :  { %v4897_v18 = vpop.eup %4896 }
 0xbf7   :  { %v4083_v26 = vcombine.low %v4895_v41, %v4897_v18 }
 0xbf8   :  { %v4899_v25 = vpop.eup %4898 }
 0xbf9   :  { %4087 = vst [vmem:[%s7325_s14] sm:$0x77] %v4083_v26 }
 0xbfa   :  { %v4901_v9 = vpop.eup %4900 }
 0xbfb   :  { %v4084_v34 = vcombine.low %v4899_v25, %v4901_v9 }
 0xbfd   :  { %4088 = vst [vmem:[%s7325_s14 + $0x8] sm:$0x77] %v4084_v34 }

</bundles_post_ra>
